<compile_context>
chip_gen: v7x
topology: tpu7x:2x2x1
jax: 0.10.0
libtpu: 0.0.40
codegen_flags: <defaults>
</compile_context>

<pallas_src>
import functools
import math

import jax
import jax.numpy as jnp
from jax.experimental import pallas as pl
from jax.experimental.pallas import tpu as pltpu

LANE = 128


def _round_up(x, m):
    return ((x + m - 1) // m) * m


def _vmem_capacity_bytes():
    try:
        return int(pltpu.get_tpu_info().vmem_capacity_bytes)
    except Exception:
        return 64 * 1024 * 1024                     # conservative (v7x-sized) default


_VMEM_CAP = _vmem_capacity_bytes()
# Scoped-VMEM budget: half of physical VMEM leaves room for double-buffering + compiler scratch.
VMEM_LIMIT = min(_VMEM_CAP // 2, 64 * 1024 * 1024)
# GEMM tile maxima: bigger tiles on 128 MiB parts (v5e/v6e), smaller on 64 MiB (v7x).
if _VMEM_CAP >= 96 * 1024 * 1024:
    GEMM_TM_MAX, GEMM_TN_MAX, GEMM_TK_MAX = 256, 1024, 1024
else:
    GEMM_TM_MAX, GEMM_TN_MAX, GEMM_TK_MAX = 256, 512, 512


def _cparams(sem):
    return pltpu.CompilerParams(dimension_semantics=sem, vmem_limit_bytes=VMEM_LIMIT)


# ---------------------------------------------------------------------------
# Tiled GEMM:  (M, K) @ (K, N) + bias[:, None]   (N = long, lane-dense axis)
# Output block is resident across the k axis -> accumulate directly into o_ref.
# ---------------------------------------------------------------------------

def _gemm_kernel(a_ref, b_ref, bias_ref, o_ref):
    k = pl.program_id(2)

    @pl.when(k == 0)
    def _init():
        o_ref[...] = jnp.zeros_like(o_ref)

    o_ref[...] += jnp.dot(a_ref[...], b_ref[...], preferred_element_type=jnp.float32)

    @pl.when(k == pl.num_programs(2) - 1)
    def _fini():
        o_ref[...] += bias_ref[...]


def pallas_gemm(a, b, bias):
    M, K = a.shape
    K2, N = b.shape
    assert K == K2
    tm = min(GEMM_TM_MAX, _round_up(M, 8))
    tn = min(GEMM_TN_MAX, _round_up(N, LANE))
    tk = min(GEMM_TK_MAX, _round_up(K, LANE))
    Mp, Kp, Np = _round_up(M, tm), _round_up(K, tk), _round_up(N, tn)
    a_p = a.astype(jnp.bfloat16)
    if (Mp, Kp) != (M, K):
        a_p = jnp.pad(a_p, ((0, Mp - M), (0, Kp - K)))
    b_p = b.astype(jnp.bfloat16)
    if (Kp, Np) != (K, N):
        b_p = jnp.pad(b_p, ((0, Kp - K), (0, Np - N)))
    bias_p = bias.astype(jnp.float32).reshape(M, 1)
    if Mp != M:
        bias_p = jnp.pad(bias_p, ((0, Mp - M), (0, 0)))
    out = pl.pallas_call(
        _gemm_kernel,
        grid=(Mp // tm, Np // tn, Kp // tk),
        in_specs=[
            pl.BlockSpec((tm, tk), lambda i, j, k: (i, k)),
            pl.BlockSpec((tk, tn), lambda i, j, k: (k, j)),
            pl.BlockSpec((tm, 1), lambda i, j, k: (i, 0)),
        ],
        out_specs=pl.BlockSpec((tm, tn), lambda i, j, k: (i, j)),
        out_shape=jax.ShapeDtypeStruct((Mp, Np), jnp.float32),
        compiler_params=_cparams(("parallel", "parallel", "arbitrary")),
    )(a_p, b_p, bias_p)
    if (Mp, Np) != (M, N):
        out = out[:M, :N]       # padded rows carry bias only; sliced away here
    return out


# ---------------------------------------------------------------------------
# Fused 3-tap convolution along the lane axis (no im2col materialization)
#   out[b, co, u] = sum_k  wk[k] @ xin[b, :, u + k]  + bias[co]
# xin carries the real signal at lane offset +1 (zero-padded elsewhere).
# The right halo is a single 128-lane block (not a second full tile).
# ---------------------------------------------------------------------------

def _conv3_kernel(x_ref, h_ref, w_ref, b_ref, o_ref):
    tt = x_ref.shape[-1]
    xw = jnp.concatenate([x_ref[0], h_ref[0]], axis=-1)                 # (Kp, tt + 128) bf16
    acc = jnp.dot(w_ref[0], xw[:, 0:tt], preferred_element_type=jnp.float32)
    acc = acc + jnp.dot(w_ref[1], xw[:, 1:tt + 1], preferred_element_type=jnp.float32)
    acc = acc + jnp.dot(w_ref[2], xw[:, 2:tt + 2], preferred_element_type=jnp.float32)
    o_ref[0] = acc + b_ref[...]


def pallas_conv3(xin, wk, bias, tt):
    """xin: (B, Kp, L + 128) bf16, signal at lane offset +1.  wk: (3, Cout, Kp).  bias: (Cout,).
    Returns (B, Cout, L) f32."""
    B, Kp, Ltot = xin.shape
    L = Ltot - LANE
    nJ = L // tt
    halo_blocks = tt // LANE
    Cout = wk.shape[1]
    return pl.pallas_call(
        _conv3_kernel,
        grid=(B, nJ),
        in_specs=[
            pl.BlockSpec((1, Kp, tt), lambda b, j: (b, 0, j)),                        # main tile
            pl.BlockSpec((1, Kp, LANE), lambda b, j: (b, 0, (j + 1) * halo_blocks)),  # 128-lane halo
            pl.BlockSpec((3, Cout, Kp), lambda b, j: (0, 0, 0)),
            pl.BlockSpec((Cout, 1), lambda b, j: (0, 0)),
        ],
        out_specs=pl.BlockSpec((1, Cout, tt), lambda b, j: (b, 0, j)),
        out_shape=jax.ShapeDtypeStruct((B, Cout, L), jnp.float32),
        compiler_params=_cparams(("parallel", "parallel")),
    )(xin, xin, wk.astype(jnp.bfloat16), bias.reshape(-1, 1).astype(jnp.float32))


# ---------------------------------------------------------------------------
# Fused BatchNorm-apply + LeakyReLU, tiled, bf16 output.
# Padded / garbage lanes are NOT masked: every consumer re-slices to the valid region.
# ---------------------------------------------------------------------------

def _bn_lrelu_kernel(x_ref, s_ref, t_ref, o_ref, *, slope):
    y = x_ref[0] * s_ref[...] + t_ref[...]
    o_ref[0] = jnp.where(y >= 0.0, y, slope * y).astype(o_ref.dtype)


def pallas_bn_lrelu(x, scale, shift, tt, slope=0.01, rb_max=512):
    B, R, L = x.shape
    rb = min(rb_max, _round_up(R, 8))
    Rp = _round_up(R, rb)
    if Rp != R:
        x = jnp.pad(x, ((0, 0), (0, Rp - R), (0, 0)))
        scale = jnp.pad(scale, (0, Rp - R))
        shift = jnp.pad(shift, (0, Rp - R))
    out = pl.pallas_call(
        functools.partial(_bn_lrelu_kernel, slope=slope),
        grid=(B, Rp // rb, L // tt),
        in_specs=[
            pl.BlockSpec((1, rb, tt), lambda b, i, j: (b, i, j)),
            pl.BlockSpec((rb, 1), lambda b, i, j: (i, 0)),
            pl.BlockSpec((rb, 1), lambda b, i, j: (i, 0)),
        ],
        out_specs=pl.BlockSpec((1, rb, tt), lambda b, i, j: (b, i, j)),
        out_shape=jax.ShapeDtypeStruct((B, Rp, L), jnp.bfloat16),
        compiler_params=_cparams(("parallel", "parallel", "parallel")),
    )(x.astype(jnp.float32),
      scale.reshape(Rp, 1).astype(jnp.float32),
      shift.reshape(Rp, 1).astype(jnp.float32))
    if Rp != R:
        out = out[:, :R, :]
    return out


# ---------------------------------------------------------------------------
# Generic tiled elementwise helper (flattened, lane-dense; pads only when needed)
# ---------------------------------------------------------------------------

def _ew_kernel(fn, n_in, *refs):
    ins = [r[...] for r in refs[:n_in]]
    res = fn(*ins)
    if not isinstance(res, tuple):
        res = (res,)
    for o_ref, r in zip(refs[n_in:], res):
        o_ref[...] = r


def pallas_elementwise(fn, n_out, *arrays):
    shape = arrays[0].shape
    L = math.prod(shape)
    lane = 512
    rows_needed = -(-L // lane)
    rowb = min(256, _round_up(rows_needed, 8))
    rows = _round_up(rows_needed, rowb)
    Lp = rows * lane
    flats = []
    for a in arrays:
        a = a.astype(jnp.float32).reshape(-1)
        if Lp != L:
            a = jnp.pad(a, (0, Lp - L))
        flats.append(a.reshape(rows, lane))
    spec = pl.BlockSpec((rowb, lane), lambda i: (i, 0))
    outs = pl.pallas_call(
        functools.partial(_ew_kernel, fn, len(arrays)),
        grid=(rows // rowb,),
        in_specs=[spec] * len(arrays),
        out_specs=tuple([spec] * n_out),
        out_shape=tuple([jax.ShapeDtypeStruct((rows, lane), jnp.float32)] * n_out),
        compiler_params=_cparams(("parallel",)),
    )(*flats)
    return [o.reshape(-1)[:L].reshape(shape) for o in outs]


def _act(x, kind):
    if kind == "sigmoid":
        return jax.nn.sigmoid(x)
    return jnp.tanh(x)


def pallas_stft_gate(g0, g1, re_s, im_s, re_w, im_w, activation):
    # mag*cos(phase) == re and mag*sin(phase) == im, so no transcendental beyond the two
    # activations is needed: pure VPU FMA otherwise (and 2 fewer HBM input slabs than v1).
    def fn(a, b, rs, is_, rw, iw):
        a0 = _act(a, activation)
        a1 = _act(b, activation)
        return a0 * rs + a1 * rw, a0 * is_ + a1 * iw
    re, im = pallas_elementwise(fn, 2, g0, g1, re_s, im_s, re_w, im_w)
    return re, im


def pallas_wave_blend(d0, d1, d2, ws, wv, bs, activation):
    def fn(a, b, c, x0, x1, x2):
        return _act(a, activation) * x0 + _act(b, activation) * x1 + _act(c, activation) * x2
    (out,) = pallas_elementwise(fn, 1, d0, d1, d2, ws, wv, bs)
    return out


# ---------------------------------------------------------------------------
# STFT glue (framing + real DFT, vectorized overlap-add inverse)
# ---------------------------------------------------------------------------

def _dft_mats(nfft):
    bins = nfft // 2 + 1
    n = jnp.arange(nfft, dtype=jnp.float32)
    k = jnp.arange(bins, dtype=jnp.float32)
    ang = 2.0 * jnp.pi * k[:, None] * n[None, :] / nfft
    return jnp.cos(ang), jnp.sin(ang)


def _hann(nfft):
    n = jnp.arange(nfft, dtype=jnp.float32)
    return 0.5 - 0.5 * jnp.cos(2.0 * jnp.pi * n / nfft)


def stft_forward(x, nfft, hop, window, cosm, sinm):
    """Returns (re, im, mag), each (B, C, bins, n_frames); phase is never materialized."""
    T = x.shape[-1]
    n_frames = (T - nfft) // hop + 1
    idx = jnp.arange(n_frames)[:, None] * hop + jnp.arange(nfft)[None, :]
    frames = x[:, :, idx] * window                                   # (B,C,nF,nfft)
    re = jnp.einsum("bcfn,kn->bckf", frames, cosm)
    im = -jnp.einsum("bcfn,kn->bckf", frames, sinm)
    mag = jnp.sqrt(re * re + im * im)
    return re, im, mag


def stft_inverse(re, im, nfft, hop, window, cosm, sinm):
    B, C, bins, nF = re.shape
    kweight = jnp.ones((bins,), jnp.float32).at[1:-1].set(2.0)
    rew = re * kweight[None, None, :, None]
    imw = im * kweight[None, None, :, None]
    frames = (jnp.einsum("bckf,kn->bcfn", rew, cosm)
              - jnp.einsum("bckf,kn->bcfn", imw, sinm)) / nfft
    frames = frames * window
    assert nfft % hop == 0   # TODO(synk): non-divisor hop would need a per-frame overlap-add
    R = nfft // hop
    chunks = frames.reshape(B, C, nF, R, hop)
    acc = jnp.zeros((B, C, nF + R - 1, hop), jnp.float32)
    w2 = (window * window).reshape(R, hop)
    wacc = jnp.zeros((nF + R - 1, hop), jnp.float32)
    for r in range(R):                                               # R = nfft // hop is small
        acc = acc.at[:, :, r:r + nF, :].add(chunks[:, :, :, r, :])
        wacc = wacc.at[r:r + nF, :].add(jnp.broadcast_to(w2[r], (nF, hop)))
    out = acc.reshape(B, C, (nF + R - 1) * hop)
    wsum = wacc.reshape(-1)
    return out / jnp.maximum(wsum, 1e-8)


# ---------------------------------------------------------------------------
# Conv layers
# ---------------------------------------------------------------------------

def stft_conv_layer(layer, x4, n_frames, tt):
    """x4: (B, Cin, F, >=n_frames); only the first n_frames frame columns are real.
    Returns (B, Cout, (F-2)//2, W) bf16 with real data in [..., :n_frames]."""
    B, Cin, F = x4.shape[:3]
    Fo, Fp = F - 2, (F - 2) // 2
    W = _round_up(n_frames + 2, tt)
    w, b = layer["w"], layer["b"]
    Cout = w.shape[0]
    Cinp = _round_up(Cin, 8)
    xr = x4[..., :n_frames].astype(jnp.bfloat16)
    if Cinp != Cin:
        xr = jnp.pad(xr, ((0, 0), (0, Cinp - Cin), (0, 0), (0, 0)))
    # TODO(synk): the kh (frequency-tap) stack below is still a 3x im2col in HBM; reading three
    #             row-offset blocks inside the conv kernel would remove these copies.
    x3 = jnp.stack([xr[:, :, kh:kh + Fo, :] for kh in range(3)], axis=1)   # (B,3,Cinp,Fo,nF)
    x3 = jnp.pad(x3, ((0, 0), (0, 0), (0, 0), (0, 0), (1, W - 1 - n_frames)))
    x3 = x3.reshape(B, 3 * Cinp, Fo * W)
    x3 = jnp.pad(x3, ((0, 0), (0, 0), (0, LANE)))                          # 128-lane right halo
    wq = jnp.pad(w, ((0, 0), (0, Cinp - Cin), (0, 0), (0, 0)))
    wk = jnp.transpose(wq, (3, 0, 2, 1)).reshape(3, Cout, 3 * Cinp)        # [kw, co, kh*Cinp+ci]
    y = pallas_conv3(x3, wk, b, tt)                                        # (B, Cout, Fo*W) f32
    # MaxPool2d((2,1)) over frequency pairs.
    y = y.reshape(B, Cout, Fo, W)[:, :, :2 * Fp, :]
    y = y.reshape(B, Cout, Fp, 2, W).max(axis=3)                           # (B, Cout, Fp, W)
    # BatchNorm1d((F-2)//2): stats pooled over (batch, Cout, frames), per-frequency gamma/beta;
    # two-pass mean / centered variance.
    v = y[..., :n_frames]
    mean = jnp.mean(v, axis=(0, 1, 3))
    var = jnp.mean(jnp.square(v - mean[None, None, :, None]), axis=(0, 1, 3))
    scale = layer["gamma"] * jax.lax.rsqrt(var + 1e-5)
    shift = layer["beta"] - mean * scale
    s_rows = jnp.tile(scale, Cout)                                         # row = co*Fp + fp
    t_rows = jnp.tile(shift, Cout)
    y = pallas_bn_lrelu(y.reshape(B, Cout * Fp, W), s_rows, t_rows, tt)
    return y.reshape(B, Cout, Fp, W)


def wave_conv_layer(layer, x3, T, tt, Lp):
    """x3: (B, Cin, >=T), real data in [..., :T].  Returns (B, Cout, Lp) bf16."""
    B, Cin = x3.shape[:2]
    w, b = layer["w"], layer["b"]
    Cout = w.shape[0]
    Cinp = _round_up(Cin, 8)
    xr = x3[..., :T].astype(jnp.bfloat16)
    # TODO(synk): the +1 offset / right-halo pad is one fused bf16 XLA copy per layer; an
    #             in-kernel left-halo read would remove it entirely.
    xin = jnp.pad(xr, ((0, 0), (0, Cinp - Cin), (1, Lp + LANE - 1 - T)))
    wk = jnp.pad(jnp.transpose(w, (2, 0, 1)), ((0, 0), (0, 0), (0, Cinp - Cin)))  # (3,Cout,Cinp)
    y = pallas_conv3(xin, wk, b, tt)                                       # (B, Cout, Lp) f32
    v = y[..., :T]
    mean = jnp.mean(v, axis=(0, 2))
    var = jnp.mean(jnp.square(v - mean[None, :, None]), axis=(0, 2))
    scale = layer["gamma"] * jax.lax.rsqrt(var + 1e-5)
    shift = layer["beta"] - mean * scale
    return pallas_bn_lrelu(y, scale, shift, tt)


# ---------------------------------------------------------------------------
# BlendNet forward
# ---------------------------------------------------------------------------

def blendnet_forward(p, wave_stft, wave, *, nfft, hop, activation):
    B, C, T = wave_stft.shape
    bins = nfft // 2 + 1
    window = _hann(nfft)
    cosm, sinm = _dft_mats(nfft)

    re_s, im_s, mag_s = stft_forward(wave_stft, nfft, hop, window, cosm, sinm)
    re_w, im_w, mag_w = stft_forward(wave, nfft, hop, window, cosm, sinm)
    Fr = mag_s.shape[-1]
    tt_s = min(512, _round_up(Fr + 2, LANE))

    # ---- STFT branch ----
    data = jnp.concatenate([mag_s, mag_w], axis=1)                         # (B, 2C, bins, Fr)
    data = (10.0 / math.log(10.0)) * jnp.log(jnp.maximum(data, 1e-8))      # 10*log10(clamp)
    for layer in p["conv_stft"]:
        data = stft_conv_layer(layer, data, Fr, tt_s)                      # (B, Cout, Fp, W) bf16
    Cf, Ff = data.shape[1], data.shape[2]
    xf = jnp.transpose(data[..., :Fr], (1, 2, 0, 3)).reshape(Cf * Ff, B * Fr)
    y = pallas_gemm(p["linear_stft"]["w"], xf, p["linear_stft"]["b"])      # (2*bins*C, B*Fr)
    y = y.reshape(bins, C, 2, B, Fr)
    g = jnp.transpose(y, (2, 3, 1, 0, 4))                                  # (2, B, C, bins, Fr)
    re, im = pallas_stft_gate(g[0], g[1], re_s, im_s, re_w, im_w, activation)
    blend_stft = stft_inverse(re, im, nfft, hop, window, cosm, sinm)       # (B, C, T)

    # ---- Wave branch ----
    tt_w = min(512, _round_up(T, LANE))
    Lp = _round_up(T, tt_w)
    data = jnp.stack([wave_stft, wave, blend_stft], axis=1).reshape(B, 3 * C, T)
    for layer in p["conv_wave"]:
        data = wave_conv_layer(layer, data, T, tt_w, Lp)                   # (B, Cout, Lp) bf16
    Cw = data.shape[1]
    xw = jnp.transpose(data[..., :T], (1, 0, 2)).reshape(Cw, B * T)
    y = pallas_gemm(p["linear_wave"]["w"], xw, p["linear_wave"]["b"])      # (3C, B*T)
    y = y.reshape(C, 3, B, T)
    d = jnp.transpose(y, (1, 2, 0, 3))                                     # (3, B, C, T)
    return pallas_wave_blend(d[0], d[1], d[2], wave_stft, wave, blend_stft, activation)


# ---------------------------------------------------------------------------
# Parameters (torch-style initialization / layouts)
# ---------------------------------------------------------------------------

def init_params(key, layers, channels, nfft):
    bins = nfft // 2 + 1
    blend = 2
    keys = iter(jax.random.split(key, 64))

    def unif(shape, bound):
        return jax.random.uniform(next(keys), shape, jnp.float32, -bound, bound)

    p = {}
    conv_stft = []
    f, in_ch = bins, blend * channels
    for j in range(layers):
        out_ch = 8 if j == 0 else 2 * in_ch
        bound = 1.0 / math.sqrt(in_ch * 9)
        f_out = (f - 2) // 2
        conv_stft.append({
            "w": unif((out_ch, in_ch, 3, 3), bound),
            "b": unif((out_ch,), bound),
            "gamma": jnp.ones((f_out,), jnp.float32),
            "beta": jnp.zeros((f_out,), jnp.float32),
        })
        f, in_ch = f_out, out_ch
    p["conv_stft"] = conv_stft

    lin_in, lin_out = f * in_ch, blend * bins * channels
    bound = 1.0 / math.sqrt(lin_in)
    p["linear_stft"] = {"w": unif((lin_out, lin_in), bound), "b": unif((lin_out,), bound)}

    conv_wave = []
    in_ch = (blend + 1) * channels
    for j in range(layers):
        out_ch = 8 if j == 0 else 2 * in_ch
        bound = 1.0 / math.sqrt(in_ch * 3)
        conv_wave.append({
            "w": unif((out_ch, in_ch, 3), bound),
            "b": unif((out_ch,), bound),
            "gamma": jnp.ones((out_ch,), jnp.float32),
            "beta": jnp.zeros((out_ch,), jnp.float32),
        })
        in_ch = out_ch
    p["conv_wave"] = conv_wave

    lw_in, lw_out = 2 ** (layers + 2), (blend + 1) * channels
    bound = 1.0 / math.sqrt(lw_in)
    p["linear_wave"] = {"w": unif((lw_out, lw_in), bound), "b": unif((lw_out,), bound)}
    return p


# ---------------------------------------------------------------------------

if __name__ == "__main__":
    layers, channels, nfft, hop = 2, 2, 64, 16
    activation = "sigmoid"
    B = 2
    n_frames = 8
    T = (n_frames - 1) * hop + nfft          # 176

    key = jax.random.PRNGKey(0)
    kp, kx1, kx2 = jax.random.split(key, 3)
    params = init_params(kp, layers, channels, nfft)
    wave_stft = jax.random.normal(kx1, (B, channels, T), jnp.float32)
    wave = jax.random.normal(kx2, (B, channels, T), jnp.float32)

    fwd = jax.jit(functools.partial(blendnet_forward,
                                    nfft=nfft, hop=hop, activation=activation))
    out = fwd(params, wave_stft, wave)
    out = jax.block_until_ready(out)
    assert out.shape == (B, channels, T), out.shape
    assert bool(jnp.all(jnp.isfinite(out)))
    print("KERNEL_OK")
</pallas_src>

<mosaic_0001>
module attributes {stable_mosaic.version = 11 : i64} {
  func.func @_conv3_kernel(%arg0: i32, %arg1: i32, %arg2: memref<1x24x128xbf16, #tpu.memory_space<vmem>>, %arg3: memref<1x24x128xbf16, #tpu.memory_space<vmem>>, %arg4: memref<3x8x24xbf16, #tpu.memory_space<vmem>>, %arg5: memref<8x1xf32, #tpu.memory_space<vmem>>, %arg6: memref<1x8x128xf32, #tpu.memory_space<vmem>>) attributes {dimension_semantics = [#tpu.dimension_semantics<parallel>, #tpu.dimension_semantics<parallel>], iteration_bounds = array<i64: 2, 31>, scalar_prefetch = 0 : i64, scratch_operands = 0 : i64, tpu.core_type = #tpu.core_type<tc>, window_params = [{transform_indices = @transform_0, window_bounds = array<i64: 1, 24, 128>}, {transform_indices = @transform_1, window_bounds = array<i64: 1, 24, 128>}, {pipeline_mode = #tpu.pipeline_mode<synchronous>, transform_indices = @transform_2, window_bounds = array<i64: 3, 8, 24>}, {pipeline_mode = #tpu.pipeline_mode<synchronous>, transform_indices = @transform_3, window_bounds = array<i64: 8, 1>}, {transform_indices = @transform_4, window_bounds = array<i64: 1, 8, 128>}]} {
    %c0 = arith.constant 0 : index
    %c0_0 = arith.constant 0 : index
    %c0_1 = arith.constant 0 : index
    %0 = vector.load %arg2[%c0, %c0_0, %c0_1] : memref<1x24x128xbf16, #tpu.memory_space<vmem>>, vector<1x24x128xbf16>
    %1 = vector.shape_cast %0 : vector<1x24x128xbf16> to vector<24x128xbf16>
    %c0_2 = arith.constant 0 : index
    %c0_3 = arith.constant 0 : index
    %c0_4 = arith.constant 0 : index
    %2 = vector.load %arg3[%c0_2, %c0_3, %c0_4] : memref<1x24x128xbf16, #tpu.memory_space<vmem>>, vector<1x24x128xbf16>
    %3 = vector.shape_cast %2 : vector<1x24x128xbf16> to vector<24x128xbf16>
    %4 = tpu.concatenate %1, %3 in 1 : vector<24x128xbf16>, vector<24x128xbf16> -> vector<24x256xbf16>
    %c0_5 = arith.constant 0 : index
    %c0_6 = arith.constant 0 : index
    %c0_7 = arith.constant 0 : index
    %5 = vector.load %arg4[%c0_5, %c0_6, %c0_7] : memref<3x8x24xbf16, #tpu.memory_space<vmem>>, vector<1x8x24xbf16>
    %6 = vector.shape_cast %5 : vector<1x8x24xbf16> to vector<8x24xbf16>
    %7 = vector.extract_strided_slice %4 {offsets = [0, 0], sizes = [24, 128], strides = [1, 1]} : vector<24x256xbf16> to vector<24x128xbf16>
    %cst = arith.constant dense<0.000000e+00> : vector<8x128xf32>
    %8 = tpu.matmul %6, %7, %cst {dimension_numbers = #tpu.dot_dimension_numbers<[1], [0], [0], [1], [0, 0, 1, 1], [], []>} : vector<8x24xbf16>, vector<24x128xbf16>, vector<8x128xf32> -> vector<8x128xf32>
    %c1 = arith.constant 1 : index
    %c0_8 = arith.constant 0 : index
    %c0_9 = arith.constant 0 : index
    %9 = vector.load %arg4[%c1, %c0_8, %c0_9] : memref<3x8x24xbf16, #tpu.memory_space<vmem>>, vector<1x8x24xbf16>
    %10 = vector.shape_cast %9 : vector<1x8x24xbf16> to vector<8x24xbf16>
    %11 = vector.extract_strided_slice %4 {offsets = [0, 1], sizes = [24, 128], strides = [1, 1]} : vector<24x256xbf16> to vector<24x128xbf16>
    %cst_10 = arith.constant dense<0.000000e+00> : vector<8x128xf32>
    %12 = tpu.matmul %10, %11, %cst_10 {dimension_numbers = #tpu.dot_dimension_numbers<[1], [0], [0], [1], [0, 0, 1, 1], [], []>} : vector<8x24xbf16>, vector<24x128xbf16>, vector<8x128xf32> -> vector<8x128xf32>
    %13 = arith.addf %8, %12 : vector<8x128xf32>
    %c2 = arith.constant 2 : index
    %c0_11 = arith.constant 0 : index
    %c0_12 = arith.constant 0 : index
    %14 = vector.load %arg4[%c2, %c0_11, %c0_12] : memref<3x8x24xbf16, #tpu.memory_space<vmem>>, vector<1x8x24xbf16>
    %15 = vector.shape_cast %14 : vector<1x8x24xbf16> to vector<8x24xbf16>
    %16 = vector.extract_strided_slice %4 {offsets = [0, 2], sizes = [24, 128], strides = [1, 1]} : vector<24x256xbf16> to vector<24x128xbf16>
    %cst_13 = arith.constant dense<0.000000e+00> : vector<8x128xf32>
    %17 = tpu.matmul %15, %16, %cst_13 {dimension_numbers = #tpu.dot_dimension_numbers<[1], [0], [0], [1], [0, 0, 1, 1], [], []>} : vector<8x24xbf16>, vector<24x128xbf16>, vector<8x128xf32> -> vector<8x128xf32>
    %18 = arith.addf %13, %17 : vector<8x128xf32>
    %c0_14 = arith.constant 0 : index
    %c0_15 = arith.constant 0 : index
    %19 = vector.load %arg5[%c0_14, %c0_15] : memref<8x1xf32, #tpu.memory_space<vmem>>, vector<8x1xf32>
    %20 = vector.broadcast %19 : vector<8x1xf32> to vector<8x128xf32>
    %21 = arith.addf %18, %20 : vector<8x128xf32>
    %c0_16 = arith.constant 0 : index
    %c0_17 = arith.constant 0 : index
    %c0_18 = arith.constant 0 : index
    %22 = vector.load %arg6[%c0_16, %c0_17, %c0_18] : memref<1x8x128xf32, #tpu.memory_space<vmem>>, vector<1x8x128xf32>
    %23 = vector.shape_cast %22 : vector<1x8x128xf32> to vector<8x128xf32>
    %24 = vector.shape_cast %21 : vector<8x128xf32> to vector<1x8x128xf32>
    tpu.vector_store %arg6[%c0_16, %c0_17, %c0_18], %24 {strides = array<i32>} : memref<1x8x128xf32, #tpu.memory_space<vmem>>, vector<1x8x128xf32>,
    return
  }
  func.func @transform_0(%arg0: i32, %arg1: i32) -> (i32, i32, i32) {
    %c0_i32 = arith.constant 0 : i32
    %c0_i32_0 = arith.constant 0 : i32
    return %arg0, %c0_i32, %arg1 : i32, i32, i32
  }
  func.func @transform_1(%arg0: i32, %arg1: i32) -> (i32, i32, i32) {
    %c1_i32 = arith.constant 1 : i32
    %0 = arith.addi %arg1, %c1_i32 : i32
    %c1_i32_0 = arith.constant 1 : i32
    %1 = arith.muli %0, %c1_i32_0 : i32
    %c0_i32 = arith.constant 0 : i32
    %c0_i32_1 = arith.constant 0 : i32
    return %arg0, %c0_i32, %1 : i32, i32, i32
  }
  func.func @transform_2(%arg0: i32, %arg1: i32) -> (i32, i32, i32) {
    %c0_i32 = arith.constant 0 : i32
    %c0_i32_0 = arith.constant 0 : i32
    %c0_i32_1 = arith.constant 0 : i32
    %c0_i32_2 = arith.constant 0 : i32
    return %c0_i32, %c0_i32_0, %c0_i32_1 : i32, i32, i32
  }
  func.func @transform_3(%arg0: i32, %arg1: i32) -> (i32, i32) {
    %c0_i32 = arith.constant 0 : i32
    %c0_i32_0 = arith.constant 0 : i32
    %c0_i32_1 = arith.constant 0 : i32
    return %c0_i32, %c0_i32_0 : i32, i32
  }
  func.func @transform_4(%arg0: i32, %arg1: i32) -> (i32, i32, i32) {
    %c0_i32 = arith.constant 0 : i32
    %c0_i32_0 = arith.constant 0 : i32
    return %arg0, %c0_i32, %arg1 : i32, i32, i32
  }
}

module attributes {stable_mosaic.version = 11 : i64} {
  func.func @_bn_lrelu_kernel(%arg0: i32, %arg1: i32, %arg2: i32, %arg3: memref<1x120x128xf32, #tpu.memory_space<vmem>>, %arg4: memref<120x1xf32, #tpu.memory_space<vmem>>, %arg5: memref<120x1xf32, #tpu.memory_space<vmem>>, %arg6: memref<1x120x128xbf16, #tpu.memory_space<vmem>>) attributes {dimension_semantics = [#tpu.dimension_semantics<parallel>, #tpu.dimension_semantics<parallel>, #tpu.dimension_semantics<parallel>], iteration_bounds = array<i64: 2, 1, 1>, scalar_prefetch = 0 : i64, scratch_operands = 0 : i64, tpu.core_type = #tpu.core_type<tc>, window_params = [{transform_indices = @transform_0, window_bounds = array<i64: 1, 120, 128>}, {transform_indices = @transform_1, window_bounds = array<i64: 120, 1>}, {transform_indices = @transform_2, window_bounds = array<i64: 120, 1>}, {transform_indices = @transform_3, window_bounds = array<i64: 1, 120, 128>}]} {
    %c0 = arith.constant 0 : index
    %c0_0 = arith.constant 0 : index
    %c0_1 = arith.constant 0 : index
    %0 = vector.load %arg3[%c0, %c0_0, %c0_1] : memref<1x120x128xf32, #tpu.memory_space<vmem>>, vector<1x120x128xf32>
    %1 = vector.shape_cast %0 : vector<1x120x128xf32> to vector<120x128xf32>
    %c0_2 = arith.constant 0 : index
    %c0_3 = arith.constant 0 : index
    %2 = vector.load %arg4[%c0_2, %c0_3] : memref<120x1xf32, #tpu.memory_space<vmem>>, vector<120x1xf32>
    %3 = vector.broadcast %2 : vector<120x1xf32> to vector<120x128xf32>
    %4 = arith.mulf %1, %3 : vector<120x128xf32>
    %c0_4 = arith.constant 0 : index
    %c0_5 = arith.constant 0 : index
    %5 = vector.load %arg5[%c0_4, %c0_5] : memref<120x1xf32, #tpu.memory_space<vmem>>, vector<120x1xf32>
    %6 = vector.broadcast %5 : vector<120x1xf32> to vector<120x128xf32>
    %7 = arith.addf %4, %6 : vector<120x128xf32>
    %cst = arith.constant 0.000000e+00 : f32
    %8 = vector.broadcast %cst : f32 to vector<120x128xf32>
    %9 = arith.cmpf oge, %7, %8 : vector<120x128xf32>
    %cst_6 = arith.constant 0.00999999977 : f32
    %10 = vector.broadcast %cst_6 : f32 to vector<120x128xf32>
    %11 = arith.mulf %10, %7 : vector<120x128xf32>
    %12 = arith.select %9, %7, %11 : vector<120x128xi1>, vector<120x128xf32>
    %13 = arith.truncf %12 : vector<120x128xf32> to vector<120x128xbf16>
    %c0_7 = arith.constant 0 : index
    %c0_8 = arith.constant 0 : index
    %c0_9 = arith.constant 0 : index
    %14 = vector.load %arg6[%c0_7, %c0_8, %c0_9] : memref<1x120x128xbf16, #tpu.memory_space<vmem>>, vector<1x120x128xbf16>
    %15 = vector.shape_cast %14 : vector<1x120x128xbf16> to vector<120x128xbf16>
    %16 = vector.shape_cast %13 : vector<120x128xbf16> to vector<1x120x128xbf16>
    tpu.vector_store %arg6[%c0_7, %c0_8, %c0_9], %16 {strides = array<i32>} : memref<1x120x128xbf16, #tpu.memory_space<vmem>>, vector<1x120x128xbf16>,
    return
  }
  func.func @transform_0(%arg0: i32, %arg1: i32, %arg2: i32) -> (i32, i32, i32) {
    %c0_i32 = arith.constant 0 : i32
    return %arg0, %arg1, %arg2 : i32, i32, i32
  }
  func.func @transform_1(%arg0: i32, %arg1: i32, %arg2: i32) -> (i32, i32) {
    %c0_i32 = arith.constant 0 : i32
    %c0_i32_0 = arith.constant 0 : i32
    return %arg1, %c0_i32 : i32, i32
  }
  func.func @transform_2(%arg0: i32, %arg1: i32, %arg2: i32) -> (i32, i32) {
    %c0_i32 = arith.constant 0 : i32
    %c0_i32_0 = arith.constant 0 : i32
    return %arg1, %c0_i32 : i32, i32
  }
  func.func @transform_3(%arg0: i32, %arg1: i32, %arg2: i32) -> (i32, i32, i32) {
    %c0_i32 = arith.constant 0 : i32
    return %arg0, %arg1, %arg2 : i32, i32, i32
  }
}

module attributes {stable_mosaic.version = 11 : i64} {
  func.func @_conv3_kernel(%arg0: i32, %arg1: i32, %arg2: memref<1x24x128xbf16, #tpu.memory_space<vmem>>, %arg3: memref<1x24x128xbf16, #tpu.memory_space<vmem>>, %arg4: memref<3x16x24xbf16, #tpu.memory_space<vmem>>, %arg5: memref<16x1xf32, #tpu.memory_space<vmem>>, %arg6: memref<1x16x128xf32, #tpu.memory_space<vmem>>) attributes {dimension_semantics = [#tpu.dimension_semantics<parallel>, #tpu.dimension_semantics<parallel>], iteration_bounds = array<i64: 2, 13>, scalar_prefetch = 0 : i64, scratch_operands = 0 : i64, tpu.core_type = #tpu.core_type<tc>, window_params = [{transform_indices = @transform_0, window_bounds = array<i64: 1, 24, 128>}, {transform_indices = @transform_1, window_bounds = array<i64: 1, 24, 128>}, {pipeline_mode = #tpu.pipeline_mode<synchronous>, transform_indices = @transform_2, window_bounds = array<i64: 3, 16, 24>}, {pipeline_mode = #tpu.pipeline_mode<synchronous>, transform_indices = @transform_3, window_bounds = array<i64: 16, 1>}, {transform_indices = @transform_4, window_bounds = array<i64: 1, 16, 128>}]} {
    %c0 = arith.constant 0 : index
    %c0_0 = arith.constant 0 : index
    %c0_1 = arith.constant 0 : index
    %0 = vector.load %arg2[%c0, %c0_0, %c0_1] : memref<1x24x128xbf16, #tpu.memory_space<vmem>>, vector<1x24x128xbf16>
    %1 = vector.shape_cast %0 : vector<1x24x128xbf16> to vector<24x128xbf16>
    %c0_2 = arith.constant 0 : index
    %c0_3 = arith.constant 0 : index
    %c0_4 = arith.constant 0 : index
    %2 = vector.load %arg3[%c0_2, %c0_3, %c0_4] : memref<1x24x128xbf16, #tpu.memory_space<vmem>>, vector<1x24x128xbf16>
    %3 = vector.shape_cast %2 : vector<1x24x128xbf16> to vector<24x128xbf16>
    %4 = tpu.concatenate %1, %3 in 1 : vector<24x128xbf16>, vector<24x128xbf16> -> vector<24x256xbf16>
    %c0_5 = arith.constant 0 : index
    %c0_6 = arith.constant 0 : index
    %c0_7 = arith.constant 0 : index
    %5 = vector.load %arg4[%c0_5, %c0_6, %c0_7] : memref<3x16x24xbf16, #tpu.memory_space<vmem>>, vector<1x16x24xbf16>
    %6 = vector.shape_cast %5 : vector<1x16x24xbf16> to vector<16x24xbf16>
    %7 = vector.extract_strided_slice %4 {offsets = [0, 0], sizes = [24, 128], strides = [1, 1]} : vector<24x256xbf16> to vector<24x128xbf16>
    %cst = arith.constant dense<0.000000e+00> : vector<16x128xf32>
    %8 = tpu.matmul %6, %7, %cst {dimension_numbers = #tpu.dot_dimension_numbers<[1], [0], [0], [1], [0, 0, 1, 1], [], []>} : vector<16x24xbf16>, vector<24x128xbf16>, vector<16x128xf32> -> vector<16x128xf32>
    %c1 = arith.constant 1 : index
    %c0_8 = arith.constant 0 : index
    %c0_9 = arith.constant 0 : index
    %9 = vector.load %arg4[%c1, %c0_8, %c0_9] : memref<3x16x24xbf16, #tpu.memory_space<vmem>>, vector<1x16x24xbf16>
    %10 = vector.shape_cast %9 : vector<1x16x24xbf16> to vector<16x24xbf16>
    %11 = vector.extract_strided_slice %4 {offsets = [0, 1], sizes = [24, 128], strides = [1, 1]} : vector<24x256xbf16> to vector<24x128xbf16>
    %cst_10 = arith.constant dense<0.000000e+00> : vector<16x128xf32>
    %12 = tpu.matmul %10, %11, %cst_10 {dimension_numbers = #tpu.dot_dimension_numbers<[1], [0], [0], [1], [0, 0, 1, 1], [], []>} : vector<16x24xbf16>, vector<24x128xbf16>, vector<16x128xf32> -> vector<16x128xf32>
    %13 = arith.addf %8, %12 : vector<16x128xf32>
    %c2 = arith.constant 2 : index
    %c0_11 = arith.constant 0 : index
    %c0_12 = arith.constant 0 : index
    %14 = vector.load %arg4[%c2, %c0_11, %c0_12] : memref<3x16x24xbf16, #tpu.memory_space<vmem>>, vector<1x16x24xbf16>
    %15 = vector.shape_cast %14 : vector<1x16x24xbf16> to vector<16x24xbf16>
    %16 = vector.extract_strided_slice %4 {offsets = [0, 2], sizes = [24, 128], strides = [1, 1]} : vector<24x256xbf16> to vector<24x128xbf16>
    %cst_13 = arith.constant dense<0.000000e+00> : vector<16x128xf32>
    %17 = tpu.matmul %15, %16, %cst_13 {dimension_numbers = #tpu.dot_dimension_numbers<[1], [0], [0], [1], [0, 0, 1, 1], [], []>} : vector<16x24xbf16>, vector<24x128xbf16>, vector<16x128xf32> -> vector<16x128xf32>
    %18 = arith.addf %13, %17 : vector<16x128xf32>
    %c0_14 = arith.constant 0 : index
    %c0_15 = arith.constant 0 : index
    %19 = vector.load %arg5[%c0_14, %c0_15] : memref<16x1xf32, #tpu.memory_space<vmem>>, vector<16x1xf32>
    %20 = vector.broadcast %19 : vector<16x1xf32> to vector<16x128xf32>
    %21 = arith.addf %18, %20 : vector<16x128xf32>
    %c0_16 = arith.constant 0 : index
    %c0_17 = arith.constant 0 : index
    %c0_18 = arith.constant 0 : index
    %22 = vector.load %arg6[%c0_16, %c0_17, %c0_18] : memref<1x16x128xf32, #tpu.memory_space<vmem>>, vector<1x16x128xf32>
    %23 = vector.shape_cast %22 : vector<1x16x128xf32> to vector<16x128xf32>
    %24 = vector.shape_cast %21 : vector<16x128xf32> to vector<1x16x128xf32>
    tpu.vector_store %arg6[%c0_16, %c0_17, %c0_18], %24 {strides = array<i32>} : memref<1x16x128xf32, #tpu.memory_space<vmem>>, vector<1x16x128xf32>,
    return
  }
  func.func @transform_0(%arg0: i32, %arg1: i32) -> (i32, i32, i32) {
    %c0_i32 = arith.constant 0 : i32
    %c0_i32_0 = arith.constant 0 : i32
    return %arg0, %c0_i32, %arg1 : i32, i32, i32
  }
  func.func @transform_1(%arg0: i32, %arg1: i32) -> (i32, i32, i32) {
    %c1_i32 = arith.constant 1 : i32
    %0 = arith.addi %arg1, %c1_i32 : i32
    %c1_i32_0 = arith.constant 1 : i32
    %1 = arith.muli %0, %c1_i32_0 : i32
    %c0_i32 = arith.constant 0 : i32
    %c0_i32_1 = arith.constant 0 : i32
    return %arg0, %c0_i32, %1 : i32, i32, i32
  }
  func.func @transform_2(%arg0: i32, %arg1: i32) -> (i32, i32, i32) {
    %c0_i32 = arith.constant 0 : i32
    %c0_i32_0 = arith.constant 0 : i32
    %c0_i32_1 = arith.constant 0 : i32
    %c0_i32_2 = arith.constant 0 : i32
    return %c0_i32, %c0_i32_0, %c0_i32_1 : i32, i32, i32
  }
  func.func @transform_3(%arg0: i32, %arg1: i32) -> (i32, i32) {
    %c0_i32 = arith.constant 0 : i32
    %c0_i32_0 = arith.constant 0 : i32
    %c0_i32_1 = arith.constant 0 : i32
    return %c0_i32, %c0_i32_0 : i32, i32
  }
  func.func @transform_4(%arg0: i32, %arg1: i32) -> (i32, i32, i32) {
    %c0_i32 = arith.constant 0 : i32
    %c0_i32_0 = arith.constant 0 : i32
    return %arg0, %c0_i32, %arg1 : i32, i32, i32
  }
}

module attributes {stable_mosaic.version = 11 : i64} {
  func.func @_bn_lrelu_kernel(%arg0: i32, %arg1: i32, %arg2: i32, %arg3: memref<1x96x128xf32, #tpu.memory_space<vmem>>, %arg4: memref<96x1xf32, #tpu.memory_space<vmem>>, %arg5: memref<96x1xf32, #tpu.memory_space<vmem>>, %arg6: memref<1x96x128xbf16, #tpu.memory_space<vmem>>) attributes {dimension_semantics = [#tpu.dimension_semantics<parallel>, #tpu.dimension_semantics<parallel>, #tpu.dimension_semantics<parallel>], iteration_bounds = array<i64: 2, 1, 1>, scalar_prefetch = 0 : i64, scratch_operands = 0 : i64, tpu.core_type = #tpu.core_type<tc>, window_params = [{transform_indices = @transform_0, window_bounds = array<i64: 1, 96, 128>}, {transform_indices = @transform_1, window_bounds = array<i64: 96, 1>}, {transform_indices = @transform_2, window_bounds = array<i64: 96, 1>}, {transform_indices = @transform_3, window_bounds = array<i64: 1, 96, 128>}]} {
    %c0 = arith.constant 0 : index
    %c0_0 = arith.constant 0 : index
    %c0_1 = arith.constant 0 : index
    %0 = vector.load %arg3[%c0, %c0_0, %c0_1] : memref<1x96x128xf32, #tpu.memory_space<vmem>>, vector<1x96x128xf32>
    %1 = vector.shape_cast %0 : vector<1x96x128xf32> to vector<96x128xf32>
    %c0_2 = arith.constant 0 : index
    %c0_3 = arith.constant 0 : index
    %2 = vector.load %arg4[%c0_2, %c0_3] : memref<96x1xf32, #tpu.memory_space<vmem>>, vector<96x1xf32>
    %3 = vector.broadcast %2 : vector<96x1xf32> to vector<96x128xf32>
    %4 = arith.mulf %1, %3 : vector<96x128xf32>
    %c0_4 = arith.constant 0 : index
    %c0_5 = arith.constant 0 : index
    %5 = vector.load %arg5[%c0_4, %c0_5] : memref<96x1xf32, #tpu.memory_space<vmem>>, vector<96x1xf32>
    %6 = vector.broadcast %5 : vector<96x1xf32> to vector<96x128xf32>
    %7 = arith.addf %4, %6 : vector<96x128xf32>
    %cst = arith.constant 0.000000e+00 : f32
    %8 = vector.broadcast %cst : f32 to vector<96x128xf32>
    %9 = arith.cmpf oge, %7, %8 : vector<96x128xf32>
    %cst_6 = arith.constant 0.00999999977 : f32
    %10 = vector.broadcast %cst_6 : f32 to vector<96x128xf32>
    %11 = arith.mulf %10, %7 : vector<96x128xf32>
    %12 = arith.select %9, %7, %11 : vector<96x128xi1>, vector<96x128xf32>
    %13 = arith.truncf %12 : vector<96x128xf32> to vector<96x128xbf16>
    %c0_7 = arith.constant 0 : index
    %c0_8 = arith.constant 0 : index
    %c0_9 = arith.constant 0 : index
    %14 = vector.load %arg6[%c0_7, %c0_8, %c0_9] : memref<1x96x128xbf16, #tpu.memory_space<vmem>>, vector<1x96x128xbf16>
    %15 = vector.shape_cast %14 : vector<1x96x128xbf16> to vector<96x128xbf16>
    %16 = vector.shape_cast %13 : vector<96x128xbf16> to vector<1x96x128xbf16>
    tpu.vector_store %arg6[%c0_7, %c0_8, %c0_9], %16 {strides = array<i32>} : memref<1x96x128xbf16, #tpu.memory_space<vmem>>, vector<1x96x128xbf16>,
    return
  }
  func.func @transform_0(%arg0: i32, %arg1: i32, %arg2: i32) -> (i32, i32, i32) {
    %c0_i32 = arith.constant 0 : i32
    return %arg0, %arg1, %arg2 : i32, i32, i32
  }
  func.func @transform_1(%arg0: i32, %arg1: i32, %arg2: i32) -> (i32, i32) {
    %c0_i32 = arith.constant 0 : i32
    %c0_i32_0 = arith.constant 0 : i32
    return %arg1, %c0_i32 : i32, i32
  }
  func.func @transform_2(%arg0: i32, %arg1: i32, %arg2: i32) -> (i32, i32) {
    %c0_i32 = arith.constant 0 : i32
    %c0_i32_0 = arith.constant 0 : i32
    return %arg1, %c0_i32 : i32, i32
  }
  func.func @transform_3(%arg0: i32, %arg1: i32, %arg2: i32) -> (i32, i32, i32) {
    %c0_i32 = arith.constant 0 : i32
    return %arg0, %arg1, %arg2 : i32, i32, i32
  }
}

module attributes {stable_mosaic.version = 11 : i64} {
  func.func @_gemm_kernel(%arg0: i32, %arg1: i32, %arg2: i32, %arg3: memref<136x128xbf16, #tpu.memory_space<vmem>>, %arg4: memref<128x128xbf16, #tpu.memory_space<vmem>>, %arg5: memref<136x1xf32, #tpu.memory_space<vmem>>, %arg6: memref<136x128xf32, #tpu.memory_space<vmem>>) attributes {dimension_semantics = [#tpu.dimension_semantics<parallel>, #tpu.dimension_semantics<parallel>, #tpu.dimension_semantics<arbitrary>], iteration_bounds = array<i64: 1, 1, 1>, scalar_prefetch = 0 : i64, scratch_operands = 0 : i64, tpu.core_type = #tpu.core_type<tc>, window_params = [{transform_indices = @transform_0, window_bounds = array<i64: 136, 128>}, {transform_indices = @transform_1, window_bounds = array<i64: 128, 128>}, {transform_indices = @transform_2, window_bounds = array<i64: 136, 1>}, {transform_indices = @transform_3, window_bounds = array<i64: 136, 128>}]} {
    %c0_i32 = arith.constant 0 : i32
    %0 = arith.cmpi eq, %arg2, %c0_i32 : i32
    %1 = arith.extui %0 : i1 to i32
    %c0_i32_0 = arith.constant 0 : i32
    %2 = arith.cmpi ne, %1, %c0_i32_0 : i32
    scf.if %2 {
      %cst_10 = arith.constant 0.000000e+00 : f32
      %12 = vector.broadcast %cst_10 : f32 to vector<136x128xf32>
      %c0_11 = arith.constant 0 : index
      %c0_12 = arith.constant 0 : index
      %13 = vector.load %arg6[%c0_11, %c0_12] : memref<136x128xf32, #tpu.memory_space<vmem>>, vector<136x128xf32>
      tpu.vector_store %arg6[%c0_11, %c0_12], %12 {strides = array<i32>} : memref<136x128xf32, #tpu.memory_space<vmem>>, vector<136x128xf32>,
    } else {
    }
    %c0 = arith.constant 0 : index
    %c0_1 = arith.constant 0 : index
    %3 = vector.load %arg6[%c0, %c0_1] : memref<136x128xf32, #tpu.memory_space<vmem>>, vector<136x128xf32>
    %c0_2 = arith.constant 0 : index
    %c0_3 = arith.constant 0 : index
    %4 = vector.load %arg3[%c0_2, %c0_3] : memref<136x128xbf16, #tpu.memory_space<vmem>>, vector<136x128xbf16>
    %c0_4 = arith.constant 0 : index
    %c0_5 = arith.constant 0 : index
    %5 = vector.load %arg4[%c0_4, %c0_5] : memref<128x128xbf16, #tpu.memory_space<vmem>>, vector<128x128xbf16>
    %cst = arith.constant dense<0.000000e+00> : vector<136x128xf32>
    %6 = tpu.matmul %4, %5, %cst {dimension_numbers = #tpu.dot_dimension_numbers<[1], [0], [0], [1], [0, 0, 1, 1], [], []>} : vector<136x128xbf16>, vector<128x128xbf16>, vector<136x128xf32> -> vector<136x128xf32>
    %7 = arith.addf %3, %6 : vector<136x128xf32>
    %c0_6 = arith.constant 0 : index
    %c0_7 = arith.constant 0 : index
    %8 = vector.load %arg6[%c0_6, %c0_7] : memref<136x128xf32, #tpu.memory_space<vmem>>, vector<136x128xf32>
    tpu.vector_store %arg6[%c0_6, %c0_7], %7 {strides = array<i32>} : memref<136x128xf32, #tpu.memory_space<vmem>>, vector<136x128xf32>,
    %c0_i32_8 = arith.constant 0 : i32
    %9 = arith.cmpi eq, %arg2, %c0_i32_8 : i32
    %10 = arith.extui %9 : i1 to i32
    %c0_i32_9 = arith.constant 0 : i32
    %11 = arith.cmpi ne, %10, %c0_i32_9 : i32
    scf.if %11 {
      %c0_10 = arith.constant 0 : index
      %c0_11 = arith.constant 0 : index
      %12 = vector.load %arg6[%c0_10, %c0_11] : memref<136x128xf32, #tpu.memory_space<vmem>>, vector<136x128xf32>
      %c0_12 = arith.constant 0 : index
      %c0_13 = arith.constant 0 : index
      %13 = vector.load %arg5[%c0_12, %c0_13] : memref<136x1xf32, #tpu.memory_space<vmem>>, vector<136x1xf32>
      %14 = vector.broadcast %13 : vector<136x1xf32> to vector<136x128xf32>
      %15 = arith.addf %12, %14 : vector<136x128xf32>
      %c0_14 = arith.constant 0 : index
      %c0_15 = arith.constant 0 : index
      %16 = vector.load %arg6[%c0_14, %c0_15] : memref<136x128xf32, #tpu.memory_space<vmem>>, vector<136x128xf32>
      tpu.vector_store %arg6[%c0_14, %c0_15], %15 {strides = array<i32>} : memref<136x128xf32, #tpu.memory_space<vmem>>, vector<136x128xf32>,
    } else {
    }
    return
  }
  func.func @transform_0(%arg0: i32, %arg1: i32, %arg2: i32) -> (i32, i32) {
    %c0_i32 = arith.constant 0 : i32
    return %arg0, %arg2 : i32, i32
  }
  func.func @transform_1(%arg0: i32, %arg1: i32, %arg2: i32) -> (i32, i32) {
    %c0_i32 = arith.constant 0 : i32
    return %arg2, %arg1 : i32, i32
  }
  func.func @transform_2(%arg0: i32, %arg1: i32, %arg2: i32) -> (i32, i32) {
    %c0_i32 = arith.constant 0 : i32
    %c0_i32_0 = arith.constant 0 : i32
    return %arg0, %c0_i32 : i32, i32
  }
  func.func @transform_3(%arg0: i32, %arg1: i32, %arg2: i32) -> (i32, i32) {
    %c0_i32 = arith.constant 0 : i32
    return %arg0, %arg1 : i32, i32
  }
}

module attributes {stable_mosaic.version = 11 : i64} {
  func.func @_ew_kernel(%arg0: i32, %arg1: memref<8x512xf32, #tpu.memory_space<vmem>>, %arg2: memref<8x512xf32, #tpu.memory_space<vmem>>, %arg3: memref<8x512xf32, #tpu.memory_space<vmem>>, %arg4: memref<8x512xf32, #tpu.memory_space<vmem>>, %arg5: memref<8x512xf32, #tpu.memory_space<vmem>>, %arg6: memref<8x512xf32, #tpu.memory_space<vmem>>, %arg7: memref<8x512xf32, #tpu.memory_space<vmem>>, %arg8: memref<8x512xf32, #tpu.memory_space<vmem>>) attributes {dimension_semantics = [#tpu.dimension_semantics<parallel>], iteration_bounds = array<i64: 1>, scalar_prefetch = 0 : i64, scratch_operands = 0 : i64, tpu.core_type = #tpu.core_type<tc>, window_params = [{transform_indices = @transform_0, window_bounds = array<i64: 8, 512>}, {transform_indices = @transform_1, window_bounds = array<i64: 8, 512>}, {transform_indices = @transform_2, window_bounds = array<i64: 8, 512>}, {transform_indices = @transform_3, window_bounds = array<i64: 8, 512>}, {transform_indices = @transform_4, window_bounds = array<i64: 8, 512>}, {transform_indices = @transform_5, window_bounds = array<i64: 8, 512>}, {transform_indices = @transform_6, window_bounds = array<i64: 8, 512>}, {transform_indices = @transform_7, window_bounds = array<i64: 8, 512>}]} {
    %c0 = arith.constant 0 : index
    %c0_0 = arith.constant 0 : index
    %0 = vector.load %arg1[%c0, %c0_0] : memref<8x512xf32, #tpu.memory_space<vmem>>, vector<8x512xf32>
    %c0_1 = arith.constant 0 : index
    %c0_2 = arith.constant 0 : index
    %1 = vector.load %arg2[%c0_1, %c0_2] : memref<8x512xf32, #tpu.memory_space<vmem>>, vector<8x512xf32>
    %c0_3 = arith.constant 0 : index
    %c0_4 = arith.constant 0 : index
    %2 = vector.load %arg3[%c0_3, %c0_4] : memref<8x512xf32, #tpu.memory_space<vmem>>, vector<8x512xf32>
    %c0_5 = arith.constant 0 : index
    %c0_6 = arith.constant 0 : index
    %3 = vector.load %arg4[%c0_5, %c0_6] : memref<8x512xf32, #tpu.memory_space<vmem>>, vector<8x512xf32>
    %c0_7 = arith.constant 0 : index
    %c0_8 = arith.constant 0 : index
    %4 = vector.load %arg5[%c0_7, %c0_8] : memref<8x512xf32, #tpu.memory_space<vmem>>, vector<8x512xf32>
    %c0_9 = arith.constant 0 : index
    %c0_10 = arith.constant 0 : index
    %5 = vector.load %arg6[%c0_9, %c0_10] : memref<8x512xf32, #tpu.memory_space<vmem>>, vector<8x512xf32>
    %6 = arith.negf %0 : vector<8x512xf32>
    %7 = math.exp %6 : vector<8x512xf32>
    %cst = arith.constant 1.000000e+00 : f32
    %8 = vector.broadcast %cst : f32 to vector<8x512xf32>
    %9 = arith.addf %8, %7 : vector<8x512xf32>
    %10 = arith.divf %8, %9 : vector<8x512xf32>
    %11 = arith.negf %1 : vector<8x512xf32>
    %12 = math.exp %11 : vector<8x512xf32>
    %cst_11 = arith.constant 1.000000e+00 : f32
    %13 = vector.broadcast %cst_11 : f32 to vector<8x512xf32>
    %14 = arith.addf %13, %12 : vector<8x512xf32>
    %15 = arith.divf %13, %14 : vector<8x512xf32>
    %16 = arith.mulf %10, %2 : vector<8x512xf32>
    %17 = arith.mulf %15, %4 : vector<8x512xf32>
    %18 = arith.addf %16, %17 : vector<8x512xf32>
    %19 = arith.mulf %10, %3 : vector<8x512xf32>
    %20 = arith.mulf %15, %5 : vector<8x512xf32>
    %21 = arith.addf %19, %20 : vector<8x512xf32>
    %c0_12 = arith.constant 0 : index
    %c0_13 = arith.constant 0 : index
    %22 = vector.load %arg7[%c0_12, %c0_13] : memref<8x512xf32, #tpu.memory_space<vmem>>, vector<8x512xf32>
    tpu.vector_store %arg7[%c0_12, %c0_13], %18 {strides = array<i32>} : memref<8x512xf32, #tpu.memory_space<vmem>>, vector<8x512xf32>,
    %c0_14 = arith.constant 0 : index
    %c0_15 = arith.constant 0 : index
    %23 = vector.load %arg8[%c0_14, %c0_15] : memref<8x512xf32, #tpu.memory_space<vmem>>, vector<8x512xf32>
    tpu.vector_store %arg8[%c0_14, %c0_15], %21 {strides = array<i32>} : memref<8x512xf32, #tpu.memory_space<vmem>>, vector<8x512xf32>,
    return
  }
  func.func @transform_0(%arg0: i32) -> (i32, i32) {
    %c0_i32 = arith.constant 0 : i32
    %c0_i32_0 = arith.constant 0 : i32
    return %arg0, %c0_i32 : i32, i32
  }
  func.func @transform_1(%arg0: i32) -> (i32, i32) {
    %c0_i32 = arith.constant 0 : i32
    %c0_i32_0 = arith.constant 0 : i32
    return %arg0, %c0_i32 : i32, i32
  }
  func.func @transform_2(%arg0: i32) -> (i32, i32) {
    %c0_i32 = arith.constant 0 : i32
    %c0_i32_0 = arith.constant 0 : i32
    return %arg0, %c0_i32 : i32, i32
  }
  func.func @transform_3(%arg0: i32) -> (i32, i32) {
    %c0_i32 = arith.constant 0 : i32
    %c0_i32_0 = arith.constant 0 : i32
    return %arg0, %c0_i32 : i32, i32
  }
  func.func @transform_4(%arg0: i32) -> (i32, i32) {
    %c0_i32 = arith.constant 0 : i32
    %c0_i32_0 = arith.constant 0 : i32
    return %arg0, %c0_i32 : i32, i32
  }
  func.func @transform_5(%arg0: i32) -> (i32, i32) {
    %c0_i32 = arith.constant 0 : i32
    %c0_i32_0 = arith.constant 0 : i32
    return %arg0, %c0_i32 : i32, i32
  }
  func.func @transform_6(%arg0: i32) -> (i32, i32) {
    %c0_i32 = arith.constant 0 : i32
    %c0_i32_0 = arith.constant 0 : i32
    return %arg0, %c0_i32 : i32, i32
  }
  func.func @transform_7(%arg0: i32) -> (i32, i32) {
    %c0_i32 = arith.constant 0 : i32
    %c0_i32_0 = arith.constant 0 : i32
    return %arg0, %c0_i32 : i32, i32
  }
}

module attributes {stable_mosaic.version = 11 : i64} {
  func.func @_conv3_kernel(%arg0: i32, %arg1: i32, %arg2: memref<1x8x256xbf16, #tpu.memory_space<vmem>>, %arg3: memref<1x8x128xbf16, #tpu.memory_space<vmem>>, %arg4: memref<3x8x8xbf16, #tpu.memory_space<vmem>>, %arg5: memref<8x1xf32, #tpu.memory_space<vmem>>, %arg6: memref<1x8x256xf32, #tpu.memory_space<vmem>>) attributes {dimension_semantics = [#tpu.dimension_semantics<parallel>, #tpu.dimension_semantics<parallel>], iteration_bounds = array<i64: 2, 1>, scalar_prefetch = 0 : i64, scratch_operands = 0 : i64, tpu.core_type = #tpu.core_type<tc>, window_params = [{transform_indices = @transform_0, window_bounds = array<i64: 1, 8, 256>}, {transform_indices = @transform_1, window_bounds = array<i64: 1, 8, 128>}, {pipeline_mode = #tpu.pipeline_mode<synchronous>, transform_indices = @transform_2, window_bounds = array<i64: 3, 8, 8>}, {pipeline_mode = #tpu.pipeline_mode<synchronous>, transform_indices = @transform_3, window_bounds = array<i64: 8, 1>}, {transform_indices = @transform_4, window_bounds = array<i64: 1, 8, 256>}]} {
    %c0 = arith.constant 0 : index
    %c0_0 = arith.constant 0 : index
    %c0_1 = arith.constant 0 : index
    %0 = vector.load %arg2[%c0, %c0_0, %c0_1] : memref<1x8x256xbf16, #tpu.memory_space<vmem>>, vector<1x8x256xbf16>
    %1 = vector.shape_cast %0 : vector<1x8x256xbf16> to vector<8x256xbf16>
    %c0_2 = arith.constant 0 : index
    %c0_3 = arith.constant 0 : index
    %c0_4 = arith.constant 0 : index
    %2 = vector.load %arg3[%c0_2, %c0_3, %c0_4] : memref<1x8x128xbf16, #tpu.memory_space<vmem>>, vector<1x8x128xbf16>
    %3 = vector.shape_cast %2 : vector<1x8x128xbf16> to vector<8x128xbf16>
    %4 = tpu.concatenate %1, %3 in 1 : vector<8x256xbf16>, vector<8x128xbf16> -> vector<8x384xbf16>
    %c0_5 = arith.constant 0 : index
    %c0_6 = arith.constant 0 : index
    %c0_7 = arith.constant 0 : index
    %5 = vector.load %arg4[%c0_5, %c0_6, %c0_7] : memref<3x8x8xbf16, #tpu.memory_space<vmem>>, vector<1x8x8xbf16>
    %6 = vector.shape_cast %5 : vector<1x8x8xbf16> to vector<8x8xbf16>
    %7 = vector.extract_strided_slice %4 {offsets = [0, 0], sizes = [8, 256], strides = [1, 1]} : vector<8x384xbf16> to vector<8x256xbf16>
    %cst = arith.constant dense<0.000000e+00> : vector<8x256xf32>
    %8 = tpu.matmul %6, %7, %cst {dimension_numbers = #tpu.dot_dimension_numbers<[1], [0], [0], [1], [0, 0, 1, 1], [], []>} : vector<8x8xbf16>, vector<8x256xbf16>, vector<8x256xf32> -> vector<8x256xf32>
    %c1 = arith.constant 1 : index
    %c0_8 = arith.constant 0 : index
    %c0_9 = arith.constant 0 : index
    %9 = vector.load %arg4[%c1, %c0_8, %c0_9] : memref<3x8x8xbf16, #tpu.memory_space<vmem>>, vector<1x8x8xbf16>
    %10 = vector.shape_cast %9 : vector<1x8x8xbf16> to vector<8x8xbf16>
    %11 = vector.extract_strided_slice %4 {offsets = [0, 1], sizes = [8, 256], strides = [1, 1]} : vector<8x384xbf16> to vector<8x256xbf16>
    %cst_10 = arith.constant dense<0.000000e+00> : vector<8x256xf32>
    %12 = tpu.matmul %10, %11, %cst_10 {dimension_numbers = #tpu.dot_dimension_numbers<[1], [0], [0], [1], [0, 0, 1, 1], [], []>} : vector<8x8xbf16>, vector<8x256xbf16>, vector<8x256xf32> -> vector<8x256xf32>
    %13 = arith.addf %8, %12 : vector<8x256xf32>
    %c2 = arith.constant 2 : index
    %c0_11 = arith.constant 0 : index
    %c0_12 = arith.constant 0 : index
    %14 = vector.load %arg4[%c2, %c0_11, %c0_12] : memref<3x8x8xbf16, #tpu.memory_space<vmem>>, vector<1x8x8xbf16>
    %15 = vector.shape_cast %14 : vector<1x8x8xbf16> to vector<8x8xbf16>
    %16 = vector.extract_strided_slice %4 {offsets = [0, 2], sizes = [8, 256], strides = [1, 1]} : vector<8x384xbf16> to vector<8x256xbf16>
    %cst_13 = arith.constant dense<0.000000e+00> : vector<8x256xf32>
    %17 = tpu.matmul %15, %16, %cst_13 {dimension_numbers = #tpu.dot_dimension_numbers<[1], [0], [0], [1], [0, 0, 1, 1], [], []>} : vector<8x8xbf16>, vector<8x256xbf16>, vector<8x256xf32> -> vector<8x256xf32>
    %18 = arith.addf %13, %17 : vector<8x256xf32>
    %c0_14 = arith.constant 0 : index
    %c0_15 = arith.constant 0 : index
    %19 = vector.load %arg5[%c0_14, %c0_15] : memref<8x1xf32, #tpu.memory_space<vmem>>, vector<8x1xf32>
    %20 = vector.broadcast %19 : vector<8x1xf32> to vector<8x256xf32>
    %21 = arith.addf %18, %20 : vector<8x256xf32>
    %c0_16 = arith.constant 0 : index
    %c0_17 = arith.constant 0 : index
    %c0_18 = arith.constant 0 : index
    %22 = vector.load %arg6[%c0_16, %c0_17, %c0_18] : memref<1x8x256xf32, #tpu.memory_space<vmem>>, vector<1x8x256xf32>
    %23 = vector.shape_cast %22 : vector<1x8x256xf32> to vector<8x256xf32>
    %24 = vector.shape_cast %21 : vector<8x256xf32> to vector<1x8x256xf32>
    tpu.vector_store %arg6[%c0_16, %c0_17, %c0_18], %24 {strides = array<i32>} : memref<1x8x256xf32, #tpu.memory_space<vmem>>, vector<1x8x256xf32>,
    return
  }
  func.func @transform_0(%arg0: i32, %arg1: i32) -> (i32, i32, i32) {
    %c0_i32 = arith.constant 0 : i32
    %c0_i32_0 = arith.constant 0 : i32
    return %arg0, %c0_i32, %arg1 : i32, i32, i32
  }
  func.func @transform_1(%arg0: i32, %arg1: i32) -> (i32, i32, i32) {
    %c1_i32 = arith.constant 1 : i32
    %0 = arith.addi %arg1, %c1_i32 : i32
    %c2_i32 = arith.constant 2 : i32
    %1 = arith.muli %0, %c2_i32 : i32
    %c0_i32 = arith.constant 0 : i32
    %c0_i32_0 = arith.constant 0 : i32
    return %arg0, %c0_i32, %1 : i32, i32, i32
  }
  func.func @transform_2(%arg0: i32, %arg1: i32) -> (i32, i32, i32) {
    %c0_i32 = arith.constant 0 : i32
    %c0_i32_0 = arith.constant 0 : i32
    %c0_i32_1 = arith.constant 0 : i32
    %c0_i32_2 = arith.constant 0 : i32
    return %c0_i32, %c0_i32_0, %c0_i32_1 : i32, i32, i32
  }
  func.func @transform_3(%arg0: i32, %arg1: i32) -> (i32, i32) {
    %c0_i32 = arith.constant 0 : i32
    %c0_i32_0 = arith.constant 0 : i32
    %c0_i32_1 = arith.constant 0 : i32
    return %c0_i32, %c0_i32_0 : i32, i32
  }
  func.func @transform_4(%arg0: i32, %arg1: i32) -> (i32, i32, i32) {
    %c0_i32 = arith.constant 0 : i32
    %c0_i32_0 = arith.constant 0 : i32
    return %arg0, %c0_i32, %arg1 : i32, i32, i32
  }
}

module attributes {stable_mosaic.version = 11 : i64} {
  func.func @_bn_lrelu_kernel(%arg0: i32, %arg1: i32, %arg2: i32, %arg3: memref<1x8x256xf32, #tpu.memory_space<vmem>>, %arg4: memref<8x1xf32, #tpu.memory_space<vmem>>, %arg5: memref<8x1xf32, #tpu.memory_space<vmem>>, %arg6: memref<1x8x256xbf16, #tpu.memory_space<vmem>>) attributes {dimension_semantics = [#tpu.dimension_semantics<parallel>, #tpu.dimension_semantics<parallel>, #tpu.dimension_semantics<parallel>], iteration_bounds = array<i64: 2, 1, 1>, scalar_prefetch = 0 : i64, scratch_operands = 0 : i64, tpu.core_type = #tpu.core_type<tc>, window_params = [{transform_indices = @transform_0, window_bounds = array<i64: 1, 8, 256>}, {transform_indices = @transform_1, window_bounds = array<i64: 8, 1>}, {transform_indices = @transform_2, window_bounds = array<i64: 8, 1>}, {transform_indices = @transform_3, window_bounds = array<i64: 1, 8, 256>}]} {
    %c0 = arith.constant 0 : index
    %c0_0 = arith.constant 0 : index
    %c0_1 = arith.constant 0 : index
    %0 = vector.load %arg3[%c0, %c0_0, %c0_1] : memref<1x8x256xf32, #tpu.memory_space<vmem>>, vector<1x8x256xf32>
    %1 = vector.shape_cast %0 : vector<1x8x256xf32> to vector<8x256xf32>
    %c0_2 = arith.constant 0 : index
    %c0_3 = arith.constant 0 : index
    %2 = vector.load %arg4[%c0_2, %c0_3] : memref<8x1xf32, #tpu.memory_space<vmem>>, vector<8x1xf32>
    %3 = vector.broadcast %2 : vector<8x1xf32> to vector<8x256xf32>
    %4 = arith.mulf %1, %3 : vector<8x256xf32>
    %c0_4 = arith.constant 0 : index
    %c0_5 = arith.constant 0 : index
    %5 = vector.load %arg5[%c0_4, %c0_5] : memref<8x1xf32, #tpu.memory_space<vmem>>, vector<8x1xf32>
    %6 = vector.broadcast %5 : vector<8x1xf32> to vector<8x256xf32>
    %7 = arith.addf %4, %6 : vector<8x256xf32>
    %cst = arith.constant 0.000000e+00 : f32
    %8 = vector.broadcast %cst : f32 to vector<8x256xf32>
    %9 = arith.cmpf oge, %7, %8 : vector<8x256xf32>
    %cst_6 = arith.constant 0.00999999977 : f32
    %10 = vector.broadcast %cst_6 : f32 to vector<8x256xf32>
    %11 = arith.mulf %10, %7 : vector<8x256xf32>
    %12 = arith.select %9, %7, %11 : vector<8x256xi1>, vector<8x256xf32>
    %13 = arith.truncf %12 : vector<8x256xf32> to vector<8x256xbf16>
    %c0_7 = arith.constant 0 : index
    %c0_8 = arith.constant 0 : index
    %c0_9 = arith.constant 0 : index
    %14 = vector.load %arg6[%c0_7, %c0_8, %c0_9] : memref<1x8x256xbf16, #tpu.memory_space<vmem>>, vector<1x8x256xbf16>
    %15 = vector.shape_cast %14 : vector<1x8x256xbf16> to vector<8x256xbf16>
    %16 = vector.shape_cast %13 : vector<8x256xbf16> to vector<1x8x256xbf16>
    tpu.vector_store %arg6[%c0_7, %c0_8, %c0_9], %16 {strides = array<i32>} : memref<1x8x256xbf16, #tpu.memory_space<vmem>>, vector<1x8x256xbf16>,
    return
  }
  func.func @transform_0(%arg0: i32, %arg1: i32, %arg2: i32) -> (i32, i32, i32) {
    %c0_i32 = arith.constant 0 : i32
    return %arg0, %arg1, %arg2 : i32, i32, i32
  }
  func.func @transform_1(%arg0: i32, %arg1: i32, %arg2: i32) -> (i32, i32) {
    %c0_i32 = arith.constant 0 : i32
    %c0_i32_0 = arith.constant 0 : i32
    return %arg1, %c0_i32 : i32, i32
  }
  func.func @transform_2(%arg0: i32, %arg1: i32, %arg2: i32) -> (i32, i32) {
    %c0_i32 = arith.constant 0 : i32
    %c0_i32_0 = arith.constant 0 : i32
    return %arg1, %c0_i32 : i32, i32
  }
  func.func @transform_3(%arg0: i32, %arg1: i32, %arg2: i32) -> (i32, i32, i32) {
    %c0_i32 = arith.constant 0 : i32
    return %arg0, %arg1, %arg2 : i32, i32, i32
  }
}

module attributes {stable_mosaic.version = 11 : i64} {
  func.func @_bn_lrelu_kernel(%arg0: i32, %arg1: i32, %arg2: i32, %arg3: memref<1x16x256xf32, #tpu.memory_space<vmem>>, %arg4: memref<16x1xf32, #tpu.memory_space<vmem>>, %arg5: memref<16x1xf32, #tpu.memory_space<vmem>>, %arg6: memref<1x16x256xbf16, #tpu.memory_space<vmem>>) attributes {dimension_semantics = [#tpu.dimension_semantics<parallel>, #tpu.dimension_semantics<parallel>, #tpu.dimension_semantics<parallel>], iteration_bounds = array<i64: 2, 1, 1>, scalar_prefetch = 0 : i64, scratch_operands = 0 : i64, tpu.core_type = #tpu.core_type<tc>, window_params = [{transform_indices = @transform_0, window_bounds = array<i64: 1, 16, 256>}, {transform_indices = @transform_1, window_bounds = array<i64: 16, 1>}, {transform_indices = @transform_2, window_bounds = array<i64: 16, 1>}, {transform_indices = @transform_3, window_bounds = array<i64: 1, 16, 256>}]} {
    %c0 = arith.constant 0 : index
    %c0_0 = arith.constant 0 : index
    %c0_1 = arith.constant 0 : index
    %0 = vector.load %arg3[%c0, %c0_0, %c0_1] : memref<1x16x256xf32, #tpu.memory_space<vmem>>, vector<1x16x256xf32>
    %1 = vector.shape_cast %0 : vector<1x16x256xf32> to vector<16x256xf32>
    %c0_2 = arith.constant 0 : index
    %c0_3 = arith.constant 0 : index
    %2 = vector.load %arg4[%c0_2, %c0_3] : memref<16x1xf32, #tpu.memory_space<vmem>>, vector<16x1xf32>
    %3 = vector.broadcast %2 : vector<16x1xf32> to vector<16x256xf32>
    %4 = arith.mulf %1, %3 : vector<16x256xf32>
    %c0_4 = arith.constant 0 : index
    %c0_5 = arith.constant 0 : index
    %5 = vector.load %arg5[%c0_4, %c0_5] : memref<16x1xf32, #tpu.memory_space<vmem>>, vector<16x1xf32>
    %6 = vector.broadcast %5 : vector<16x1xf32> to vector<16x256xf32>
    %7 = arith.addf %4, %6 : vector<16x256xf32>
    %cst = arith.constant 0.000000e+00 : f32
    %8 = vector.broadcast %cst : f32 to vector<16x256xf32>
    %9 = arith.cmpf oge, %7, %8 : vector<16x256xf32>
    %cst_6 = arith.constant 0.00999999977 : f32
    %10 = vector.broadcast %cst_6 : f32 to vector<16x256xf32>
    %11 = arith.mulf %10, %7 : vector<16x256xf32>
    %12 = arith.select %9, %7, %11 : vector<16x256xi1>, vector<16x256xf32>
    %13 = arith.truncf %12 : vector<16x256xf32> to vector<16x256xbf16>
    %c0_7 = arith.constant 0 : index
    %c0_8 = arith.constant 0 : index
    %c0_9 = arith.constant 0 : index
    %14 = vector.load %arg6[%c0_7, %c0_8, %c0_9] : memref<1x16x256xbf16, #tpu.memory_space<vmem>>, vector<1x16x256xbf16>
    %15 = vector.shape_cast %14 : vector<1x16x256xbf16> to vector<16x256xbf16>
    %16 = vector.shape_cast %13 : vector<16x256xbf16> to vector<1x16x256xbf16>
    tpu.vector_store %arg6[%c0_7, %c0_8, %c0_9], %16 {strides = array<i32>} : memref<1x16x256xbf16, #tpu.memory_space<vmem>>, vector<1x16x256xbf16>,
    return
  }
  func.func @transform_0(%arg0: i32, %arg1: i32, %arg2: i32) -> (i32, i32, i32) {
    %c0_i32 = arith.constant 0 : i32
    return %arg0, %arg1, %arg2 : i32, i32, i32
  }
  func.func @transform_1(%arg0: i32, %arg1: i32, %arg2: i32) -> (i32, i32) {
    %c0_i32 = arith.constant 0 : i32
    %c0_i32_0 = arith.constant 0 : i32
    return %arg1, %c0_i32 : i32, i32
  }
  func.func @transform_2(%arg0: i32, %arg1: i32, %arg2: i32) -> (i32, i32) {
    %c0_i32 = arith.constant 0 : i32
    %c0_i32_0 = arith.constant 0 : i32
    return %arg1, %c0_i32 : i32, i32
  }
  func.func @transform_3(%arg0: i32, %arg1: i32, %arg2: i32) -> (i32, i32, i32) {
    %c0_i32 = arith.constant 0 : i32
    return %arg0, %arg1, %arg2 : i32, i32, i32
  }
}

module attributes {stable_mosaic.version = 11 : i64} {
  func.func @_conv3_kernel(%arg0: i32, %arg1: i32, %arg2: memref<1x8x256xbf16, #tpu.memory_space<vmem>>, %arg3: memref<1x8x128xbf16, #tpu.memory_space<vmem>>, %arg4: memref<3x16x8xbf16, #tpu.memory_space<vmem>>, %arg5: memref<16x1xf32, #tpu.memory_space<vmem>>, %arg6: memref<1x16x256xf32, #tpu.memory_space<vmem>>) attributes {dimension_semantics = [#tpu.dimension_semantics<parallel>, #tpu.dimension_semantics<parallel>], iteration_bounds = array<i64: 2, 1>, scalar_prefetch = 0 : i64, scratch_operands = 0 : i64, tpu.core_type = #tpu.core_type<tc>, window_params = [{transform_indices = @transform_0, window_bounds = array<i64: 1, 8, 256>}, {transform_indices = @transform_1, window_bounds = array<i64: 1, 8, 128>}, {pipeline_mode = #tpu.pipeline_mode<synchronous>, transform_indices = @transform_2, window_bounds = array<i64: 3, 16, 8>}, {pipeline_mode = #tpu.pipeline_mode<synchronous>, transform_indices = @transform_3, window_bounds = array<i64: 16, 1>}, {transform_indices = @transform_4, window_bounds = array<i64: 1, 16, 256>}]} {
    %c0 = arith.constant 0 : index
    %c0_0 = arith.constant 0 : index
    %c0_1 = arith.constant 0 : index
    %0 = vector.load %arg2[%c0, %c0_0, %c0_1] : memref<1x8x256xbf16, #tpu.memory_space<vmem>>, vector<1x8x256xbf16>
    %1 = vector.shape_cast %0 : vector<1x8x256xbf16> to vector<8x256xbf16>
    %c0_2 = arith.constant 0 : index
    %c0_3 = arith.constant 0 : index
    %c0_4 = arith.constant 0 : index
    %2 = vector.load %arg3[%c0_2, %c0_3, %c0_4] : memref<1x8x128xbf16, #tpu.memory_space<vmem>>, vector<1x8x128xbf16>
    %3 = vector.shape_cast %2 : vector<1x8x128xbf16> to vector<8x128xbf16>
    %4 = tpu.concatenate %1, %3 in 1 : vector<8x256xbf16>, vector<8x128xbf16> -> vector<8x384xbf16>
    %c0_5 = arith.constant 0 : index
    %c0_6 = arith.constant 0 : index
    %c0_7 = arith.constant 0 : index
    %5 = vector.load %arg4[%c0_5, %c0_6, %c0_7] : memref<3x16x8xbf16, #tpu.memory_space<vmem>>, vector<1x16x8xbf16>
    %6 = vector.shape_cast %5 : vector<1x16x8xbf16> to vector<16x8xbf16>
    %7 = vector.extract_strided_slice %4 {offsets = [0, 0], sizes = [8, 256], strides = [1, 1]} : vector<8x384xbf16> to vector<8x256xbf16>
    %cst = arith.constant dense<0.000000e+00> : vector<16x256xf32>
    %8 = tpu.matmul %6, %7, %cst {dimension_numbers = #tpu.dot_dimension_numbers<[1], [0], [0], [1], [0, 0, 1, 1], [], []>} : vector<16x8xbf16>, vector<8x256xbf16>, vector<16x256xf32> -> vector<16x256xf32>
    %c1 = arith.constant 1 : index
    %c0_8 = arith.constant 0 : index
    %c0_9 = arith.constant 0 : index
    %9 = vector.load %arg4[%c1, %c0_8, %c0_9] : memref<3x16x8xbf16, #tpu.memory_space<vmem>>, vector<1x16x8xbf16>
    %10 = vector.shape_cast %9 : vector<1x16x8xbf16> to vector<16x8xbf16>
    %11 = vector.extract_strided_slice %4 {offsets = [0, 1], sizes = [8, 256], strides = [1, 1]} : vector<8x384xbf16> to vector<8x256xbf16>
    %cst_10 = arith.constant dense<0.000000e+00> : vector<16x256xf32>
    %12 = tpu.matmul %10, %11, %cst_10 {dimension_numbers = #tpu.dot_dimension_numbers<[1], [0], [0], [1], [0, 0, 1, 1], [], []>} : vector<16x8xbf16>, vector<8x256xbf16>, vector<16x256xf32> -> vector<16x256xf32>
    %13 = arith.addf %8, %12 : vector<16x256xf32>
    %c2 = arith.constant 2 : index
    %c0_11 = arith.constant 0 : index
    %c0_12 = arith.constant 0 : index
    %14 = vector.load %arg4[%c2, %c0_11, %c0_12] : memref<3x16x8xbf16, #tpu.memory_space<vmem>>, vector<1x16x8xbf16>
    %15 = vector.shape_cast %14 : vector<1x16x8xbf16> to vector<16x8xbf16>
    %16 = vector.extract_strided_slice %4 {offsets = [0, 2], sizes = [8, 256], strides = [1, 1]} : vector<8x384xbf16> to vector<8x256xbf16>
    %cst_13 = arith.constant dense<0.000000e+00> : vector<16x256xf32>
    %17 = tpu.matmul %15, %16, %cst_13 {dimension_numbers = #tpu.dot_dimension_numbers<[1], [0], [0], [1], [0, 0, 1, 1], [], []>} : vector<16x8xbf16>, vector<8x256xbf16>, vector<16x256xf32> -> vector<16x256xf32>
    %18 = arith.addf %13, %17 : vector<16x256xf32>
    %c0_14 = arith.constant 0 : index
    %c0_15 = arith.constant 0 : index
    %19 = vector.load %arg5[%c0_14, %c0_15] : memref<16x1xf32, #tpu.memory_space<vmem>>, vector<16x1xf32>
    %20 = vector.broadcast %19 : vector<16x1xf32> to vector<16x256xf32>
    %21 = arith.addf %18, %20 : vector<16x256xf32>
    %c0_16 = arith.constant 0 : index
    %c0_17 = arith.constant 0 : index
    %c0_18 = arith.constant 0 : index
    %22 = vector.load %arg6[%c0_16, %c0_17, %c0_18] : memref<1x16x256xf32, #tpu.memory_space<vmem>>, vector<1x16x256xf32>
    %23 = vector.shape_cast %22 : vector<1x16x256xf32> to vector<16x256xf32>
    %24 = vector.shape_cast %21 : vector<16x256xf32> to vector<1x16x256xf32>
    tpu.vector_store %arg6[%c0_16, %c0_17, %c0_18], %24 {strides = array<i32>} : memref<1x16x256xf32, #tpu.memory_space<vmem>>, vector<1x16x256xf32>,
    return
  }
  func.func @transform_0(%arg0: i32, %arg1: i32) -> (i32, i32, i32) {
    %c0_i32 = arith.constant 0 : i32
    %c0_i32_0 = arith.constant 0 : i32
    return %arg0, %c0_i32, %arg1 : i32, i32, i32
  }
  func.func @transform_1(%arg0: i32, %arg1: i32) -> (i32, i32, i32) {
    %c1_i32 = arith.constant 1 : i32
    %0 = arith.addi %arg1, %c1_i32 : i32
    %c2_i32 = arith.constant 2 : i32
    %1 = arith.muli %0, %c2_i32 : i32
    %c0_i32 = arith.constant 0 : i32
    %c0_i32_0 = arith.constant 0 : i32
    return %arg0, %c0_i32, %1 : i32, i32, i32
  }
  func.func @transform_2(%arg0: i32, %arg1: i32) -> (i32, i32, i32) {
    %c0_i32 = arith.constant 0 : i32
    %c0_i32_0 = arith.constant 0 : i32
    %c0_i32_1 = arith.constant 0 : i32
    %c0_i32_2 = arith.constant 0 : i32
    return %c0_i32, %c0_i32_0, %c0_i32_1 : i32, i32, i32
  }
  func.func @transform_3(%arg0: i32, %arg1: i32) -> (i32, i32) {
    %c0_i32 = arith.constant 0 : i32
    %c0_i32_0 = arith.constant 0 : i32
    %c0_i32_1 = arith.constant 0 : i32
    return %c0_i32, %c0_i32_0 : i32, i32
  }
  func.func @transform_4(%arg0: i32, %arg1: i32) -> (i32, i32, i32) {
    %c0_i32 = arith.constant 0 : i32
    %c0_i32_0 = arith.constant 0 : i32
    return %arg0, %c0_i32, %arg1 : i32, i32, i32
  }
}

module attributes {stable_mosaic.version = 11 : i64} {
  func.func @_gemm_kernel(%arg0: i32, %arg1: i32, %arg2: i32, %arg3: memref<8x128xbf16, #tpu.memory_space<vmem>>, %arg4: memref<128x384xbf16, #tpu.memory_space<vmem>>, %arg5: memref<8x1xf32, #tpu.memory_space<vmem>>, %arg6: memref<8x384xf32, #tpu.memory_space<vmem>>) attributes {dimension_semantics = [#tpu.dimension_semantics<parallel>, #tpu.dimension_semantics<parallel>, #tpu.dimension_semantics<arbitrary>], iteration_bounds = array<i64: 1, 1, 1>, scalar_prefetch = 0 : i64, scratch_operands = 0 : i64, tpu.core_type = #tpu.core_type<tc>, window_params = [{transform_indices = @transform_0, window_bounds = array<i64: 8, 128>}, {transform_indices = @transform_1, window_bounds = array<i64: 128, 384>}, {transform_indices = @transform_2, window_bounds = array<i64: 8, 1>}, {transform_indices = @transform_3, window_bounds = array<i64: 8, 384>}]} {
    %c0_i32 = arith.constant 0 : i32
    %0 = arith.cmpi eq, %arg2, %c0_i32 : i32
    %1 = arith.extui %0 : i1 to i32
    %c0_i32_0 = arith.constant 0 : i32
    %2 = arith.cmpi ne, %1, %c0_i32_0 : i32
    scf.if %2 {
      %cst_10 = arith.constant 0.000000e+00 : f32
      %12 = vector.broadcast %cst_10 : f32 to vector<8x384xf32>
      %c0_11 = arith.constant 0 : index
      %c0_12 = arith.constant 0 : index
      %13 = vector.load %arg6[%c0_11, %c0_12] : memref<8x384xf32, #tpu.memory_space<vmem>>, vector<8x384xf32>
      tpu.vector_store %arg6[%c0_11, %c0_12], %12 {strides = array<i32>} : memref<8x384xf32, #tpu.memory_space<vmem>>, vector<8x384xf32>,
    } else {
    }
    %c0 = arith.constant 0 : index
    %c0_1 = arith.constant 0 : index
    %3 = vector.load %arg6[%c0, %c0_1] : memref<8x384xf32, #tpu.memory_space<vmem>>, vector<8x384xf32>
    %c0_2 = arith.constant 0 : index
    %c0_3 = arith.constant 0 : index
    %4 = vector.load %arg3[%c0_2, %c0_3] : memref<8x128xbf16, #tpu.memory_space<vmem>>, vector<8x128xbf16>
    %c0_4 = arith.constant 0 : index
    %c0_5 = arith.constant 0 : index
    %5 = vector.load %arg4[%c0_4, %c0_5] : memref<128x384xbf16, #tpu.memory_space<vmem>>, vector<128x384xbf16>
    %cst = arith.constant dense<0.000000e+00> : vector<8x384xf32>
    %6 = tpu.matmul %4, %5, %cst {dimension_numbers = #tpu.dot_dimension_numbers<[1], [0], [0], [1], [0, 0, 1, 1], [], []>} : vector<8x128xbf16>, vector<128x384xbf16>, vector<8x384xf32> -> vector<8x384xf32>
    %7 = arith.addf %3, %6 : vector<8x384xf32>
    %c0_6 = arith.constant 0 : index
    %c0_7 = arith.constant 0 : index
    %8 = vector.load %arg6[%c0_6, %c0_7] : memref<8x384xf32, #tpu.memory_space<vmem>>, vector<8x384xf32>
    tpu.vector_store %arg6[%c0_6, %c0_7], %7 {strides = array<i32>} : memref<8x384xf32, #tpu.memory_space<vmem>>, vector<8x384xf32>,
    %c0_i32_8 = arith.constant 0 : i32
    %9 = arith.cmpi eq, %arg2, %c0_i32_8 : i32
    %10 = arith.extui %9 : i1 to i32
    %c0_i32_9 = arith.constant 0 : i32
    %11 = arith.cmpi ne, %10, %c0_i32_9 : i32
    scf.if %11 {
      %c0_10 = arith.constant 0 : index
      %c0_11 = arith.constant 0 : index
      %12 = vector.load %arg6[%c0_10, %c0_11] : memref<8x384xf32, #tpu.memory_space<vmem>>, vector<8x384xf32>
      %c0_12 = arith.constant 0 : index
      %c0_13 = arith.constant 0 : index
      %13 = vector.load %arg5[%c0_12, %c0_13] : memref<8x1xf32, #tpu.memory_space<vmem>>, vector<8x1xf32>
      %14 = vector.broadcast %13 : vector<8x1xf32> to vector<8x384xf32>
      %15 = arith.addf %12, %14 : vector<8x384xf32>
      %c0_14 = arith.constant 0 : index
      %c0_15 = arith.constant 0 : index
      %16 = vector.load %arg6[%c0_14, %c0_15] : memref<8x384xf32, #tpu.memory_space<vmem>>, vector<8x384xf32>
      tpu.vector_store %arg6[%c0_14, %c0_15], %15 {strides = array<i32>} : memref<8x384xf32, #tpu.memory_space<vmem>>, vector<8x384xf32>,
    } else {
    }
    return
  }
  func.func @transform_0(%arg0: i32, %arg1: i32, %arg2: i32) -> (i32, i32) {
    %c0_i32 = arith.constant 0 : i32
    return %arg0, %arg2 : i32, i32
  }
  func.func @transform_1(%arg0: i32, %arg1: i32, %arg2: i32) -> (i32, i32) {
    %c0_i32 = arith.constant 0 : i32
    return %arg2, %arg1 : i32, i32
  }
  func.func @transform_2(%arg0: i32, %arg1: i32, %arg2: i32) -> (i32, i32) {
    %c0_i32 = arith.constant 0 : i32
    %c0_i32_0 = arith.constant 0 : i32
    return %arg0, %c0_i32 : i32, i32
  }
  func.func @transform_3(%arg0: i32, %arg1: i32, %arg2: i32) -> (i32, i32) {
    %c0_i32 = arith.constant 0 : i32
    return %arg0, %arg1 : i32, i32
  }
}

module attributes {stable_mosaic.version = 11 : i64} {
  func.func @_ew_kernel(%arg0: i32, %arg1: memref<8x512xf32, #tpu.memory_space<vmem>>, %arg2: memref<8x512xf32, #tpu.memory_space<vmem>>, %arg3: memref<8x512xf32, #tpu.memory_space<vmem>>, %arg4: memref<8x512xf32, #tpu.memory_space<vmem>>, %arg5: memref<8x512xf32, #tpu.memory_space<vmem>>, %arg6: memref<8x512xf32, #tpu.memory_space<vmem>>, %arg7: memref<8x512xf32, #tpu.memory_space<vmem>>) attributes {dimension_semantics = [#tpu.dimension_semantics<parallel>], iteration_bounds = array<i64: 1>, scalar_prefetch = 0 : i64, scratch_operands = 0 : i64, tpu.core_type = #tpu.core_type<tc>, window_params = [{transform_indices = @transform_0, window_bounds = array<i64: 8, 512>}, {transform_indices = @transform_1, window_bounds = array<i64: 8, 512>}, {transform_indices = @transform_2, window_bounds = array<i64: 8, 512>}, {transform_indices = @transform_3, window_bounds = array<i64: 8, 512>}, {transform_indices = @transform_4, window_bounds = array<i64: 8, 512>}, {transform_indices = @transform_5, window_bounds = array<i64: 8, 512>}, {transform_indices = @transform_6, window_bounds = array<i64: 8, 512>}]} {
    %c0 = arith.constant 0 : index
    %c0_0 = arith.constant 0 : index
    %0 = vector.load %arg1[%c0, %c0_0] : memref<8x512xf32, #tpu.memory_space<vmem>>, vector<8x512xf32>
    %c0_1 = arith.constant 0 : index
    %c0_2 = arith.constant 0 : index
    %1 = vector.load %arg2[%c0_1, %c0_2] : memref<8x512xf32, #tpu.memory_space<vmem>>, vector<8x512xf32>
    %c0_3 = arith.constant 0 : index
    %c0_4 = arith.constant 0 : index
    %2 = vector.load %arg3[%c0_3, %c0_4] : memref<8x512xf32, #tpu.memory_space<vmem>>, vector<8x512xf32>
    %c0_5 = arith.constant 0 : index
    %c0_6 = arith.constant 0 : index
    %3 = vector.load %arg4[%c0_5, %c0_6] : memref<8x512xf32, #tpu.memory_space<vmem>>, vector<8x512xf32>
    %c0_7 = arith.constant 0 : index
    %c0_8 = arith.constant 0 : index
    %4 = vector.load %arg5[%c0_7, %c0_8] : memref<8x512xf32, #tpu.memory_space<vmem>>, vector<8x512xf32>
    %c0_9 = arith.constant 0 : index
    %c0_10 = arith.constant 0 : index
    %5 = vector.load %arg6[%c0_9, %c0_10] : memref<8x512xf32, #tpu.memory_space<vmem>>, vector<8x512xf32>
    %6 = arith.negf %0 : vector<8x512xf32>
    %7 = math.exp %6 : vector<8x512xf32>
    %cst = arith.constant 1.000000e+00 : f32
    %8 = vector.broadcast %cst : f32 to vector<8x512xf32>
    %9 = arith.addf %8, %7 : vector<8x512xf32>
    %10 = arith.divf %8, %9 : vector<8x512xf32>
    %11 = arith.mulf %10, %3 : vector<8x512xf32>
    %12 = arith.negf %1 : vector<8x512xf32>
    %13 = math.exp %12 : vector<8x512xf32>
    %cst_11 = arith.constant 1.000000e+00 : f32
    %14 = vector.broadcast %cst_11 : f32 to vector<8x512xf32>
    %15 = arith.addf %14, %13 : vector<8x512xf32>
    %16 = arith.divf %14, %15 : vector<8x512xf32>
    %17 = arith.mulf %16, %4 : vector<8x512xf32>
    %18 = arith.addf %11, %17 : vector<8x512xf32>
    %19 = arith.negf %2 : vector<8x512xf32>
    %20 = math.exp %19 : vector<8x512xf32>
    %cst_12 = arith.constant 1.000000e+00 : f32
    %21 = vector.broadcast %cst_12 : f32 to vector<8x512xf32>
    %22 = arith.addf %21, %20 : vector<8x512xf32>
    %23 = arith.divf %21, %22 : vector<8x512xf32>
    %24 = arith.mulf %23, %5 : vector<8x512xf32>
    %25 = arith.addf %18, %24 : vector<8x512xf32>
    %c0_13 = arith.constant 0 : index
    %c0_14 = arith.constant 0 : index
    %26 = vector.load %arg7[%c0_13, %c0_14] : memref<8x512xf32, #tpu.memory_space<vmem>>, vector<8x512xf32>
    tpu.vector_store %arg7[%c0_13, %c0_14], %25 {strides = array<i32>} : memref<8x512xf32, #tpu.memory_space<vmem>>, vector<8x512xf32>,
    return
  }
  func.func @transform_0(%arg0: i32) -> (i32, i32) {
    %c0_i32 = arith.constant 0 : i32
    %c0_i32_0 = arith.constant 0 : i32
    return %arg0, %c0_i32 : i32, i32
  }
  func.func @transform_1(%arg0: i32) -> (i32, i32) {
    %c0_i32 = arith.constant 0 : i32
    %c0_i32_0 = arith.constant 0 : i32
    return %arg0, %c0_i32 : i32, i32
  }
  func.func @transform_2(%arg0: i32) -> (i32, i32) {
    %c0_i32 = arith.constant 0 : i32
    %c0_i32_0 = arith.constant 0 : i32
    return %arg0, %c0_i32 : i32, i32
  }
  func.func @transform_3(%arg0: i32) -> (i32, i32) {
    %c0_i32 = arith.constant 0 : i32
    %c0_i32_0 = arith.constant 0 : i32
    return %arg0, %c0_i32 : i32, i32
  }
  func.func @transform_4(%arg0: i32) -> (i32, i32) {
    %c0_i32 = arith.constant 0 : i32
    %c0_i32_0 = arith.constant 0 : i32
    return %arg0, %c0_i32 : i32, i32
  }
  func.func @transform_5(%arg0: i32) -> (i32, i32) {
    %c0_i32 = arith.constant 0 : i32
    %c0_i32_0 = arith.constant 0 : i32
    return %arg0, %c0_i32 : i32, i32
  }
  func.func @transform_6(%arg0: i32) -> (i32, i32) {
    %c0_i32 = arith.constant 0 : i32
    %c0_i32_0 = arith.constant 0 : i32
    return %arg0, %c0_i32 : i32, i32
  }
}

</mosaic_0001>

<bundles_post_ra>
// kernel: tile.23
= control target key start
LH: loop header
LB: loop body
LE: loop exit
PB: predicated region body
PF: predicated region fallthrough
CT: control target
= control target key end

     0   :  { %s22_s0 = inlined_call_operand.vmem [shape: f32[15], index: 0, kind: input, shape index: {}]   ;;  %s23_s1 = inlined_call_operand.vmem [shape: f32[8,15], index: 1, kind: output, shape index: {}]  }
   0x1   :  { %v4_v0 = vld [vmem:[%s22_s0] ss:$0 sm:$0xff] }
   0x2   :  { %5 = vst [vmem:[%s23_s1] sm:$0xff] %v4_v0 }

// kernel: tile.0
= control target key start
LH: loop header
LB: loop body
LE: loop exit
PB: predicated region body
PF: predicated region fallthrough
CT: control target
= control target key end

     0   :  { %s174_s10 = smov 125   ;;  %vm3_vm0 = vcmask 7168   ;;  %s175_s11 = smov 127   ;;  %s349_s0 = inlined_call_operand.vmem [shape: f32[8,15], index: 0, kind: input, shape index: {}]   ;;  %s350_s1 = inlined_call_operand.vmem [shape: f32[120,1], index: 1, kind: output, shape index: {}]  }
   0x1   :  { %v25_v0 = vld.sshfl [vmem:[%s349_s0] sm:$0xff pattern:$0x46135702]   ;;  %s176_s18 = smov 124   ;;  %s177_s19 = smov 126  }
   0x2   :  { %v5_v1 = vld.sshfl [vmem:[%s349_s0] sm:$0xff pattern:$0x24613570]   ;;  %26 = vrot.lane.b32.xlu1 %v25_v0, %s174_s10  ;;  %s179_s22 = smov 123   ;;  %s180_s23 = smov 120  }
   0x3   :  { %6 = vrot.lane.b32.xlu0 %v5_v1, %s175_s11  ;;  %v2_v2 = vld [vmem:[%s349_s0] sm:$0xff]   ;;  %s181_s24 = smov 121   ;;  %s182_s25 = smov 118  }
   0x4   :  { %4 = vst.msk [vmem:[%s350_s1] ss:$15 sm:$0xff] %vm3_vm0, %v2_v2   ;;  %v35_v3 = vld.sshfl [vmem:[%s349_s0] sm:$0xff pattern:$0x61357024]   ;;  %s183_s26 = smov 119  }
   0x5   :  { %v55_v4 = vld.sshfl [vmem:[%s349_s0] sm:$0xff pattern:$0x13570246]   ;;  %s178_s0 = smov 122   ;;  %s184_s27 = smov 116  }
   0x6   :  { %36 = vrot.lane.b32.xlu1 %v35_v3, %s176_s18  ;;  %s185_s28 = smov 117   ;;  %s186_s29 = smov 114  }
   0x7   :  { %16 = vrot.lane.b32.xlu0 %v25_v0, %s177_s19  ;;  %s187_s30 = smov 115  }
   0xa   :  { %56 = vrot.lane.b32.xlu1 %v55_v4, %s178_s0 }
   0xb   :  { %46 = vrot.lane.b32.xlu0 %v35_v3, %s179_s22 }
   0xe   :  { %72 = vrot.lane.b32.xlu1 %v55_v4, %s180_s23 }
   0xf   :  { %64 = vrot.lane.b32.xlu0 %v55_v4, %s181_s24 }
  0x12   :  { %88 = vrot.lane.b32.xlu1 %v55_v4, %s182_s25 }
  0x13   :  { %80 = vrot.lane.b32.xlu0 %v55_v4, %s183_s26 }
  0x16   :  { %104 = vrot.lane.b32.xlu1 %v55_v4, %s184_s27 }
  0x17   :  { %96 = vrot.lane.b32.xlu0 %v55_v4, %s185_s28 }
  0x1a   :  { %120 = vrot.lane.b32.xlu1 %v55_v4, %s186_s29 }
  0x1b   :  { %112 = vrot.lane.b32.xlu0 %v55_v4, %s187_s30 }
  0x74   :  { %v27_v5 = vpop.permute.xlu1 %26  }
  0x75   :  { %v7_v6 = vpop.permute.xlu0 %6   ;;  %133 = vst.msk [vmem:[%s350_s1 + $0x21] ss:$-30 sm:$0x3] %vm3_vm0, %v27_v5   ;;  %134 = vst.msk [vmem:[%s350_s1 + $0xa8] ss:$-30 sm:$0x3c] %vm3_vm0, %v27_v5  }
  0x76   :  { %135 = vst.msk [vmem:[%s350_s1 + $0x111] ss:$-30 sm:$0xc0] %vm3_vm0, %v27_v5   ;;  %127 = vst.msk [vmem:[%s350_s1 + $0x1] ss:$105 sm:$0x3] %vm3_vm0, %v7_v6  }
  0x77   :  { %128 = vst.msk [vmem:[%s350_s1 + $0x88] ss:$-30 sm:$0x1c] %vm3_vm0, %v7_v6   ;;  %129 = vst.msk [vmem:[%s350_s1 + $0xf1] ss:$-30 sm:$0xe0] %vm3_vm0, %v7_v6  }
  0x78   :  { %v37_v7 = vpop.permute.xlu1 %36  }
  0x79   :  { %v17_v8 = vpop.permute.xlu0 %16   ;;  %136 = vst.msk [vmem:[%s350_s1 + $0x40] ss:$-30 sm:$0x7] %vm3_vm0, %v37_v7   ;;  %137 = vst.msk [vmem:[%s350_s1 + $0xc7] ss:$-30 sm:$0x78] %vm3_vm0, %v37_v7  }
  0x7a   :  { %138 = vst.msk [vmem:[%s350_s1 + $0x57] sm:$0x80] %vm3_vm0, %v37_v7   ;;  %130 = vst.msk [vmem:[%s350_s1 + $0x20] ss:$-30 sm:$0x3] %vm3_vm0, %v17_v8  }
  0x7b   :  { %131 = vst.msk [vmem:[%s350_s1 + $0xa7] ss:$-30 sm:$0x3c] %vm3_vm0, %v17_v8   ;;  %132 = vst.msk [vmem:[%s350_s1 + $0x110] ss:$-30 sm:$0xc0] %vm3_vm0, %v17_v8  }
  0x7c   :  { %v57_v9 = vpop.permute.xlu1 %56  }
  0x7d   :  { %v47_v10 = vpop.permute.xlu0 %46   ;;  %142 = vst.msk [vmem:[%s350_s1 + $0x60] ss:$-30 sm:$0xf] %vm3_vm0, %v57_v9   ;;  %143 = vst.msk [vmem:[%s350_s1 + $0xe7] ss:$-30 sm:$0xf0] %vm3_vm0, %v57_v9  }
  0x7e   :  { %139 = vst.msk [vmem:[%s350_s1 + $0x41] ss:$-30 sm:$0x7] %vm3_vm0, %v47_v10   ;;  %140 = vst.msk [vmem:[%s350_s1 + $0xc8] ss:$-30 sm:$0x78] %vm3_vm0, %v47_v10  }
  0x7f   :  { %141 = vst.msk [vmem:[%s350_s1 + $0x58] sm:$0x80] %vm3_vm0, %v47_v10  }
  0x80   :  { %v73_v11 = vpop.permute.xlu1 %72  }
  0x81   :  { %v65_v12 = vpop.permute.xlu0 %64   ;;  %146 = vst.msk [vmem:[%s350_s1 + $0x62] ss:$-30 sm:$0xf] %vm3_vm0, %v73_v11   ;;  %147 = vst.msk [vmem:[%s350_s1 + $0xe9] ss:$-30 sm:$0xf0] %vm3_vm0, %v73_v11  }
  0x82   :  { %144 = vst.msk [vmem:[%s350_s1 + $0x61] ss:$-30 sm:$0xf] %vm3_vm0, %v65_v12   ;;  %145 = vst.msk [vmem:[%s350_s1 + $0xe8] ss:$-30 sm:$0xf0] %vm3_vm0, %v65_v12  }
  0x84   :  { %v89_v13 = vpop.permute.xlu1 %88  }
  0x85   :  { %v81_v14 = vpop.permute.xlu0 %80   ;;  %150 = vst.msk [vmem:[%s350_s1 + $0x64] ss:$-30 sm:$0xf] %vm3_vm0, %v89_v13   ;;  %151 = vst.msk [vmem:[%s350_s1 + $0xeb] ss:$-30 sm:$0xf0] %vm3_vm0, %v89_v13  }
  0x86   :  { %148 = vst.msk [vmem:[%s350_s1 + $0x63] ss:$-30 sm:$0xf] %vm3_vm0, %v81_v14   ;;  %149 = vst.msk [vmem:[%s350_s1 + $0xea] ss:$-30 sm:$0xf0] %vm3_vm0, %v81_v14  }
  0x88   :  { %v105_v15 = vpop.permute.xlu1 %104  }
  0x89   :  { %v97_v16 = vpop.permute.xlu0 %96   ;;  %154 = vst.msk [vmem:[%s350_s1 + $0x66] ss:$-30 sm:$0xf] %vm3_vm0, %v105_v15   ;;  %155 = vst.msk [vmem:[%s350_s1 + $0xed] ss:$-30 sm:$0xf0] %vm3_vm0, %v105_v15  }
  0x8a   :  { %152 = vst.msk [vmem:[%s350_s1 + $0x65] ss:$-30 sm:$0xf] %vm3_vm0, %v97_v16   ;;  %153 = vst.msk [vmem:[%s350_s1 + $0xec] ss:$-30 sm:$0xf0] %vm3_vm0, %v97_v16  }
  0x8c   :  { %v121_v17 = vpop.permute.xlu1 %120  }
  0x8d   :  { %v113_v18 = vpop.permute.xlu0 %112   ;;  %158 = vst.msk [vmem:[%s350_s1 + $0x68] ss:$-30 sm:$0xf] %vm3_vm0, %v121_v17   ;;  %159 = vst.msk [vmem:[%s350_s1 + $0xef] ss:$-30 sm:$0xf0] %vm3_vm0, %v121_v17  }
  0x8e   :  { %156 = vst.msk [vmem:[%s350_s1 + $0x67] ss:$-30 sm:$0xf] %vm3_vm0, %v113_v18   ;;  %157 = vst.msk [vmem:[%s350_s1 + $0xee] ss:$-30 sm:$0xf0] %vm3_vm0, %v113_v18  }

// kernel: blendnet_forward.12
= control target key start
LH: loop header
LB: loop body
LE: loop exit
PB: predicated region body
PF: predicated region fallthrough
CT: control target
= control target key end

     0   :  { %s904_s15 = smov 0   ;;  %s906_s16 = smov 0   ;;  %s1062_s0 = inlined_call_operand.vmem [shape: bf16[2,24,4096], index: 0, kind: input, shape index: {}, may-alias: {0,1}]   ;;  %s1063_s1 = inlined_call_operand.vmem [shape: bf16[2,24,4096], index: 1, kind: input, shape index: {}, may-alias: {0,1}]   ;;  %s1064_s2 = inlined_call_operand.vmem [shape: bf16[3,8,24], index: 2, kind: input, shape index: {}]   ;;  %s1065_s3 = inlined_call_operand.vmem [shape: f32[8,1], index: 3, kind: input, shape index: {}]   ;;  %s1066_s4 = inlined_call_operand.vmem [shape: f32[2,8,3968], index: 4, kind: output, shape index: {}]  }
   0x1   :  { %s908_s17 = smov 0   ;;  %s910_s18 = smov 0  }
   0x2   :  { %s912_s19 = smov 0   ;;  %s914_s20 = smov 0  }
   0x3   :  { %s916_s21 = smov 0   ;;  %s918_s22 = smov 0  }
   0x4   :  { %s920_s23 = smov 0  }
   0x5 LB: > { %s23_s24 = sadd.s32 1, %s864_s21  ;;  %s26_s25 = sadd.s32 1, %s868_s22  ;;  %s872_s23 = sphi %s920_s23, %s14_s23   ;;  %s868_s22 = sphi %s918_s22, %s1076_s22   ;;  %s864_s21 = sphi %s916_s21, %s1075_s21   ;;  %s860_s20 = sphi %s914_s20, %s1074_s20   ;;  %s856_s19 = sphi %s912_s19, %s1073_s19   ;;  %s852_s18 = sphi %s910_s18, %s1072_s18   ;;  %s848_s17 = sphi %s908_s17, %s1071_s17   ;;  %s844_s16 = sphi %s906_s16, %s1070_s16   ;;  %s840_s15 = sphi %s904_s15, %s1069_s15  }
   0x6   : > { %p24_p0 = scmp.ge.s32.totalorder %s23_s24, 31  ;;  %p42_p1 = scmp.ne.s32.totalorder %s852_s18, %s848_s17 }
   0x7   : > { %p43_p2 = scmp.eq.s32.totalorder %s872_s23, 0  ;;  %s35_s5 = sadd.s32 1, %s852_s18 }
   0x8   : > { %s954_s26 = scalar_select %p24_p0, 0, %s23_s24  }
   0x9   : > { %s1078_s25 = smov (!%p24_p0, %s26_s25), %s868_s22  ;;  %p959_p3 = por %p43_p2, %p42_p1 }
   0xa   : > { %p28_p4 = scmp.ge.s32.totalorder %s1078_s25, 2  ;;  %s59_s28 = sadd.s32 1, %s954_s26 }
   0xb   : > { %s31_s29 = ssub.s32 %s864_s21, %s954_s26  ;;  %s61_s30 = ssub.s32 %s23_s24, %s59_s28 }
   0xc   : > { %s1080_s25 = smov (%p28_p4, %s1078_s25), 0  ;;  %p72_p5 = scmp.ne.s32.totalorder %s844_s16, %s840_s15 }
   0xd   : > { %s30_s6 = ssub.s32 %s868_s22, %s1080_s25  ;;  %s65_s7 = sadd.s32 1, %s844_s16 }
   0xe   : > { %s32_s8 = sor.u32 %s31_s29, %s30_s6  ;;  %s62_s9 = sor.u32 %s61_s30, %s30_s6 }
   0xf   : > { %p33_p6 = scmp.eq.s32.totalorder %s32_s8, 0  ;;  %p63_p7 = scmp.eq.s32.totalorder %s62_s9, 0 }
  0x10   : > { %p976_p8 = por %p72_p5, %p43_p2  ;;  %p662_p9 = scmp.ge.s32.totalorder %s872_s23, 62 }
  0x11   : > { %s981_s11 = scalar_select %p33_p6, %s852_s18, %s35_s5  }
  0x12   : > { %s984_s12 = scalar_select %p63_p7, %s844_s16, %s65_s7  }
  0x13   : > { %174 = sbr.rel (%p662_p9) target bundleno = 46 (0x2e), region = 24 }
  0x1a   : > { %177 = sbr.rel (!%p959_p3) target bundleno = 36 (0x24), region = 28  ;;  %s179_s13 = sand.u32 (%p959_p3), 1, %s852_s18  }
  0x1b   : > { %s715_s14 = smul.u32 (%p959_p3), 96, %s868_s22 }
  0x1c   : > { %s714_s24 = smul.u32 (%p959_p3), 12, %s179_s13 }
  0x1d   : > { %s183_s28 = sadd.s32 (%p959_p3), %s864_s21, %s715_s14 }
  0x1e   : > { %s663_s29 = sshll.u32 (%p959_p3), %s183_s28, 2  ;;  %s181_s7 = scalar_lea.vmem (%p959_p3), [#allocation2], %s714_s24 }
  0x1f   : > { %s185_s5 = scalar_lea.vmem (%p959_p3), %s1062_s0, %s663_s29 }
  0x20   : > { %v201_v0 = vld [vmem:[%s185_s5] sm:$0xf] (%p959_p3) }
  0x21   : > { %v203_v1 = vld [vmem:[%s185_s5 + $0x80] sm:$0xf]  ;;  %202 = vst [vmem:[%s181_s7] sm:$0xf] %v201_v0 }
  0x22   : > { %v205_v2 = vld [vmem:[%s185_s5 + $0x100] sm:$0xf]  ;;  %204 = vst [vmem:[%s181_s7 + $0x4] sm:$0xf] %v203_v1 }
  0x23   : > { %206 = vst [vmem:[%s181_s7 + $0x8] sm:$0xf] %v205_v2 }
  0x24 PF: > { %235 = sbr.rel (!%p976_p8) target bundleno = 46 (0x2e), region = 69  ;;  %s237_s27 = sand.u32 (%p976_p8), 1, %s844_s16  }
  0x25   : > { %s585_s8 = smul.u32 (%p976_p8), 96, %s868_s22 }
  0x26   : > { %s716_s9 = smul.u32 (%p976_p8), 12, %s237_s27 }
  0x27   : > { %s586_s13 = sadd.s32 (%p976_p8), %s864_s21, %s585_s8 }
  0x28   : > { %s664_s14 = sshll.u32 (%p976_p8), %s586_s13, 2  ;;  %s239_s24 = scalar_lea.vmem (%p976_p8), [#allocation3], %s716_s9 }
  0x29   : > { %s588_s30 = scalar_lea.vmem (%p976_p8), %s1063_s1, %s664_s14 }
  0x2a   : > { %v665_v3 = vld [vmem:[%s588_s30 + $0x4] sm:$0xf] (%p976_p8) }
  0x2b   : > { %v666_v4 = vld [vmem:[%s588_s30 + $0x84] sm:$0xf]  ;;  %261 = vst [vmem:[%s239_s24] sm:$0xf] %v665_v3 }
  0x2c   : > { %v667_v5 = vld [vmem:[%s588_s30 + $0x104] sm:$0xf]  ;;  %263 = vst [vmem:[%s239_s24 + $0x4] sm:$0xf] %v666_v4 }
  0x2d   : > { %265 = vst [vmem:[%s239_s24 + $0x8] sm:$0xf] %v667_v5 }
  0x2e PF: > { %p668_p10 = scmp.ge.s32.totalorder %s872_s23, 1  ;;  %p293_p11 = scmp.lt.s32.totalorder %s872_s23, 63 }
  0x30   : > { %p294_p12 = pnand %p668_p10, %p293_p11 }
  0x31   : > { %s300_s10 = sand.u32 (!%p294_p12), 1, %s848_s17   ;;  %s307_s5 = sand.u32 (!%p294_p12), 1, %s840_s15   ;;  %v874_v6 = vmov (!%p294_p12), 0.0   ;;  %vm875_vm0 = vmmov (!%p294_p12), 0   ;;  %vm391_vm1 = vcmask (!%p294_p12), 1043456   ;;  %vm387_vm2 = vcmask (!%p294_p12), 195584  }
  0x32   : > { %297 = sbr.rel (%p294_p12) target bundleno = 407 (0x197), region = 110  ;;  %690 = vmatprep.subr.bf16.mxu0 (!%p294_p12), %v874_v6  ;;  %698 = vmatprep.subr.bf16.mxu1 (!%p294_p12), %v874_v6  ;;  %s876_s8 = smov (!%p294_p12), 127   ;;  %v372_v12 = vld [vmem:[%s1064_s2] sm:$0xf] (!%p294_p12)  ;;  %v878_v13 = vmov (!%p294_p12), 0   ;;  %vm383_vm3 = vcmask (!%p294_p12), 1039360  }
  0x33   : > { %s717_s6 = smul.u32 (!%p294_p12), 12, %s300_s10  ;;  %694 = vmatprep.mubr.msk.bf16.mxu0 (!%p294_p12), %vm875_vm0, %v874_v6  ;;  %702 = vmatprep.mubr.msk.bf16.mxu1 (!%p294_p12), %vm875_vm0, %v874_v6  ;;  %s877_s13 = smov (!%p294_p12), 126   ;;  %v542_v14 = vld [vmem:[%s1065_s3] sm:$0xff] (!%p294_p12)  ;;  %vm491_vm4 = vcmask (!%p294_p12), 1031168   ;;  %v677_v30 = vld [vmem:[%s1064_s2 + $0x8] sm:$0xf] (!%p294_p12) }
  0x34   : > { %s718_s7 = smul.u32 (!%p294_p12), 12, %s307_s5  ;;  %797 = vset.pattern.permute.xlu0 (!%p294_p12), %v878_v13  ;;  %v674_v24 = vld [vmem:[%s1064_s2 + $0x4] sm:$0xf] (!%p294_p12)  ;;  %p340_p13 = scmp.lt.s32.totalorder (!%p294_p12), %s860_s20, 1 }
  0x35   : > { %s302_s27 = scalar_lea.vmem (!%p294_p12), [#allocation2], %s717_s6  ;;  %p342_p0 = scmp.lt.s32.totalorder (!%p294_p12), %s856_s19, 30 }
  0x36   : > { %v798_v7 = vld [vmem:[%s302_s27 + $0x8] ss:$0 sps:$4 sm:$0xff] (!%p294_p12)   ;;  %v799_v8 = vld [vmem:[%s302_s27] sm:$0xff] (!%p294_p12)   ;;  %s309_s9 = scalar_lea.vmem (!%p294_p12), [#allocation3], %s718_s7 }
  0x37   : > { %379 = vrot.lane.b32.xlu1 (!%p294_p12), %v798_v7, %s876_s8  ;;  %v800_v9 = vld [vmem:[%s309_s9 + $0x8] ss:$0 sps:$4 sm:$0xff] (!%p294_p12)   ;;  %375 = vrot.lane.b32.xlu0 (!%p294_p12), %v799_v8, %s876_s8  ;;  %v801_v10 = vld [vmem:[%s309_s9] sm:$0xff] (!%p294_p12)   ;;  %v439_v11 = vsel (!%p294_p12), %vm391_vm1, %v798_v7, 0 }
  0x38   : > { %699 = vmatpush3.bf16.msra.mxu1 (!%p294_p12), %v799_v8 }
  0x39   : > { %700 = vmatprep.subr.bf16.mxu1 %v874_v6  ;;  %s1082_s20 = smov (!%p340_p13, %s860_s20), 1  ;;  %s1084_s19 = smov (!%p342_p0, %s856_s19), 30 }
  0x3a   : > { %s719_s6 = smul.u32 31, %s1082_s20 }
  0x3b   : > { %381 = vrot.lane.b32.xlu1 %v800_v9, %s876_s8  ;;  %377 = vrot.lane.b32.xlu0 %v801_v10, %s876_s8 }
  0x3c   : > { %701 = vmatpush3.bf16.msra.mxu1 %v439_v11  ;;  %s345_s5 = sadd.s32 %s719_s6, %s1084_s19 }
  0x3d   : > { %s669_s7 = sshll.u32 %s345_s5, 3 }
  0x3e   : > { %s347_s9 = scalar_lea.vmem %s1066_s4, %s669_s7 }
  0x3f   : > { %485 = vrot.lane.b32.xlu1 %v801_v10, %s877_s13  ;;  %703 = vmatmul.mubr.msk.bf16.vlgmr.msra.gmra.mrb[0].mxu1 %vm387_vm2, %v372_v12 }
  0x40   : > { %483 = vrot.lane.b32.xlu0 %v799_v8, %s877_s13 }
  0x43   : > { %489 = vrot.lane.b32.xlu1 %v800_v9, %s877_s13 }
  0x44   : > { %487 = vrot.lane.b32.xlu0 %v798_v7, %s877_s13 }
  0x48   : > { %545 = vperm.xlu0 %797, %v542_v14  }
  0xa9   : > { %v380_v15 = vpop.permute.xlu1 %379  ;;  %v376_v16 = vpop.permute.xlu0 %375 }
  0xad   : > { %v382_v17 = vpop.permute.xlu1 %381  ;;  %v378_v18 = vpop.permute.xlu0 %377 }
  0xae   : > { %v384_v19 = vsel %vm383_vm3, %v376_v16, %v378_v18  ;;  %v385_v20 = vsel %vm383_vm3, %v380_v15, %v382_v17 }
  0xaf   : > { %691 = vmatpush3.bf16.msra.mxu0 %v384_v19  ;;  %v393_v23 = vsel %vm391_vm1, %v385_v20, 0 }
  0xb0   : > { %692 = vmatprep.subr.bf16.mxu0 %v874_v6 }
  0xb1   : > { %v486_v21 = vpop.permute.xlu1 %485 }
  0xb2   : > { %v484_v22 = vpop.permute.xlu0 %483 }
  0xb3   : > { %693 = vmatpush3.bf16.msra.mxu0 %v393_v23  ;;  %v492_v25 = vsel %vm491_vm4, %v484_v22, %v486_v21 }
  0xb4   : > { %706 = vmatprep.subr.bf16.mxu0 %v874_v6 }
  0xb5   : > { %v490_v26 = vpop.permute.xlu1 %489 }
  0xb6   : > { %v488_v27 = vpop.permute.xlu0 %487  ;;  %695 = vmatmul.mubr.msk.bf16.vlgmr.msra.gmra.mrb[0].mxu0 %vm387_vm2, %v674_v24 }
  0xb7   : > { %v493_v28 = vsel %vm491_vm4, %v488_v27, %v490_v26  ;;  %707 = vmatpush3.bf16.msra.mxu0 %v492_v25  ;;  %710 = vmatprep.mubr.msk.bf16.mxu0 %vm875_vm0, %v874_v6 }
  0xb8   : > { %v499_v29 = vsel %vm391_vm1, %v493_v28, 0  ;;  %708 = vmatprep.subr.bf16.mxu0 %v874_v6 }
  0xbb   : > { %709 = vmatpush3.bf16.msra.mxu0 %v499_v29 }
  0xbe   : > { %711 = vmatmul.mubr.msk.bf16.vlgmr.msra.gmra.mrb[4].mxu0 %vm387_vm2, %v677_v30 }
  0xc7   : > { %v546_v41 = vpop.permute.xlu0 %545 }
 0x112   : > { %v475_v31 = vpop.f32.mrb[0].mxu1 }
 0x113   : > { %v704_v32 = vpop.f32.mrb[1].mxu1 }
 0x114   : > { %v478_v33 = vpop.f32.mrb[2].mxu1 }
 0x115   : > { %v705_v34 = vpop.f32.mrb[3].mxu1 }
 0x189   : > { %v429_v35 = vpop.f32.mrb[0].mxu0 }
 0x18a   : > { %v696_v36 = vpop.f32.mrb[1].mxu0  ;;  %v476_v37 = vadd.f32 %v475_v31, %v429_v35 }
 0x18b   : > { %v432_v38 = vpop.f32.mrb[2].mxu0 }
 0x18c   : > { %v697_v39 = vpop.f32.mrb[3].mxu0 }
 0x191   : > { %v535_v40 = vpop.f32.mrb[4].mxu0 }
 0x192   : > { %v541_v42 = vadd.f32 %v535_v40, %v476_v37  ;;  %v712_v43 = vpop.f32.mrb[5].mxu0 }
 0x193   : > { %v538_v44 = vpop.f32.mrb[6].mxu0 }
 0x194   : > { %v548_v45 = vadd.f32 %v546_v41, %v541_v42  ;;  %v713_v46 = vpop.f32.mrb[7].mxu0 }
 0x196   : > { %549 = vst [vmem:[%s347_s9] sm:$0xff] %v548_v45 }
 0x197 PF: > { %s14_s23 = sadd.s32 1, %s872_s23   ;;  %s1069_s15 = smov %s844_s16 }
 0x198   : > { %p11_p1 = scmp.ge.s32.totalorder %s14_s23, 64   ;;  %s1070_s16 = smov %s984_s12 }
 0x199   : > { %s1071_s17 = smov %s852_s18  ;;  %s1072_s18 = smov %s981_s11 }
 0x19a   : > { %s1073_s19 = smov %s864_s21  ;;  %s1074_s20 = smov %s868_s22 }
 0x19b   : > { %s1075_s21 = smov %s954_s26  ;;  %s1076_s22 = smov %s1080_s25 }
 0x19c   :  { %13 = sbr.rel (!%p11_p1) target bundleno = 5 (0x5), region = 163 }

// kernel: blendnet_forward.13
= control target key start
LH: loop header
LB: loop body
LE: loop exit
PB: predicated region body
PF: predicated region fallthrough
CT: control target
= control target key end

     0   :  { %s915_s12 = smov 0   ;;  %s917_s13 = smov 0   ;;  %s1091_s0 = inlined_call_operand.vmem [shape: f32[2,120,128], index: 0, kind: input, shape index: {}]   ;;  %s1092_s1 = inlined_call_operand.vmem [shape: f32[120,1], index: 1, kind: input, shape index: {}]   ;;  %s1093_s2 = inlined_call_operand.vmem [shape: f32[120,1], index: 2, kind: input, shape index: {}]   ;;  %s1094_s3 = inlined_call_operand.vmem [shape: bf16[2,120,128], index: 3, kind: output, shape index: {}]  }
   0x1   :  { %s919_s14 = smov 0  }
   0x2 LB: > { %s32_s15 = sadd.s32 1, %s888_s13  ;;  %p765_p0 = scmp.ge.s32.totalorder %s892_s14, 1  ;;  %s892_s14 = sphi %s919_s14, %s13_s14   ;;  %s888_s13 = sphi %s917_s13, %s1096_s13   ;;  %s884_s12 = sphi %s915_s12, %s1095_s12  }
   0x3   : > { %p34_p1 = scmp.ge.s32.totalorder %s32_s15, 2  ;;  %p194_p2 = scmp.lt.s32.totalorder %s892_s14, 3 }
   0x5   : > { %s1098_s15 = smov (%p34_p1, %s32_s15), 0  ;;  %p195_p3 = pnand %p765_p0, %p194_p2 }
   0x6   : > { %v297_v0 = vld [vmem:[%s1092_s1 + $0x10] sm:$0xff] (!%p195_p3)  ;;  %v295_v1 = vld [vmem:[%s1092_s1] sm:$0xff] (!%p195_p3)  ;;  %v894_v2 = vmov (!%p195_p3), 0   ;;  %v298_v3 = vld [vmem:[%s1092_s1 + $0x18] sm:$0xff] (!%p195_p3)  ;;  %p243_p4 = scmp.lt.s32.totalorder (!%p195_p3), %s884_s12, 1 }
   0x7   : > { %198 = sbr.rel (%p195_p3) target bundleno = 200 (0xc8), region = 32  ;;  %869 = vset.pattern.permute.xlu1 (!%p195_p3), %v894_v2  ;;  %868 = vset.pattern.permute.xlu0 (!%p195_p3), %v894_v2  ;;  %v296_v4 = vld [vmem:[%s1092_s1 + $0x8] sm:$0xff] (!%p195_p3)  ;;  %v299_v6 = vld [vmem:[%s1092_s1 + $0x20] sm:$0xff] (!%p195_p3)  ;;  %v302_v7 = vld [vmem:[%s1092_s1 + $0x38] sm:$0xff] (!%p195_p3) }
   0x8   : > { %322 = vperm.xlu1 (!%p195_p3), %869, %v297_v0   ;;  %312 = vperm.xlu0 (!%p195_p3), %868, %v295_v1   ;;  %v300_v5 = vld [vmem:[%s1092_s1 + $0x28] sm:$0xff] (!%p195_p3)  ;;  %v301_v8 = vld [vmem:[%s1092_s1 + $0x30] sm:$0xff] (!%p195_p3)  ;;  %v303_v10 = vld [vmem:[%s1092_s1 + $0x40] sm:$0xff] (!%p195_p3) }
   0x9   : > { %v304_v9 = vld [vmem:[%s1092_s1 + $0x48] sm:$0xff] (!%p195_p3)  ;;  %v306_v11 = vld [vmem:[%s1092_s1 + $0x58] sm:$0xff] (!%p195_p3)  ;;  %v305_v12 = vld [vmem:[%s1092_s1 + $0x50] sm:$0xff] (!%p195_p3) }
   0xa   : > { %v308_v13 = vld [vmem:[%s1092_s1 + $0x68] sm:$0xff] (!%p195_p3)  ;;  %v307_v14 = vld [vmem:[%s1092_s1 + $0x60] sm:$0xff] (!%p195_p3)  ;;  %v309_v16 = vld [vmem:[%s1092_s1 + $0x70] sm:$0xff] (!%p195_p3) }
   0xb   : > { %v400_v15 = vld [vmem:[%s1093_s2] sm:$0xff] (!%p195_p3)  ;;  %v402_v17 = vld [vmem:[%s1093_s2 + $0x10] sm:$0xff] (!%p195_p3)  ;;  %v401_v18 = vld [vmem:[%s1093_s2 + $0x8] sm:$0xff] (!%p195_p3) }
   0xc   : > { %327 = vperm.xlu1 (!%p195_p3), %869, %v298_v3   ;;  %317 = vperm.xlu0 (!%p195_p3), %868, %v296_v4   ;;  %v404_v19 = vld [vmem:[%s1093_s2 + $0x20] sm:$0xff] (!%p195_p3)  ;;  %v403_v20 = vld [vmem:[%s1093_s2 + $0x18] sm:$0xff] (!%p195_p3)  ;;  %v406_v21 = vld [vmem:[%s1093_s2 + $0x30] sm:$0xff] (!%p195_p3) }
   0xd   : > { %v405_v22 = vld [vmem:[%s1093_s2 + $0x28] sm:$0xff] (!%p195_p3)  ;;  %v408_v23 = vld [vmem:[%s1093_s2 + $0x40] sm:$0xff] (!%p195_p3)  ;;  %v407_v24 = vld [vmem:[%s1093_s2 + $0x38] sm:$0xff] (!%p195_p3) }
   0xe   : > { %v410_v25 = vld [vmem:[%s1093_s2 + $0x50] sm:$0xff]  ;;  %v409_v26 = vld [vmem:[%s1093_s2 + $0x48] sm:$0xff]  ;;  %v412_v27 = vld [vmem:[%s1093_s2 + $0x60] sm:$0xff]  ;;  %s1100_s12 = smov (!%p243_p4, %s884_s12), 1 }
   0xf   : > { %v411_v28 = vld [vmem:[%s1093_s2 + $0x58] sm:$0xff]  ;;  %v414_v29 = vld [vmem:[%s1093_s2 + $0x70] sm:$0xff]  ;;  %v413_v30 = vld [vmem:[%s1093_s2 + $0x68] sm:$0xff]  ;;  %s841_s30 = smul.u32 120, %s1100_s12 }
  0x10   : > { %337 = vperm.xlu1 %869, %v300_v5   ;;  %332 = vperm.xlu0 %868, %v299_v6   ;;  %s842_s7 = smul.u32 60, %s1100_s12 }
  0x11   : > { %s1039_s6 = scalar_lea.vmem %s1091_s0, %s841_s30 }
  0x12   : > { %v280_v43 = vld [vmem:[%s1039_s6] sm:$0xff]  ;;  %v282_v47 = vld [vmem:[%s1039_s6 + $0x10] sm:$0xff]  ;;  %v281_v48 = vld [vmem:[%s1039_s6 + $0x8] sm:$0xff]  ;;  %s1058_s10 = scalar_lea.vmem %s1094_s3, %s842_s7 }
  0x13   : > { %v283_v54 = vld [vmem:[%s1039_s6 + $0x18] sm:$0xff]  ;;  %v284_v55 = vld [vmem:[%s1039_s6 + $0x20] sm:$0xff]  ;;  %v285_v0 = vld [vmem:[%s1039_s6 + $0x28] sm:$0xff] }
  0x14   : > { %347 = vperm.xlu1 %869, %v302_v7   ;;  %342 = vperm.xlu0 %868, %v301_v8   ;;  %v286_v1 = vld [vmem:[%s1039_s6 + $0x30] sm:$0xff] }
  0x18   : > { %357 = vperm.xlu1 %869, %v304_v9   ;;  %352 = vperm.xlu0 %868, %v303_v10  }
  0x1c   : > { %367 = vperm.xlu1 %869, %v306_v11   ;;  %362 = vperm.xlu0 %868, %v305_v12  }
  0x20   : > { %377 = vperm.xlu1 %869, %v308_v13   ;;  %372 = vperm.xlu0 %868, %v307_v14   ;;  %v287_v13 = vld [vmem:[%s1039_s6 + $0x38] sm:$0xff]  ;;  %v288_v14 = vld [vmem:[%s1039_s6 + $0x40] sm:$0xff] }
  0x24   : > { %417 = vperm.xlu1 %869, %v400_v15   ;;  %382 = vperm.xlu0 %868, %v309_v16  }
  0x28   : > { %427 = vperm.xlu1 %869, %v402_v17   ;;  %422 = vperm.xlu0 %868, %v401_v18  }
  0x2c   : > { %437 = vperm.xlu1 %869, %v404_v19   ;;  %432 = vperm.xlu0 %868, %v403_v20  }
  0x30   : > { %447 = vperm.xlu1 %869, %v406_v21   ;;  %442 = vperm.xlu0 %868, %v405_v22  }
  0x34   : > { %457 = vperm.xlu1 %869, %v408_v23   ;;  %452 = vperm.xlu0 %868, %v407_v24  }
  0x38   : > { %467 = vperm.xlu1 %869, %v410_v25   ;;  %462 = vperm.xlu0 %868, %v409_v26   ;;  %v289_v26 = vld [vmem:[%s1039_s6 + $0x48] sm:$0xff] }
  0x3c   : > { %477 = vperm.xlu1 %869, %v412_v27   ;;  %472 = vperm.xlu0 %868, %v411_v28   ;;  %v290_v27 = vld [vmem:[%s1039_s6 + $0x50] sm:$0xff] }
  0x40   : > { %487 = vperm.xlu1 %869, %v414_v29   ;;  %482 = vperm.xlu0 %868, %v413_v30  }
  0x87   : > { %v323_v31 = vpop.permute.xlu1 %322  ;;  %v313_v32 = vpop.permute.xlu0 %312 }
  0x88   : > { %v385_v46 = vmul.f32 %v313_v32, %v280_v43  ;;  %v387_v52 = vmul.f32 %v323_v31, %v282_v47  ;;  %v292_v43 = vld [vmem:[%s1039_s6 + $0x60] sm:$0xff] }
  0x8b   : > { %v328_v33 = vpop.permute.xlu1 %327  ;;  %v318_v34 = vpop.permute.xlu0 %317 }
  0x8c   : > { %v386_v53 = vmul.f32 %v318_v34, %v281_v48  ;;  %v388_v61 = vmul.f32 %v328_v33, %v283_v54 }
  0x8f   : > { %v338_v35 = vpop.permute.xlu1 %337  ;;  %v333_v36 = vpop.permute.xlu0 %332 }
  0x90   : > { %v389_v62 = vmul.f32 %v333_v36, %v284_v55  ;;  %v390_v10 = vmul.f32 %v338_v35, %v285_v0 }
  0x93   : > { %v348_v37 = vpop.permute.xlu1 %347  ;;  %v343_v38 = vpop.permute.xlu0 %342 }
  0x94   : > { %v391_v11 = vmul.f32 %v343_v38, %v286_v1  ;;  %v392_v23 = vmul.f32 %v348_v37, %v287_v13 }
  0x97   : > { %v1029_v39 = vpop.permute.xlu1 %357  ;;  %v353_v40 = vpop.permute.xlu0 %352 }
  0x98   : > { %v393_v24 = vmul.f32 %v353_v40, %v288_v14  ;;  %v394_v36 = vmul.f32 %v1029_v39, %v289_v26  ;;  %v291_v40 = vld [vmem:[%s1039_s6 + $0x58] sm:$0xff] }
  0x9b   : > { %v1032_v41 = vpop.permute.xlu1 %367  ;;  %v1034_v42 = vpop.permute.xlu0 %362 }
  0x9c   : > { %v395_v37 = vmul.f32 %v1034_v42, %v290_v27  ;;  %v396_v39 = vmul.f32 %v1032_v41, %v291_v40 }
  0x9f   : > { %v1042_v44 = vpop.permute.xlu1 %377  ;;  %v1044_v45 = vpop.permute.xlu0 %372 }
  0xa0   : > { %v397_v42 = vmul.f32 %v1044_v45, %v292_v43 }
  0xa3   : > { %v418_v49 = vpop.permute.xlu1 %417  ;;  %v1048_v50 = vpop.permute.xlu0 %382 }
  0xa4   : > { %v490_v51 = vadd.f32 %v418_v49, %v385_v46 }
  0xa6   : > { %v520_v56 = vmul.f32 0.01, %v490_v51  ;;  %vm505_vm0 = vcmp.ge.f32.partialorder %v490_v51, 0.0 }
  0xa7   : > { %v428_v57 = vpop.permute.xlu1 %427  ;;  %v423_v58 = vpop.permute.xlu0 %422 }
  0xa8   : > { %v492_v59 = vadd.f32 %v428_v57, %v387_v52  ;;  %v491_v60 = vadd.f32 %v423_v58, %v386_v53  ;;  %v535_v2 = vsel %vm505_vm0, %v490_v51, %v520_v56  ;;  %v293_v56 = vld [vmem:[%s1039_s6 + $0x68] sm:$0xff]  ;;  %v294_v57 = vld [vmem:[%s1039_s6 + $0x70] sm:$0xff] }
  0xa9   : > { %v399_v41 = vmul.f32 %v1048_v50, %v294_v57 }
  0xaa   : > { %vm506_vm1 = vcmp.ge.f32.partialorder %v491_v60, 0.0  ;;  %v521_v63 = vmul.f32 0.01, %v491_v60  ;;  %v522_v3 = vmul.f32 0.01, %v492_v59  ;;  %vm507_vm2 = vcmp.ge.f32.partialorder %v492_v59, 0.0 }
  0xab   : > { %v438_v4 = vpop.permute.xlu1 %437  ;;  %v433_v5 = vpop.permute.xlu0 %432 }
  0xac   : > { %v536_v6 = vsel %vm506_vm1, %v491_v60, %v521_v63  ;;  %v494_v7 = vadd.f32 %v438_v4, %v389_v62  ;;  %v493_v8 = vadd.f32 %v433_v5, %v388_v61  ;;  %v537_v15 = vsel %vm507_vm2, %v492_v59, %v522_v3 }
  0xad   : > { %v803_v9 = vpack.c.bf16 %v536_v6, %v535_v2  ;;  %v398_v2 = vmul.f32 %v1042_v44, %v293_v56 }
  0xae   : > { %vm508_vm3 = vcmp.ge.f32.partialorder %v493_v8, 0.0  ;;  %v523_v12 = vmul.f32 0.01, %v493_v8  ;;  %v524_v16 = vmul.f32 0.01, %v494_v7  ;;  %vm509_vm4 = vcmp.ge.f32.partialorder %v494_v7, 0.0 }
  0xaf   : > { %804 = vst [vmem:[%s1058_s10] sm:$0xff] %v803_v9   ;;  %v448_v17 = vpop.permute.xlu1 %447  ;;  %v443_v18 = vpop.permute.xlu0 %442 }
  0xb0   : > { %v538_v19 = vsel %vm508_vm3, %v493_v8, %v523_v12  ;;  %v496_v20 = vadd.f32 %v448_v17, %v391_v11  ;;  %v495_v21 = vadd.f32 %v443_v18, %v390_v10  ;;  %v539_v28 = vsel %vm509_vm4, %v494_v7, %v524_v16 }
  0xb1   : > { %v808_v22 = vpack.c.bf16 %v538_v19, %v537_v15 }
  0xb2   : > { %vm510_vm5 = vcmp.ge.f32.partialorder %v495_v21, 0.0  ;;  %v525_v25 = vmul.f32 0.01, %v495_v21  ;;  %v526_v29 = vmul.f32 0.01, %v496_v20  ;;  %vm511_vm6 = vcmp.ge.f32.partialorder %v496_v20, 0.0 }
  0xb3   : > { %835 = vst [vmem:[%s1058_s10 + $0x8] sm:$0xff] %v808_v22   ;;  %v458_v30 = vpop.permute.xlu1 %457  ;;  %v453_v31 = vpop.permute.xlu0 %452 }
  0xb4   : > { %v540_v32 = vsel %vm510_vm5, %v495_v21, %v525_v25  ;;  %v498_v33 = vadd.f32 %v458_v30, %v393_v24  ;;  %v497_v34 = vadd.f32 %v453_v31, %v392_v23  ;;  %v541_v46 = vsel %vm511_vm6, %v496_v20, %v526_v29 }
  0xb5   : > { %v813_v35 = vpack.c.bf16 %v540_v32, %v539_v28 }
  0xb6   : > { %vm512_vm7 = vcmp.ge.f32.partialorder %v497_v34, 0.0  ;;  %v527_v38 = vmul.f32 0.01, %v497_v34  ;;  %v528_v47 = vmul.f32 0.01, %v498_v33  ;;  %vm513_vm8 = vcmp.ge.f32.partialorder %v498_v33, 0.0 }
  0xb7   : > { %836 = vst [vmem:[%s1058_s10 + $0x10] sm:$0xff] %v813_v35   ;;  %v468_v48 = vpop.permute.xlu1 %467  ;;  %v463_v49 = vpop.permute.xlu0 %462 }
  0xb8   : > { %v542_v51 = vsel %vm512_vm7, %v497_v34, %v527_v38  ;;  %v500_v52 = vadd.f32 %v468_v48, %v395_v37  ;;  %v499_v53 = vadd.f32 %v463_v49, %v394_v36  ;;  %v543_v58 = vsel %vm513_vm8, %v498_v33, %v528_v47 }
  0xb9   : > { %v818_v54 = vpack.c.bf16 %v542_v51, %v541_v46 }
  0xba   : > { %vm514_vm9 = vcmp.ge.f32.partialorder %v499_v53, 0.0  ;;  %v529_v55 = vmul.f32 0.01, %v499_v53  ;;  %v530_v59 = vmul.f32 0.01, %v500_v52  ;;  %vm515_vm10 = vcmp.ge.f32.partialorder %v500_v52, 0.0 }
  0xbb   : > { %837 = vst [vmem:[%s1058_s10 + $0x18] sm:$0xff] %v818_v54   ;;  %v478_v60 = vpop.permute.xlu1 %477  ;;  %v473_v61 = vpop.permute.xlu0 %472 }
  0xbc   : > { %v544_v62 = vsel %vm514_vm9, %v499_v53, %v529_v55  ;;  %v502_v63 = vadd.f32 %v478_v60, %v397_v42  ;;  %v501_v0 = vadd.f32 %v473_v61, %v396_v39  ;;  %v545_v3 = vsel %vm515_vm10, %v500_v52, %v530_v59 }
  0xbd   : > { %v823_v1 = vpack.c.bf16 %v544_v62, %v543_v58 }
  0xbe   : > { %vm516_vm11 = vcmp.ge.f32.partialorder %v501_v0, 0.0  ;;  %v531_v45 = vmul.f32 0.01, %v501_v0  ;;  %v532_v6 = vmul.f32 0.01, %v502_v63  ;;  %vm517_vm12 = vcmp.ge.f32.partialorder %v502_v63, 0.0 }
  0xbf   : > { %838 = vst [vmem:[%s1058_s10 + $0x20] sm:$0xff] %v823_v1   ;;  %v488_v4 = vpop.permute.xlu1 %487  ;;  %v483_v5 = vpop.permute.xlu0 %482 }
  0xc0   : > { %v546_v7 = vsel %vm516_vm11, %v501_v0, %v531_v45  ;;  %v504_v8 = vadd.f32 %v488_v4, %v399_v41  ;;  %v503_v9 = vadd.f32 %v483_v5, %v398_v2  ;;  %v547_v50 = vsel %vm517_vm12, %v502_v63, %v532_v6 }
  0xc1   : > { %v828_v10 = vpack.c.bf16 %v546_v7, %v545_v3 }
  0xc2   : > { %vm519_vm13 = vcmp.ge.f32.partialorder %v504_v8, 0.0  ;;  %v534_v11 = vmul.f32 0.01, %v504_v8  ;;  %vm518_vm14 = vcmp.ge.f32.partialorder %v503_v9, 0.0  ;;  %v533_v44 = vmul.f32 0.01, %v503_v9 }
  0xc3   : > { %839 = vst [vmem:[%s1058_s10 + $0x28] sm:$0xff] %v828_v10  }
  0xc4   : > { %v549_v12 = vsel %vm519_vm13, %v504_v8, %v534_v11  ;;  %v548_v13 = vsel %vm518_vm14, %v503_v9, %v533_v44 }
  0xc5   : > { %v799_v14 = vpack.c.bf16 %v549_v12, %v549_v12  ;;  %v833_v15 = vpack.c.bf16 %v548_v13, %v547_v50 }
  0xc7   : > { %625 = vst [vmem:[%s1058_s10 + $0x38] sm:$0xf] %v799_v14  ;;  %840 = vst [vmem:[%s1058_s10 + $0x30] sm:$0xff] %v833_v15  }
  0xc8 PF: > { %s13_s14 = sadd.s32 1, %s892_s14   ;;  %s1095_s12 = smov %s888_s13 }
  0xc9   : > { %p10_p5 = scmp.ge.s32.totalorder %s13_s14, 4   ;;  %s1096_s13 = smov %s1098_s15 }
  0xcb   :  { %12 = sbr.rel (!%p10_p5) target bundleno = 2 (0x2), region = 68 }

// kernel: blendnet_forward.14
= control target key start
LH: loop header
LB: loop body
LE: loop exit
PB: predicated region body
PF: predicated region fallthrough
CT: control target
= control target key end

     0   :  { %s964_s15 = smov 0   ;;  %s966_s16 = smov 0   ;;  %s1140_s0 = inlined_call_operand.vmem [shape: bf16[2,24,1792], index: 0, kind: input, shape index: {}, may-alias: {0,1}]   ;;  %s1141_s1 = inlined_call_operand.vmem [shape: bf16[2,24,1792], index: 1, kind: input, shape index: {}, may-alias: {0,1}]   ;;  %s1142_s2 = inlined_call_operand.vmem [shape: bf16[3,16,24], index: 2, kind: input, shape index: {}]   ;;  %s1143_s3 = inlined_call_operand.vmem [shape: f32[16,1], index: 3, kind: input, shape index: {}]   ;;  %s1144_s4 = inlined_call_operand.vmem [shape: f32[2,16,1664], index: 4, kind: output, shape index: {}]  }
   0x1   :  { %s968_s17 = smov 0   ;;  %s970_s18 = smov 0  }
   0x2   :  { %s972_s19 = smov 0   ;;  %s974_s20 = smov 0  }
   0x3   :  { %s976_s21 = smov 0   ;;  %s978_s22 = smov 0  }
   0x4   :  { %s980_s23 = smov 0  }
   0x5 LB: > { %s708_s24 = sadd.s32 4294967295, %s932_s23   ;;  %s23_s25 = sadd.s32 1, %s924_s21  ;;  %s932_s23 = sphi %s980_s23, %s14_s23   ;;  %s928_s22 = sphi %s978_s22, %s1155_s22   ;;  %s924_s21 = sphi %s976_s21, %s1154_s21   ;;  %s920_s20 = sphi %s974_s20, %s1153_s20   ;;  %s916_s19 = sphi %s972_s19, %s1152_s19   ;;  %s912_s18 = sphi %s970_s18, %s1151_s18   ;;  %s908_s17 = sphi %s968_s17, %s1150_s17   ;;  %s904_s16 = sphi %s966_s16, %s1149_s16   ;;  %s900_s15 = sphi %s964_s15, %s1148_s15  }
   0x6   : > { %p24_p0 = scmp.ge.s32.totalorder %s23_s25, 13  ;;  %s26_s26 = sadd.s32 1, %s928_s22 }
   0x7   : > { %s35_s27 = sadd.s32 1, %s912_s18  ;;  %p42_p1 = scmp.ne.s32.totalorder %s912_s18, %s908_s17 }
   0x8   : > { %s1015_s28 = scalar_select %p24_p0, 0, %s23_s25  }
   0x9   : > { %s1157_s26 = smov (!%p24_p0, %s26_s26), %s928_s22  ;;  %p43_p2 = scmp.eq.s32.totalorder %s932_s23, 0 }
   0xa   : > { %s31_s29 = ssub.s32 %s924_s21, %s1015_s28  ;;  %p28_p3 = scmp.ge.s32.totalorder %s1157_s26, 2 }
   0xb   : > { %s59_s30 = sadd.s32 1, %s1015_s28  ;;  %p1027_p4 = por %p43_p2, %p42_p1 }
   0xc   : > { %s61_s6 = ssub.s32 %s23_s25, %s59_s30  ;;  %s1159_s26 = smov (%p28_p3, %s1157_s26), 0 }
   0xd   : > { %s65_s7 = sadd.s32 1, %s904_s16  ;;  %p72_p5 = scmp.ne.s32.totalorder %s904_s16, %s900_s15 }
   0xe   : > { %s30_s8 = ssub.s32 %s928_s22, %s1159_s26  ;;  %p146_p6 = scmp.eq.s32.totalorder %s708_s24, 25 }
   0xf   : > { %s32_s9 = sor.u32 %s31_s29, %s30_s8  ;;  %s62_s10 = sor.u32 %s61_s6, %s30_s8 }
  0x10   : > { %p33_p7 = scmp.eq.s32.totalorder %s32_s9, 0  ;;  %p63_p8 = scmp.eq.s32.totalorder %s62_s10, 0 }
  0x11   : > { %p1040_p9 = por %p72_p5, %p43_p2  ;;  %p1047_p10 = por %p146_p6, %p42_p1 }
  0x12   : > { %s1052_s13 = scalar_select %p33_p7, %s912_s18, %s35_s27  }
  0x13   : > { %s1055_s14 = scalar_select %p63_p8, %s904_s16, %s65_s7  }
  0x14   : > { %p711_p11 = scmp.ge.s32.totalorder %s932_s23, 26 }
  0x16   : > { %174 = sbr.rel (%p711_p11) target bundleno = 47 (0x2f), region = 24 }
  0x1d   : > { %177 = sbr.rel (!%p1027_p4) target bundleno = 38 (0x26), region = 28  ;;  %s179_s24 = sand.u32 (%p1027_p4), 1, %s912_s18  }
  0x1e   : > { %s771_s25 = smul.u32 (%p1027_p4), 42, %s928_s22 }
  0x1f   : > { %s770_s29 = smul.u32 (%p1027_p4), 12, %s179_s24 }
  0x20   : > { %s183_s30 = sadd.s32 (%p1027_p4), %s924_s21, %s771_s25 }
  0x21   : > { %s712_s6 = sshll.u32 (%p1027_p4), %s183_s30, 2  ;;  %s181_s7 = scalar_lea.vmem (%p1027_p4), [#allocation2], %s770_s29 }
  0x22   : > { %s185_s27 = scalar_lea.vmem (%p1027_p4), %s1140_s0, %s712_s6 }
  0x23   : > { %v201_v0 = vld [vmem:[%s185_s27] sm:$0xf] (%p1027_p4)  ;;  %v203_v1 = vld [vmem:[%s185_s27 + $0x38] sm:$0xf] (%p1027_p4)  ;;  %v205_v2 = vld [vmem:[%s185_s27 + $0x70] sm:$0xf] (%p1027_p4) }
  0x24   : > { %202 = vst [vmem:[%s181_s7] sm:$0xf] %v201_v0  ;;  %204 = vst [vmem:[%s181_s7 + $0x4] sm:$0xf] %v203_v1 }
  0x25   : > { %206 = vst [vmem:[%s181_s7 + $0x8] sm:$0xf] %v205_v2 }
  0x26 PF: > { %235 = sbr.rel (!%p1040_p9) target bundleno = 47 (0x2f), region = 69  ;;  %s237_s5 = sand.u32 (%p1040_p9), 1, %s904_s16  }
  0x27   : > { %s635_s10 = smul.u32 (%p1040_p9), 42, %s928_s22 }
  0x28   : > { %s772_s24 = smul.u32 (%p1040_p9), 12, %s237_s5 }
  0x29   : > { %s636_s25 = sadd.s32 (%p1040_p9), %s924_s21, %s635_s10 }
  0x2a   : > { %s713_s30 = sshll.u32 (%p1040_p9), %s636_s25, 2  ;;  %s239_s29 = scalar_lea.vmem (%p1040_p9), [#allocation3], %s772_s24 }
  0x2b   : > { %s638_s9 = scalar_lea.vmem (%p1040_p9), %s1141_s1, %s713_s30 }
  0x2c   : > { %v714_v3 = vld [vmem:[%s638_s9 + $0x4] sm:$0xf] (%p1040_p9)  ;;  %v715_v4 = vld [vmem:[%s638_s9 + $0x3c] sm:$0xf] (%p1040_p9)  ;;  %v716_v5 = vld [vmem:[%s638_s9 + $0x74] sm:$0xf] (%p1040_p9) }
  0x2d   : > { %261 = vst [vmem:[%s239_s29] sm:$0xf] %v714_v3  ;;  %263 = vst [vmem:[%s239_s29 + $0x4] sm:$0xf] %v715_v4 }
  0x2e   : > { %265 = vst [vmem:[%s239_s29 + $0x8] sm:$0xf] %v716_v5 }
  0x2f PF: > { %p717_p12 = scmp.ge.s32.totalorder %s932_s23, 1  ;;  %p293_p13 = scmp.lt.s32.totalorder %s932_s23, 27 }
  0x31   : > { %p294_p0 = pnand %p717_p12, %p293_p13 }
  0x32   : > { %s300_s11 = sand.u32 (!%p294_p0), 1, %s908_s17   ;;  %s307_s7 = sand.u32 (!%p294_p0), 1, %s900_s15   ;;  %v934_v6 = vmov (!%p294_p0), 0.0   ;;  %vm935_vm0 = vmmov (!%p294_p0), 0   ;;  %vm386_vm1 = vcmask (!%p294_p0), 1043456   ;;  %v860_v12 = vld [vmem:[%s1142_s2] sm:$0xff] (!%p294_p0)  }
  0x33   : > { %297 = sbr.rel (%p294_p0) target bundleno = 418 (0x1a2), region = 110  ;;  %746 = vmatprep.subr.bf16.mxu0 (!%p294_p0), %v934_v6  ;;  %754 = vmatprep.subr.bf16.mxu1 (!%p294_p0), %v934_v6  ;;  %s936_s24 = smov (!%p294_p0), 127   ;;  %vm382_vm2 = vcmask (!%p294_p0), 195584   ;;  %v938_v13 = vmov (!%p294_p0), 0   ;;  %v553_v14 = vld [vmem:[%s1143_s3 + $0x8] sm:$0xff] (!%p294_p0)  ;;  %v552_v15 = vld [vmem:[%s1143_s3] sm:$0xff] (!%p294_p0) }
  0x34   : > { %s773_s27 = smul.u32 (!%p294_p0), 12, %s300_s11  ;;  %750 = vmatprep.mubr.msk.bf16.mxu0 (!%p294_p0), %vm935_vm0, %v934_v6  ;;  %758 = vmatprep.mubr.msk.bf16.mxu1 (!%p294_p0), %vm935_vm0, %v934_v6  ;;  %s937_s6 = smov (!%p294_p0), 126   ;;  %vm378_vm3 = vcmask (!%p294_p0), 1039360   ;;  %vm499_vm4 = vcmask (!%p294_p0), 1031168   ;;  %v859_v25 = vld [vmem:[%s1142_s2 + $0x8] sm:$0xff] (!%p294_p0)   ;;  %v861_v31 = vld [vmem:[%s1142_s2 + $0x10] sm:$0xff] (!%p294_p0)  }
  0x35   : > { %s774_s5 = smul.u32 (!%p294_p0), 12, %s307_s7  ;;  %854 = vset.pattern.permute.xlu1 (!%p294_p0), %v938_v13  ;;  %853 = vset.pattern.permute.xlu0 (!%p294_p0), %v938_v13 }
  0x36   : > { %s302_s10 = scalar_lea.vmem (!%p294_p0), [#allocation2], %s773_s27 }
  0x37   : > { %v855_v7 = vld [vmem:[%s302_s10 + $0x8] ss:$0 sps:$4 sm:$0xff] (!%p294_p0)   ;;  %v856_v8 = vld [vmem:[%s302_s10] sm:$0xff] (!%p294_p0)   ;;  %s309_s25 = scalar_lea.vmem (!%p294_p0), [#allocation3], %s774_s5 }
  0x38   : > { %374 = vrot.lane.b32.xlu1 (!%p294_p0), %v855_v7, %s936_s24  ;;  %v857_v9 = vld [vmem:[%s309_s25 + $0x8] ss:$0 sps:$4 sm:$0xff] (!%p294_p0)   ;;  %370 = vrot.lane.b32.xlu0 (!%p294_p0), %v856_v8, %s936_s24  ;;  %v858_v10 = vld [vmem:[%s309_s25] sm:$0xff] (!%p294_p0)   ;;  %v440_v11 = vsel (!%p294_p0), %vm386_vm1, %v855_v7, 0  ;;  %s718_s25 = sshll.u32 (!%p294_p0), %s300_s11, 4 }
  0x39   : > { %755 = vmatpush3.bf16.msra.mxu1 (!%p294_p0), %v856_v8  ;;  %s334_s15 = scalar_lea.vmem (!%p294_p0), [#allocation4], %s718_s25 }
  0x3a   : > { %756 = vmatprep.subr.bf16.mxu1 %v934_v6  ;;  %s775_s17 = smul.u32 (%p1047_p10), 26, %s920_s20 }
  0x3c   : > { %376 = vrot.lane.b32.xlu1 %v857_v9, %s936_s24  ;;  %372 = vrot.lane.b32.xlu0 %v858_v10, %s936_s24  ;;  %s576_s11 = sadd.s32 (%p1047_p10), %s916_s19, %s775_s17 }
  0x3d   : > { %757 = vmatpush3.bf16.msra.mxu1 %v440_v11  ;;  %s734_s30 = sshll.u32 (%p1047_p10), %s576_s11, 3 }
  0x3e   : > { %s578_s9 = scalar_lea.vmem (%p1047_p10), %s1144_s4, %s734_s30 }
  0x40   : > { %493 = vrot.lane.b32.xlu1 %v858_v10, %s937_s6  ;;  %759 = vmatmul.mubr.msk.bf16.vlgmr.msra.gmra.mrb[0].mxu1 %vm382_vm2, %v860_v12 }
  0x41   : > { %491 = vrot.lane.b32.xlu0 %v856_v8, %s937_s6 }
  0x44   : > { %497 = vrot.lane.b32.xlu1 %v857_v9, %s937_s6 }
  0x45   : > { %495 = vrot.lane.b32.xlu0 %v855_v7, %s937_s6 }
  0x48   : > { %561 = vperm.xlu1 %854, %v553_v14  }
  0x49   : > { %556 = vperm.xlu0 %853, %v552_v15  }
  0xaa   : > { %v375_v16 = vpop.permute.xlu1 %374  ;;  %v371_v17 = vpop.permute.xlu0 %370 }
  0xae   : > { %v377_v18 = vpop.permute.xlu1 %376  ;;  %v373_v19 = vpop.permute.xlu0 %372 }
  0xaf   : > { %v379_v20 = vsel %vm378_vm3, %v371_v17, %v373_v19  ;;  %v380_v21 = vsel %vm378_vm3, %v375_v16, %v377_v18 }
  0xb0   : > { %747 = vmatpush3.bf16.msra.mxu0 %v379_v20  ;;  %v388_v24 = vsel %vm386_vm1, %v380_v21, 0 }
  0xb1   : > { %748 = vmatprep.subr.bf16.mxu0 %v934_v6 }
  0xb2   : > { %v494_v22 = vpop.permute.xlu1 %493 }
  0xb3   : > { %v492_v23 = vpop.permute.xlu0 %491 }
  0xb4   : > { %749 = vmatpush3.bf16.msra.mxu0 %v388_v24  ;;  %v500_v26 = vsel %vm499_vm4, %v492_v23, %v494_v22 }
  0xb5   : > { %762 = vmatprep.subr.bf16.mxu0 %v934_v6 }
  0xb6   : > { %v498_v27 = vpop.permute.xlu1 %497 }
  0xb7   : > { %v496_v28 = vpop.permute.xlu0 %495  ;;  %751 = vmatmul.mubr.msk.bf16.vlgmr.msra.gmra.mrb[0].mxu0 %vm382_vm2, %v859_v25 }
  0xb8   : > { %v501_v29 = vsel %vm499_vm4, %v496_v28, %v498_v27  ;;  %763 = vmatpush3.bf16.msra.mxu0 %v500_v26  ;;  %766 = vmatprep.mubr.msk.bf16.mxu0 %vm935_vm0, %v934_v6 }
  0xb9   : > { %v507_v30 = vsel %vm386_vm1, %v501_v29, 0  ;;  %764 = vmatprep.subr.bf16.mxu0 %v934_v6 }
  0xbc   : > { %765 = vmatpush3.bf16.msra.mxu0 %v507_v30 }
  0xbf   : > { %767 = vmatmul.mubr.msk.bf16.vlgmr.msra.gmra.mrb[4].mxu0 %vm382_vm2, %v861_v31 }
  0xc7   : > { %v562_v47 = vpop.permute.xlu1 %561 }
  0xc8   : > { %v557_v43 = vpop.permute.xlu0 %556 }
 0x113   : > { %v476_v32 = vpop.f32.mrb[0].mxu1 }
 0x114   : > { %v760_v33 = vpop.f32.mrb[1].mxu1 }
 0x115   : > { %v479_v34 = vpop.f32.mrb[2].mxu1 }
 0x116   : > { %v761_v35 = vpop.f32.mrb[3].mxu1 }
 0x18a   : > { %v424_v36 = vpop.f32.mrb[0].mxu0 }
 0x18b   : > { %v477_v37 = vadd.f32 %v476_v32, %v424_v36  ;;  %v752_v38 = vpop.f32.mrb[1].mxu0 }
 0x18c   : > { %v427_v39 = vpop.f32.mrb[2].mxu0 }
 0x18d   : > { %v480_v40 = vadd.f32 %v479_v34, %v427_v39  ;;  %v753_v41 = vpop.f32.mrb[3].mxu0 }
 0x192   : > { %v543_v42 = vpop.f32.mrb[4].mxu0 }
 0x193   : > { %v550_v44 = vadd.f32 %v543_v42, %v477_v37  ;;  %v768_v45 = vpop.f32.mrb[5].mxu0  ;;  %574 = sbr.rel (!%p1047_p10) target bundleno = 418 (0x1a2), region = 122 }
 0x194   : > { %v546_v46 = vpop.f32.mrb[6].mxu0 }
 0x195   : > { %v551_v48 = vadd.f32 %v546_v46, %v480_v40  ;;  %v564_v49 = vadd.f32 %v557_v43, %v550_v44  ;;  %v769_v50 = vpop.f32.mrb[7].mxu0 }
 0x197   : > { %566 = vst [vmem:[%s334_s15] sm:$0xff] %v564_v49  ;;  %v565_v51 = vadd.f32 %v562_v47, %v551_v48 }
 0x199   : > { %567 = vst [vmem:[%s334_s15 + $0x8] sm:$0xff] %v565_v51 }
 0x19e   : > { %v608_v52 = vld [vmem:[%s334_s15] sm:$0xff] }
 0x19f   : > { %609 = vst [vmem:[%s578_s9] sm:$0xff] %v608_v52 }
 0x1a0   : > { %v610_v53 = vld [vmem:[%s334_s15 + $0x8] sm:$0xff] }
 0x1a1   : > { %611 = vst [vmem:[%s578_s9 + $0x68] sm:$0xff] %v610_v53 }
 0x1a2 PF: > { %s14_s23 = sadd.s32 1, %s932_s23   ;;  %s1148_s15 = smov %s904_s16 }
 0x1a3   : > { %p11_p1 = scmp.ge.s32.totalorder %s14_s23, 28   ;;  %s1149_s16 = smov %s1055_s14 }
 0x1a4   : > { %s1150_s17 = smov %s912_s18  ;;  %s1151_s18 = smov %s1052_s13 }
 0x1a5   : > { %s1152_s19 = smov %s924_s21  ;;  %s1153_s20 = smov %s928_s22 }
 0x1a6   : > { %s1154_s21 = smov %s1015_s28  ;;  %s1155_s22 = smov %s1159_s26 }
 0x1a7   :  { %13 = sbr.rel (!%p11_p1) target bundleno = 5 (0x5), region = 201 }

// kernel: tile.33
= control target key start
LH: loop header
LB: loop body
LE: loop exit
PB: predicated region body
PF: predicated region fallthrough
CT: control target
= control target key end

     0   :  { %s28_s0 = inlined_call_operand.vmem [shape: f32[6], index: 0, kind: input, shape index: {}]   ;;  %s29_s1 = inlined_call_operand.vmem [shape: f32[16,6], index: 1, kind: output, shape index: {}]  }
   0x1   :  { %v4_v0 = vld [vmem:[%s28_s0] ss:$0 sm:$0xff] }
   0x2   :  { %5 = vst [vmem:[%s29_s1] sm:$0xff] %v4_v0  ;;  %8 = vst [vmem:[%s29_s1 + $0x8] sm:$0xff] %v4_v0 }

// kernel: tile.2
= control target key start
LH: loop header
LB: loop body
LE: loop exit
PB: predicated region body
PF: predicated region fallthrough
CT: control target
= control target key end

     0   :  { %s166_s10 = smov 126   ;;  %vm3_vm0 = vcmask 7168   ;;  %s167_s11 = smov 127   ;;  %s345_s0 = inlined_call_operand.vmem [shape: f32[16,6], index: 0, kind: input, shape index: {}]   ;;  %s346_s1 = inlined_call_operand.vmem [shape: f32[96,1], index: 1, kind: output, shape index: {}]  }
   0x1   :  { %v33_v0 = vld.sshfl [vmem:[%s345_s0] sm:$0xff pattern:$0x27c16b05]   ;;  %v134_v4 = vld.sshfl [vmem:[%s345_s0 + $0x3] sm:$0xff pattern:$0x7c16b05a]  }
   0x2   :  { %v10_v1 = vld.sshfl [vmem:[%s345_s0] sm:$0xff pattern:$0xd27c16b0]   ;;  %34 = vrot.lane.b32.xlu1 %v33_v0, %s166_s10  ;;  %v127_v5 = vld.sshfl [vmem:[%s345_s0 + $0x3] sm:$0xff pattern:$0x27c16b05]  }
   0x3   :  { %11 = vrot.lane.b32.xlu0 %v10_v1, %s167_s11  ;;  %v2_v2 = vld [vmem:[%s345_s0] sm:$0xff]   ;;  %v121_v3 = vld [vmem:[%s345_s0 + $0x8] sm:$0xff]   ;;  %s168_s24 = smov 125   ;;  %s170_s29 = smov 123  }
   0x4   :  { %4 = vst.msk [vmem:[%s346_s1] ss:$6 sm:$0xff] %vm3_vm0, %v2_v2   ;;  %122 = vst.msk [vmem:[%s346_s1 + $0x30] ss:$6 sm:$0xff] %vm3_vm0, %v121_v3  }
   0x5   :  { %v148_v6 = vld.sshfl [vmem:[%s345_s0 + $0x2] sm:$0xff pattern:$0xd27c16b0]   ;;  %v75_v7 = vld.sshfl [vmem:[%s345_s0] sm:$0xff pattern:$0x7c16b05a]  }
   0x6   :  { %45 = vrot.lane.b32.xlu1 %v134_v4, %s166_s10  ;;  %s169_s0 = smov 124  }
   0x7   :  { %24 = vrot.lane.b32.xlu0 %v127_v5, %s167_s11 }
   0xa   :  { %66 = vrot.lane.b32.xlu1 %v134_v4, %s168_s24 }
   0xb   :  { %55 = vrot.lane.b32.xlu0 %v33_v0, %s168_s24 }
   0xe   :  { %87 = vrot.lane.b32.xlu1 %v148_v6, %s169_s0 }
   0xf   :  { %76 = vrot.lane.b32.xlu0 %v75_v7, %s169_s0 }
  0x12   :  { %110 = vrot.lane.b32.xlu1 %v148_v6, %s170_s29 }
  0x13   :  { %99 = vrot.lane.b32.xlu0 %v75_v7, %s170_s29 }
  0x74   :  { %v35_v8 = vpop.permute.xlu1 %34  }
  0x75   :  { %v12_v9 = vpop.permute.xlu0 %11   ;;  %131 = vst.msk [vmem:[%s346_s1 + $0x20] ss:$-30 sm:$0x3] %vm3_vm0, %v35_v8   ;;  %132 = vst.msk [vmem:[%s346_s1 + $0x80] ss:$-30 sm:$0x1c] %vm3_vm0, %v35_v8  }
  0x76   :  { %133 = vst.msk [vmem:[%s346_s1 + $0xe0] ss:$-30 sm:$0xe0] %vm3_vm0, %v35_v8   ;;  %123 = vst.msk [vmem:[%s346_s1 + $0x1] ss:$66 sm:$0x3] %vm3_vm0, %v12_v9  }
  0x77   :  { %124 = vst.msk [vmem:[%s346_s1 + $0x61] ss:$-30 sm:$0xc] %vm3_vm0, %v12_v9   ;;  %125 = vst.msk [vmem:[%s346_s1 + $0xc1] ss:$-30 sm:$0x70] %vm3_vm0, %v12_v9  }
  0x78   :  { %126 = vst.msk [vmem:[%s346_s1 + $0x48] sm:$0x80] %vm3_vm0, %v12_v9   ;;  %v46_v10 = vpop.permute.xlu1 %45  }
  0x79   :  { %v25_v11 = vpop.permute.xlu0 %24   ;;  %135 = vst.msk [vmem:[%s346_s1 + $0x50] ss:$-30 sm:$0x7] %vm3_vm0, %v46_v10   ;;  %136 = vst.msk [vmem:[%s346_s1 + $0xb0] ss:$-30 sm:$0x38] %vm3_vm0, %v46_v10  }
  0x7a   :  { %137 = vst.msk [vmem:[%s346_s1 + $0x110] ss:$-30 sm:$0xc0] %vm3_vm0, %v46_v10   ;;  %128 = vst.msk [vmem:[%s346_s1 + $0x31] ss:$-30 sm:$0x3] %vm3_vm0, %v25_v11  }
  0x7b   :  { %129 = vst.msk [vmem:[%s346_s1 + $0x91] ss:$-30 sm:$0x1c] %vm3_vm0, %v25_v11   ;;  %130 = vst.msk [vmem:[%s346_s1 + $0xf1] ss:$-30 sm:$0xe0] %vm3_vm0, %v25_v11  }
  0x7c   :  { %v67_v12 = vpop.permute.xlu1 %66  }
  0x7d   :  { %v56_v13 = vpop.permute.xlu0 %55   ;;  %142 = vst.msk [vmem:[%s346_s1 + $0x51] ss:$-30 sm:$0x7] %vm3_vm0, %v67_v12   ;;  %143 = vst.msk [vmem:[%s346_s1 + $0xb1] ss:$-30 sm:$0x38] %vm3_vm0, %v67_v12  }
  0x7e   :  { %144 = vst.msk [vmem:[%s346_s1 + $0x111] ss:$-30 sm:$0xc0] %vm3_vm0, %v67_v12   ;;  %138 = vst.msk [vmem:[%s346_s1 + $0x21] ss:$-30 sm:$0x3] %vm3_vm0, %v56_v13  }
  0x7f   :  { %139 = vst.msk [vmem:[%s346_s1 + $0x81] ss:$-30 sm:$0x1c] %vm3_vm0, %v56_v13   ;;  %140 = vst.msk [vmem:[%s346_s1 + $0xe1] ss:$-30 sm:$0xe0] %vm3_vm0, %v56_v13  }
  0x80   :  { %v88_v14 = vpop.permute.xlu1 %87  }
  0x81   :  { %v77_v15 = vpop.permute.xlu0 %76   ;;  %149 = vst.msk [vmem:[%s346_s1 + $0x10] ss:$66 sm:$0x3] %vm3_vm0, %v88_v14   ;;  %150 = vst.msk [vmem:[%s346_s1 + $0x70] ss:$-30 sm:$0xc] %vm3_vm0, %v88_v14  }
  0x82   :  { %151 = vst.msk [vmem:[%s346_s1 + $0xd0] ss:$-30 sm:$0x70] %vm3_vm0, %v88_v14   ;;  %152 = vst.msk [vmem:[%s346_s1 + $0x57] sm:$0x80] %vm3_vm0, %v88_v14  }
  0x83   :  { %145 = vst.msk [vmem:[%s346_s1 + $0x40] ss:$-30 sm:$0x7] %vm3_vm0, %v77_v15   ;;  %146 = vst.msk [vmem:[%s346_s1 + $0xa0] ss:$-30 sm:$0x38] %vm3_vm0, %v77_v15  }
  0x84   :  { %147 = vst.msk [vmem:[%s346_s1 + $0x100] ss:$-30 sm:$0xc0] %vm3_vm0, %v77_v15   ;;  %v111_v16 = vpop.permute.xlu1 %110  }
  0x85   :  { %v100_v17 = vpop.permute.xlu0 %99   ;;  %157 = vst.msk [vmem:[%s346_s1 + $0x11] ss:$66 sm:$0x3] %vm3_vm0, %v111_v16   ;;  %158 = vst.msk [vmem:[%s346_s1 + $0x71] ss:$-30 sm:$0xc] %vm3_vm0, %v111_v16  }
  0x86   :  { %159 = vst.msk [vmem:[%s346_s1 + $0xd1] ss:$-30 sm:$0x70] %vm3_vm0, %v111_v16   ;;  %160 = vst.msk [vmem:[%s346_s1 + $0x58] sm:$0x80] %vm3_vm0, %v111_v16  }
  0x87   :  { %153 = vst.msk [vmem:[%s346_s1 + $0x41] ss:$-30 sm:$0x7] %vm3_vm0, %v100_v17   ;;  %154 = vst.msk [vmem:[%s346_s1 + $0xa1] ss:$-30 sm:$0x38] %vm3_vm0, %v100_v17  }
  0x88   :  { %155 = vst.msk [vmem:[%s346_s1 + $0x101] ss:$-30 sm:$0xc0] %vm3_vm0, %v100_v17  }

// kernel: blendnet_forward.15
= control target key start
LH: loop header
LB: loop body
LE: loop exit
PB: predicated region body
PF: predicated region fallthrough
CT: control target
= control target key end

     0   :  { %s833_s12 = smov 0   ;;  %s835_s13 = smov 0   ;;  %s980_s0 = inlined_call_operand.vmem [shape: f32[2,96,128], index: 0, kind: input, shape index: {}]   ;;  %s981_s1 = inlined_call_operand.vmem [shape: f32[96,1], index: 1, kind: input, shape index: {}]   ;;  %s982_s2 = inlined_call_operand.vmem [shape: f32[96,1], index: 2, kind: input, shape index: {}]   ;;  %s983_s3 = inlined_call_operand.vmem [shape: bf16[2,96,128], index: 3, kind: output, shape index: {}]  }
   0x1   :  { %s837_s14 = smov 0  }
   0x2 LB: > { %s32_s15 = sadd.s32 1, %s806_s13  ;;  %p695_p0 = scmp.ge.s32.totalorder %s810_s14, 1  ;;  %s810_s14 = sphi %s837_s14, %s13_s14   ;;  %s806_s13 = sphi %s835_s13, %s985_s13   ;;  %s802_s12 = sphi %s833_s12, %s984_s12  }
   0x3   : > { %p34_p1 = scmp.ge.s32.totalorder %s32_s15, 2  ;;  %p194_p2 = scmp.lt.s32.totalorder %s810_s14, 3 }
   0x5   : > { %s987_s15 = smov (%p34_p1, %s32_s15), 0  ;;  %p195_p3 = pnand %p695_p0, %p194_p2 }
   0x6   : > { %v294_v0 = vld [vmem:[%s981_s1 + $0x10] sm:$0xff] (!%p195_p3)  ;;  %v292_v1 = vld [vmem:[%s981_s1] sm:$0xff] (!%p195_p3)  ;;  %v812_v2 = vmov (!%p195_p3), 0   ;;  %v295_v3 = vld [vmem:[%s981_s1 + $0x18] sm:$0xff] (!%p195_p3)  ;;  %p243_p4 = scmp.lt.s32.totalorder (!%p195_p3), %s802_s12, 1 }
   0x7   : > { %198 = sbr.rel (%p195_p3) target bundleno = 188 (0xbc), region = 32  ;;  %787 = vset.pattern.permute.xlu1 (!%p195_p3), %v812_v2  ;;  %786 = vset.pattern.permute.xlu0 (!%p195_p3), %v812_v2  ;;  %v293_v4 = vld [vmem:[%s981_s1 + $0x8] sm:$0xff] (!%p195_p3)  ;;  %v296_v6 = vld [vmem:[%s981_s1 + $0x20] sm:$0xff] (!%p195_p3)  ;;  %v299_v7 = vld [vmem:[%s981_s1 + $0x38] sm:$0xff] (!%p195_p3) }
   0x8   : > { %316 = vperm.xlu1 (!%p195_p3), %787, %v294_v0   ;;  %306 = vperm.xlu0 (!%p195_p3), %786, %v292_v1   ;;  %v297_v5 = vld [vmem:[%s981_s1 + $0x28] sm:$0xff] (!%p195_p3)  ;;  %v298_v8 = vld [vmem:[%s981_s1 + $0x30] sm:$0xff] (!%p195_p3)  ;;  %v300_v10 = vld [vmem:[%s981_s1 + $0x40] sm:$0xff] (!%p195_p3) }
   0x9   : > { %v301_v9 = vld [vmem:[%s981_s1 + $0x48] sm:$0xff] (!%p195_p3)  ;;  %v303_v11 = vld [vmem:[%s981_s1 + $0x58] sm:$0xff] (!%p195_p3)  ;;  %v302_v12 = vld [vmem:[%s981_s1 + $0x50] sm:$0xff] (!%p195_p3) }
   0xa   : > { %v377_v13 = vld [vmem:[%s982_s2 + $0x8] sm:$0xff] (!%p195_p3)  ;;  %v376_v14 = vld [vmem:[%s982_s2] sm:$0xff] (!%p195_p3)  ;;  %v379_v15 = vld [vmem:[%s982_s2 + $0x18] sm:$0xff] (!%p195_p3) }
   0xb   : > { %v378_v16 = vld [vmem:[%s982_s2 + $0x10] sm:$0xff] (!%p195_p3)  ;;  %v381_v17 = vld [vmem:[%s982_s2 + $0x28] sm:$0xff] (!%p195_p3)  ;;  %v380_v18 = vld [vmem:[%s982_s2 + $0x20] sm:$0xff] (!%p195_p3) }
   0xc   : > { %321 = vperm.xlu1 (!%p195_p3), %787, %v295_v3   ;;  %311 = vperm.xlu0 (!%p195_p3), %786, %v293_v4   ;;  %v383_v19 = vld [vmem:[%s982_s2 + $0x38] sm:$0xff] (!%p195_p3)  ;;  %v382_v20 = vld [vmem:[%s982_s2 + $0x30] sm:$0xff] (!%p195_p3)  ;;  %v385_v21 = vld [vmem:[%s982_s2 + $0x48] sm:$0xff] (!%p195_p3) }
   0xd   : > { %v384_v22 = vld [vmem:[%s982_s2 + $0x40] sm:$0xff] (!%p195_p3)  ;;  %v387_v23 = vld [vmem:[%s982_s2 + $0x58] sm:$0xff] (!%p195_p3)  ;;  %v386_v24 = vld [vmem:[%s982_s2 + $0x50] sm:$0xff] (!%p195_p3) }
   0xe   : > { %s989_s12 = smov (!%p243_p4, %s802_s12), 1 }
   0xf   : > { %s759_s18 = smul.u32 96, %s989_s12 }
  0x10   : > { %331 = vperm.xlu1 %787, %v297_v5   ;;  %326 = vperm.xlu0 %786, %v296_v6   ;;  %s760_s22 = smul.u32 48, %s989_s12 }
  0x11   : > { %s937_s21 = scalar_lea.vmem %s980_s0, %s759_s18 }
  0x12   : > { %v280_v35 = vld [vmem:[%s937_s21] sm:$0xff]  ;;  %v281_v36 = vld [vmem:[%s937_s21 + $0x8] sm:$0xff]  ;;  %v282_v39 = vld [vmem:[%s937_s21 + $0x10] sm:$0xff]  ;;  %s953_s25 = scalar_lea.vmem %s983_s3, %s760_s22 }
  0x13   : > { %v283_v41 = vld [vmem:[%s937_s21 + $0x18] sm:$0xff]  ;;  %v285_v49 = vld [vmem:[%s937_s21 + $0x28] sm:$0xff]  ;;  %v284_v50 = vld [vmem:[%s937_s21 + $0x20] sm:$0xff] }
  0x14   : > { %341 = vperm.xlu1 %787, %v299_v7   ;;  %336 = vperm.xlu0 %786, %v298_v8   ;;  %v287_v61 = vld [vmem:[%s937_s21 + $0x38] sm:$0xff]  ;;  %v286_v62 = vld [vmem:[%s937_s21 + $0x30] sm:$0xff] }
  0x18   : > { %351 = vperm.xlu1 %787, %v301_v9   ;;  %346 = vperm.xlu0 %786, %v300_v10   ;;  %v289_v10 = vld [vmem:[%s937_s21 + $0x48] sm:$0xff] }
  0x1c   : > { %361 = vperm.xlu1 %787, %v303_v11   ;;  %356 = vperm.xlu0 %786, %v302_v12   ;;  %v288_v11 = vld [vmem:[%s937_s21 + $0x40] sm:$0xff] }
  0x20   : > { %395 = vperm.xlu1 %787, %v377_v13   ;;  %390 = vperm.xlu0 %786, %v376_v14  }
  0x24   : > { %405 = vperm.xlu1 %787, %v379_v15   ;;  %400 = vperm.xlu0 %786, %v378_v16  }
  0x28   : > { %415 = vperm.xlu1 %787, %v381_v17   ;;  %410 = vperm.xlu0 %786, %v380_v18  }
  0x2c   : > { %425 = vperm.xlu1 %787, %v383_v19   ;;  %420 = vperm.xlu0 %786, %v382_v20  }
  0x30   : > { %435 = vperm.xlu1 %787, %v385_v21   ;;  %430 = vperm.xlu0 %786, %v384_v22  }
  0x34   : > { %445 = vperm.xlu1 %787, %v387_v23   ;;  %440 = vperm.xlu0 %786, %v386_v24   ;;  %v291_v23 = vld [vmem:[%s937_s21 + $0x58] sm:$0xff]  ;;  %v290_v24 = vld [vmem:[%s937_s21 + $0x50] sm:$0xff] }
  0x87   : > { %v317_v25 = vpop.permute.xlu1 %316  ;;  %v307_v26 = vpop.permute.xlu0 %306 }
  0x88   : > { %v364_v40 = vmul.f32 %v307_v26, %v280_v35  ;;  %v366_v47 = vmul.f32 %v317_v25, %v282_v39 }
  0x8b   : > { %v322_v27 = vpop.permute.xlu1 %321  ;;  %v312_v28 = vpop.permute.xlu0 %311 }
  0x8c   : > { %v365_v42 = vmul.f32 %v312_v28, %v281_v36  ;;  %v367_v48 = vmul.f32 %v322_v27, %v283_v41 }
  0x8f   : > { %v332_v29 = vpop.permute.xlu1 %331  ;;  %v327_v30 = vpop.permute.xlu0 %326 }
  0x90   : > { %v369_v59 = vmul.f32 %v332_v29, %v285_v49  ;;  %v368_v60 = vmul.f32 %v327_v30, %v284_v50 }
  0x93   : > { %v342_v31 = vpop.permute.xlu1 %341  ;;  %v337_v32 = vpop.permute.xlu0 %336 }
  0x94   : > { %v371_v8 = vmul.f32 %v342_v31, %v287_v61  ;;  %v370_v9 = vmul.f32 %v337_v32, %v286_v62 }
  0x97   : > { %v930_v33 = vpop.permute.xlu1 %351  ;;  %v932_v34 = vpop.permute.xlu0 %346 }
  0x98   : > { %v373_v21 = vmul.f32 %v930_v33, %v289_v10  ;;  %v372_v22 = vmul.f32 %v932_v34, %v288_v11 }
  0x9b   : > { %v941_v37 = vpop.permute.xlu1 %361  ;;  %v943_v38 = vpop.permute.xlu0 %356 }
  0x9c   : > { %v375_v36 = vmul.f32 %v941_v37, %v291_v23  ;;  %v374_v33 = vmul.f32 %v943_v38, %v290_v24 }
  0x9f   : > { %v396_v43 = vpop.permute.xlu1 %395  ;;  %v391_v44 = vpop.permute.xlu0 %390 }
  0xa0   : > { %v449_v45 = vadd.f32 %v396_v43, %v365_v42  ;;  %v448_v46 = vadd.f32 %v391_v44, %v364_v40 }
  0xa2   : > { %vm461_vm0 = vcmp.ge.f32.partialorder %v449_v45, 0.0  ;;  %v473_v51 = vmul.f32 0.01, %v449_v45  ;;  %vm460_vm1 = vcmp.ge.f32.partialorder %v448_v46, 0.0  ;;  %v472_v52 = vmul.f32 0.01, %v448_v46 }
  0xa3   : > { %v406_v53 = vpop.permute.xlu1 %405  ;;  %v401_v54 = vpop.permute.xlu0 %400 }
  0xa4   : > { %v485_v55 = vsel %vm461_vm0, %v449_v45, %v473_v51  ;;  %v484_v56 = vsel %vm460_vm1, %v448_v46, %v472_v52  ;;  %v451_v57 = vadd.f32 %v406_v53, %v367_v48  ;;  %v450_v58 = vadd.f32 %v401_v54, %v366_v47 }
  0xa5   : > { %v727_v63 = vpack.c.bf16 %v485_v55, %v484_v56 }
  0xa6   : > { %vm463_vm2 = vcmp.ge.f32.partialorder %v451_v57, 0.0  ;;  %v475_v0 = vmul.f32 0.01, %v451_v57  ;;  %vm462_vm3 = vcmp.ge.f32.partialorder %v450_v58, 0.0  ;;  %v474_v1 = vmul.f32 0.01, %v450_v58 }
  0xa7   : > { %728 = vst [vmem:[%s953_s25] sm:$0xff] %v727_v63   ;;  %v416_v2 = vpop.permute.xlu1 %415  ;;  %v411_v3 = vpop.permute.xlu0 %410 }
  0xa8   : > { %v487_v4 = vsel %vm463_vm2, %v451_v57, %v475_v0  ;;  %v486_v5 = vsel %vm462_vm3, %v450_v58, %v474_v1  ;;  %v453_v6 = vadd.f32 %v416_v2, %v369_v59  ;;  %v452_v7 = vadd.f32 %v411_v3, %v368_v60 }
  0xa9   : > { %v732_v12 = vpack.c.bf16 %v487_v4, %v486_v5 }
  0xaa   : > { %vm465_vm4 = vcmp.ge.f32.partialorder %v453_v6, 0.0  ;;  %v477_v13 = vmul.f32 0.01, %v453_v6  ;;  %vm464_vm5 = vcmp.ge.f32.partialorder %v452_v7, 0.0  ;;  %v476_v14 = vmul.f32 0.01, %v452_v7 }
  0xab   : > { %754 = vst [vmem:[%s953_s25 + $0x8] sm:$0xff] %v732_v12   ;;  %v426_v15 = vpop.permute.xlu1 %425  ;;  %v421_v16 = vpop.permute.xlu0 %420 }
  0xac   : > { %v489_v17 = vsel %vm465_vm4, %v453_v6, %v477_v13  ;;  %v488_v18 = vsel %vm464_vm5, %v452_v7, %v476_v14  ;;  %v455_v19 = vadd.f32 %v426_v15, %v371_v8  ;;  %v454_v20 = vadd.f32 %v421_v16, %v370_v9 }
  0xad   : > { %v737_v25 = vpack.c.bf16 %v489_v17, %v488_v18 }
  0xae   : > { %vm467_vm6 = vcmp.ge.f32.partialorder %v455_v19, 0.0  ;;  %v479_v26 = vmul.f32 0.01, %v455_v19  ;;  %vm466_vm7 = vcmp.ge.f32.partialorder %v454_v20, 0.0  ;;  %v478_v27 = vmul.f32 0.01, %v454_v20 }
  0xaf   : > { %755 = vst [vmem:[%s953_s25 + $0x10] sm:$0xff] %v737_v25   ;;  %v436_v28 = vpop.permute.xlu1 %435  ;;  %v431_v29 = vpop.permute.xlu0 %430 }
  0xb0   : > { %v491_v30 = vsel %vm467_vm6, %v455_v19, %v479_v26  ;;  %v490_v31 = vsel %vm466_vm7, %v454_v20, %v478_v27  ;;  %v457_v32 = vadd.f32 %v436_v28, %v373_v21  ;;  %v456_v35 = vadd.f32 %v431_v29, %v372_v22 }
  0xb1   : > { %v742_v34 = vpack.c.bf16 %v491_v30, %v490_v31 }
  0xb2   : > { %vm469_vm8 = vcmp.ge.f32.partialorder %v457_v32, 0.0  ;;  %v481_v39 = vmul.f32 0.01, %v457_v32  ;;  %vm468_vm9 = vcmp.ge.f32.partialorder %v456_v35, 0.0  ;;  %v480_v40 = vmul.f32 0.01, %v456_v35 }
  0xb3   : > { %756 = vst [vmem:[%s953_s25 + $0x18] sm:$0xff] %v742_v34   ;;  %v446_v41 = vpop.permute.xlu1 %445  ;;  %v441_v42 = vpop.permute.xlu0 %440 }
  0xb4   : > { %v493_v43 = vsel %vm469_vm8, %v457_v32, %v481_v39  ;;  %v492_v44 = vsel %vm468_vm9, %v456_v35, %v480_v40  ;;  %v459_v45 = vadd.f32 %v446_v41, %v375_v36  ;;  %v458_v46 = vadd.f32 %v441_v42, %v374_v33 }
  0xb5   : > { %v747_v47 = vpack.c.bf16 %v493_v43, %v492_v44 }
  0xb6   : > { %vm471_vm10 = vcmp.ge.f32.partialorder %v459_v45, 0.0  ;;  %v483_v48 = vmul.f32 0.01, %v459_v45  ;;  %vm470_vm11 = vcmp.ge.f32.partialorder %v458_v46, 0.0  ;;  %v482_v37 = vmul.f32 0.01, %v458_v46 }
  0xb7   : > { %757 = vst [vmem:[%s953_s25 + $0x20] sm:$0xff] %v747_v47  }
  0xb8   : > { %v495_v38 = vsel %vm471_vm10, %v459_v45, %v483_v48  ;;  %v494_v49 = vsel %vm470_vm11, %v458_v46, %v482_v37 }
  0xb9   : > { %v752_v50 = vpack.c.bf16 %v495_v38, %v494_v49 }
  0xbb   : > { %758 = vst [vmem:[%s953_s25 + $0x28] sm:$0xff] %v752_v50  }
  0xbc PF: > { %s13_s14 = sadd.s32 1, %s810_s14   ;;  %s984_s12 = smov %s806_s13 }
  0xbd   : > { %p10_p5 = scmp.ge.s32.totalorder %s13_s14, 4   ;;  %s985_s13 = smov %s987_s15 }
  0xbf   :  { %12 = sbr.rel (!%p10_p5) target bundleno = 2 (0x2), region = 68 }

// kernel: squeeze.13
= control target key start
LH: loop header
LB: loop body
LE: loop exit
PB: predicated region body
PF: predicated region fallthrough
CT: control target
= control target key end

     0   :  { %vm34_vm0 = vcmask 1043458   ;;  %vm39_vm1 = vcmask 1045508   ;;  %vm44_vm2 = vcmask 1047558   ;;  %s73_s6 = smov 3  ;;  %s76_s7 = smov 12  ;;  %vm6_vm3 = vcmask 1042434   ;;  %s812_s0 = inlined_call_operand.vmem [shape: f32[1,2,2,33,8], index: 0, kind: input, shape index: {}]   ;;  %s813_s1 = inlined_call_operand.vmem [shape: f32[1056], index: 1, kind: output, shape index: {}]  }
   0x1   :  { %v394_v0 = vld [vmem:[%s812_s0 + $0xd] ss:$16 sm:%s73_s6]   ;;  %v395_v1 = vld [vmem:[%s812_s0 + $0x14] ss:$16 sm:%s76_s7]   ;;  %s81_s12 = smov 48  ;;  %s86_s13 = smov 192 }
   0x2   :  { %v79_v2 = vsel %vm34_vm0, %v395_v1, %v394_v0  ;;  %v396_v3 = vld [vmem:[%s812_s0 + $0x1b] ss:$16 sm:%s81_s12]   ;;  %v397_v4 = vld [vmem:[%s812_s0 + $0x22] ss:$16 sm:%s86_s13]   ;;  %s29_s18 = smov 3  ;;  %s32_s21 = smov 12 }
   0x3   :  { %v84_v5 = vsel %vm39_vm1, %v396_v3, %v79_v2  ;;  %v386_v6 = vld [vmem:[%s812_s0 + $0xf] ss:$16 sm:%s29_s18]   ;;  %s37_s22 = smov 48  ;;  %v387_v8 = vld [vmem:[%s812_s0 + $0x16] ss:$16 sm:%s32_s21]   ;;  %s42_s27 = smov 192 }
   0x4   :  { %v89_v7 = vsel %vm44_vm2, %v397_v4, %v84_v5  ;;  %v388_v9 = vld [vmem:[%s812_s0 + $0x1d] ss:$16 sm:%s37_s22]   ;;  %s467_s28 = smov 104   ;;  %v35_v10 = vsel %vm34_vm0, %v387_v8, %v386_v6  ;;  %v389_v11 = vld [vmem:[%s812_s0 + $0x24] ss:$16 sm:%s42_s27]   ;;  %s95_s2 = smov 3 }
   0x5   :  { %90 = vrot.lane.b32.xlu1 %v89_v7, %s467_s28  ;;  %s98_s3 = smov 12  ;;  %v40_v12 = vsel %vm39_vm1, %v388_v9, %v35_v10  ;;  %v398_v13 = vld [vmem:[%s812_s0 + $0xc] ss:$16 sm:%s95_s2]   ;;  %s103_s8 = smov 48  ;;  %vm8_vm4 = vcmask 64512   ;;  %vm48_vm5 = vcmask 1048512  }
   0x6   :  { %v399_v14 = vld [vmem:[%s812_s0 + $0x13] ss:$16 sm:%s98_s3]   ;;  %s108_s9 = smov 192  ;;  %v45_v15 = vsel %vm44_vm2, %v389_v11, %v40_v12  ;;  %v400_v17 = vld [vmem:[%s812_s0 + $0x1a] ss:$16 sm:%s103_s8]   ;;  %s51_s14 = smov 3 }
   0x7   :  { %v101_v16 = vsel %vm34_vm0, %v399_v14, %v398_v13  ;;  %v401_v18 = vld [vmem:[%s812_s0 + $0x21] ss:$16 sm:%s108_s9]   ;;  %s468_s15 = smov 120   ;;  %v390_v20 = vld [vmem:[%s812_s0 + $0xe] ss:$16 sm:%s51_s14]   ;;  %s54_s18 = smov 12 }
   0x8   :  { %46 = vrot.lane.b32.xlu0 %v45_v15, %s468_s15  ;;  %v106_v19 = vsel %vm39_vm1, %v400_v17, %v101_v16  ;;  %s59_s19 = smov 48  ;;  %v391_v22 = vld [vmem:[%s812_s0 + $0x15] ss:$16 sm:%s54_s18]   ;;  %s64_s24 = smov 192  ;;  %vm70_vm6 = vcmask 982912   ;;  %vm92_vm7 = vcmask 917312  }
   0x9   :  { %v111_v21 = vsel %vm44_vm2, %v401_v18, %v106_v19  ;;  %v392_v23 = vld [vmem:[%s812_s0 + $0x1c] ss:$16 sm:%s59_s19]   ;;  %s469_s25 = smov 96   ;;  %v57_v24 = vsel %vm34_vm0, %v391_v22, %v390_v20  ;;  %v393_v25 = vld [vmem:[%s812_s0 + $0x23] ss:$16 sm:%s64_s24]   ;;  %s139_s28 = smov 3 }
   0xa   :  { %112 = vrot.lane.b32.xlu1 %v111_v21, %s469_s25  ;;  %s142_s29 = smov 12  ;;  %v62_v26 = vsel %vm39_vm1, %v392_v23, %v57_v24  ;;  %v406_v27 = vld [vmem:[%s812_s0 + $0xa] ss:$16 sm:%s139_s28]   ;;  %s147_s5 = smov 48  ;;  %v438_v19 = vld [vmem:[%s812_s0 + $0x98] sm:$0x1]  }
   0xb   :  { %v407_v28 = vld [vmem:[%s812_s0 + $0x11] ss:$16 sm:%s142_s29]   ;;  %s152_s6 = smov 192  ;;  %v67_v29 = vsel %vm44_vm2, %v393_v25, %v62_v26  ;;  %v408_v31 = vld [vmem:[%s812_s0 + $0x18] ss:$16 sm:%s147_s5]   ;;  %s117_s11 = smov 3 }
   0xc   :  { %v145_v30 = vsel %vm34_vm0, %v407_v28, %v406_v27  ;;  %v409_v32 = vld [vmem:[%s812_s0 + $0x1f] ss:$16 sm:%s152_s6]   ;;  %s470_s12 = smov 112   ;;  %v402_v34 = vld [vmem:[%s812_s0 + $0xb] ss:$16 sm:%s117_s11]   ;;  %s120_s15 = smov 12 }
   0xd   :  { %68 = vrot.lane.b32.xlu0 %v67_v29, %s470_s12  ;;  %v150_v33 = vsel %vm39_vm1, %v408_v31, %v145_v30  ;;  %s125_s16 = smov 48  ;;  %v403_v36 = vld [vmem:[%s812_s0 + $0x12] ss:$16 sm:%s120_s15]   ;;  %s130_s21 = smov 192  ;;  %v444_v26 = vld [vmem:[%s812_s0 + $0x97] sm:$0x1]  }
   0xe   :  { %v155_v35 = vsel %vm44_vm2, %v409_v32, %v150_v33  ;;  %v404_v37 = vld [vmem:[%s812_s0 + $0x19] ss:$16 sm:%s125_s16]   ;;  %s471_s22 = smov 80   ;;  %v123_v38 = vsel %vm34_vm0, %v403_v36, %v402_v34  ;;  %v405_v39 = vld [vmem:[%s812_s0 + $0x20] ss:$16 sm:%s130_s21]   ;;  %s183_s25 = smov 3 }
   0xf   :  { %156 = vrot.lane.b32.xlu1 %v155_v35, %s471_s22  ;;  %s186_s26 = smov 12  ;;  %v128_v40 = vsel %vm39_vm1, %v404_v37, %v123_v38  ;;  %v414_v41 = vld [vmem:[%s812_s0 + $0x8] ss:$16 sm:%s183_s25]   ;;  %s191_s2 = smov 48  ;;  %v450_v36 = vld [vmem:[%s812_s0 + $0x96] sm:$0x1]  }
  0x10   :  { %v415_v42 = vld [vmem:[%s812_s0 + $0xf] ss:$16 sm:%s186_s26]   ;;  %s196_s3 = smov 192  ;;  %v133_v43 = vsel %vm44_vm2, %v405_v39, %v128_v40  ;;  %v416_v45 = vld [vmem:[%s812_s0 + $0x16] ss:$16 sm:%s191_s2]   ;;  %s161_s8 = smov 3 }
  0x11   :  { %v189_v44 = vsel %vm34_vm0, %v415_v42, %v414_v41  ;;  %v417_v46 = vld [vmem:[%s812_s0 + $0x1d] ss:$16 sm:%s196_s3]   ;;  %s472_s9 = smov 88   ;;  %v410_v48 = vld [vmem:[%s812_s0 + $0x9] ss:$16 sm:%s161_s8]   ;;  %s164_s12 = smov 12 }
  0x12   :  { %134 = vrot.lane.b32.xlu0 %v133_v43, %s472_s9  ;;  %v194_v47 = vsel %vm39_vm1, %v416_v45, %v189_v44  ;;  %s169_s13 = smov 48  ;;  %v411_v50 = vld [vmem:[%s812_s0 + $0x10] ss:$16 sm:%s164_s12]   ;;  %s174_s18 = smov 192  ;;  %vm114_vm8 = vcmask 851712   ;;  %vm136_vm9 = vcmask 786112  }
  0x13   :  { %v199_v49 = vsel %vm44_vm2, %v417_v46, %v194_v47  ;;  %v412_v51 = vld [vmem:[%s812_s0 + $0x17] ss:$16 sm:%s169_s13]   ;;  %s473_s19 = smov 64   ;;  %v167_v52 = vsel %vm34_vm0, %v411_v50, %v410_v48  ;;  %v413_v53 = vld [vmem:[%s812_s0 + $0x1e] ss:$16 sm:%s174_s18]   ;;  %s227_s22 = smov 3 }
  0x14   :  { %200 = vrot.lane.b32.xlu1 %v199_v49, %s473_s19  ;;  %s230_s23 = smov 12  ;;  %v172_v54 = vsel %vm39_vm1, %v412_v51, %v167_v52  ;;  %v422_v55 = vld [vmem:[%s812_s0 + $0x6] ss:$16 sm:%s227_s22]   ;;  %s235_s28 = smov 48  ;;  %v379_v38 = vld [vmem:[%s812_s0 + $0x1e] sm:$0x4]  }
  0x15   :  { %v423_v56 = vld [vmem:[%s812_s0 + $0xd] ss:$16 sm:%s230_s23]   ;;  %s240_s29 = smov 192  ;;  %v177_v57 = vsel %vm44_vm2, %v413_v53, %v172_v54  ;;  %v424_v59 = vld [vmem:[%s812_s0 + $0x14] ss:$16 sm:%s235_s28]   ;;  %s205_s5 = smov 3 }
  0x16   :  { %v233_v58 = vsel %vm34_vm0, %v423_v56, %v422_v55  ;;  %v425_v60 = vld [vmem:[%s812_s0 + $0x1b] ss:$16 sm:%s240_s29]   ;;  %s474_s6 = smov 72   ;;  %v418_v62 = vld [vmem:[%s812_s0 + $0x7] ss:$16 sm:%s205_s5]   ;;  %s208_s9 = smov 12 }
  0x17   :  { %178 = vrot.lane.b32.xlu0 %v177_v57, %s474_s6  ;;  %v238_v61 = vsel %vm39_vm1, %v424_v59, %v233_v58  ;;  %s213_s10 = smov 48  ;;  %v419_v0 = vld [vmem:[%s812_s0 + $0xe] ss:$16 sm:%s208_s9]   ;;  %s218_s15 = smov 192  ;;  %vm158_vm10 = vcmask 720512   ;;  %vm180_vm11 = vcmask 654912  }
  0x18   :  { %v243_v63 = vsel %vm44_vm2, %v425_v60, %v238_v61  ;;  %v420_v1 = vld [vmem:[%s812_s0 + $0x15] ss:$16 sm:%s213_s10]   ;;  %s475_s16 = smov 48   ;;  %v211_v2 = vsel %vm34_vm0, %v419_v0, %v418_v62  ;;  %v421_v3 = vld [vmem:[%s812_s0 + $0x1c] ss:$16 sm:%s218_s15]   ;;  %s271_s19 = smov 3 }
  0x19   :  { %244 = vrot.lane.b32.xlu1 %v243_v63, %s475_s16  ;;  %s274_s20 = smov 12  ;;  %v216_v4 = vsel %vm39_vm1, %v420_v1, %v211_v2  ;;  %v430_v5 = vld [vmem:[%s812_s0 + $0x4] ss:$16 sm:%s271_s19]   ;;  %s279_s25 = smov 48  ;;  %vm202_vm12 = vcmask 589312   ;;  %vm224_vm13 = vcmask 523712  }
  0x1a   :  { %v431_v6 = vld [vmem:[%s812_s0 + $0xb] ss:$16 sm:%s274_s20]   ;;  %s284_s26 = smov 192  ;;  %v221_v7 = vsel %vm44_vm2, %v421_v3, %v216_v4  ;;  %v432_v9 = vld [vmem:[%s812_s0 + $0x12] ss:$16 sm:%s279_s25]   ;;  %s249_s2 = smov 3 }
  0x1b   :  { %v277_v8 = vsel %vm34_vm0, %v431_v6, %v430_v5  ;;  %v433_v10 = vld [vmem:[%s812_s0 + $0x19] ss:$16 sm:%s284_s26]   ;;  %s476_s3 = smov 56   ;;  %v426_v12 = vld [vmem:[%s812_s0 + $0x5] ss:$16 sm:%s249_s2]   ;;  %s252_s6 = smov 12 }
  0x1c   :  { %222 = vrot.lane.b32.xlu0 %v221_v7, %s476_s3  ;;  %v282_v11 = vsel %vm39_vm1, %v432_v9, %v277_v8  ;;  %s257_s7 = smov 48  ;;  %v427_v14 = vld [vmem:[%s812_s0 + $0xc] ss:$16 sm:%s252_s6]   ;;  %s262_s12 = smov 192  ;;  %vm246_vm14 = vcmask 458112   ;;  %vm268_vm15 = vcmask 392512  }
  0x1d   :  { %v287_v13 = vsel %vm44_vm2, %v433_v10, %v282_v11  ;;  %v428_v15 = vld [vmem:[%s812_s0 + $0x13] ss:$16 sm:%s257_s7]   ;;  %s477_s13 = smov 32   ;;  %v255_v16 = vsel %vm34_vm0, %v427_v14, %v426_v12  ;;  %v429_v17 = vld [vmem:[%s812_s0 + $0x1a] ss:$16 sm:%s262_s12]   ;;  %s293_s16 = smov 3 }
  0x1e   :  { %288 = vrot.lane.b32.xlu1 %v287_v13, %s477_s13  ;;  %v260_v18 = vsel %vm39_vm1, %v428_v15, %v255_v16  ;;  %v434_v20 = vld [vmem:[%s812_s0 + $0x3] ss:$16 sm:%s293_s16]   ;;  %s296_s21 = smov 12  ;;  %s301_s22 = smov 48 }
  0x1f   :  { %v265_v21 = vsel %vm44_vm2, %v429_v17, %v260_v18  ;;  %v435_v22 = vld [vmem:[%s812_s0 + $0xa] ss:$16 sm:%s296_s21]   ;;  %v436_v23 = vld [vmem:[%s812_s0 + $0x11] ss:$16 sm:%s301_s22]   ;;  %s306_s27 = smov 192  ;;  %s478_s28 = smov 40  }
  0x20   :  { %266 = vrot.lane.b32.xlu0 %v265_v21, %s478_s28  ;;  %v299_v24 = vsel %vm34_vm0, %v435_v22, %v434_v20  ;;  %v437_v25 = vld [vmem:[%s812_s0 + $0x18] ss:$16 sm:%s306_s27]   ;;  %s322_s4 = smov 3  ;;  %s325_s5 = smov 12 }
  0x21   :  { %s479_s6 = smov 24   ;;  %v304_v27 = vsel %vm39_vm1, %v436_v23, %v299_v24  ;;  %v440_v28 = vld [vmem:[%s812_s0 + $0x2] ss:$16 sm:%s322_s4]   ;;  %s330_s9 = smov 48  ;;  %v441_v30 = vld [vmem:[%s812_s0 + $0x9] ss:$16 sm:%s325_s5]  }
  0x22   :  { %316 = vrot.lane.b32.xlu1 %v438_v19, %s479_s6  ;;  %s335_s10 = smov 192  ;;  %v309_v29 = vsel %vm44_vm2, %v437_v25, %v304_v27  ;;  %v442_v31 = vld [vmem:[%s812_s0 + $0x10] ss:$16 sm:%s330_s9]   ;;  %s351_s15 = smov 3  ;;  %v328_v32 = vsel %vm34_vm0, %v441_v30, %v440_v28 }
  0x23   :  { %v443_v33 = vld [vmem:[%s812_s0 - $0x1a] ss:$23 sm:%s335_s10]   ;;  %v446_v34 = vld [vmem:[%s812_s0 + $0x1] ss:$16 sm:%s351_s15]   ;;  %s354_s20 = smov 12  ;;  %s359_s21 = smov 48  ;;  %v333_v35 = vsel %vm39_vm1, %v442_v31, %v328_v32 }
  0x24   :  { %310 = vrot.lane.b32.xlu0 %v309_v29, %s479_s6  ;;  %v447_v37 = vld [vmem:[%s812_s0 + $0x8] ss:$16 sm:%s354_s20]   ;;  %s364_s26 = smov 192  ;;  %s2_s27 = smov 3  ;;  %v338_v39 = vsel %vm44_vm2, %v443_v33, %v333_v35 }
  0x25   :  { %s480_s30 = smov 16   ;;  %v357_v40 = vsel %vm34_vm0, %v447_v37, %v446_v34  ;;  %v448_v41 = vld [vmem:[%s812_s0 - $0x14] ss:$23 sm:%s359_s21]   ;;  %s11_s4 = smov 3  ;;  %v449_v43 = vld [vmem:[%s812_s0 - $0x1b] ss:$23 sm:%s364_s26]  }
  0x26   :  { %345 = vrot.lane.b32.xlu1 %v444_v26, %s480_s30  ;;  %s17_s5 = smov 3  ;;  %v362_v42 = vsel %vm39_vm1, %v448_v41, %v357_v40  ;;  %s23_s8 = smov 3  ;;  %v3_v44 = vld [vmem:[%s812_s0] ss:$16 sm:%s2_s27]   ;;  %vm290_vm0 = vcmask 326912   ;;  %vm312_vm1 = vcmask 261312  }
  0x27   :  { %v7_v45 = vsel %vm6_vm3, %v379_v38, %v3_v44  ;;  %v380_v46 = vld [vmem:[%s812_s0 + $0x37] ss:$16 sm:%s11_s4]   ;;  %v382_v47 = vld [vmem:[%s812_s0 + $0x5e] ss:$16 sm:%s17_s5]   ;;  %v367_v49 = vsel %vm44_vm2, %v449_v43, %v362_v42  ;;  %vm341_vm2 = vcmask 195712   ;;  %vm370_vm3 = vcmask 130112  }
  0x28   :  { %339 = vrot.lane.b32.xlu0 %v338_v39, %s480_s30  ;;  %9 = vst.msk [vmem:[%s813_s1] sm:$0x7] %vm8_vm4, %v7_v45   ;;  %381 = vst.msk [vmem:[%s813_s1 + $0x3] sm:$0x3] %vm8_vm4, %v380_v46  }
  0x29   :  { %383 = vst.msk [vmem:[%s813_s1 + $0x5] sm:$0x3] %vm8_vm4, %v382_v47   ;;  %v384_v48 = vld [vmem:[%s812_s0 + $0x85] ss:$16 sm:%s23_s8]   ;;  %s481_s0 = smov 8  }
  0x2a   :  { %374 = vrot.lane.b32.xlu1 %v450_v36, %s481_s0  ;;  %385 = vst.msk [vmem:[%s813_s1 + $0x7] sm:$0x3] %vm8_vm4, %v384_v48  }
  0x2c   :  { %368 = vrot.lane.b32.xlu0 %v367_v49, %s481_s0 }
  0x77   :  { %v91_v50 = vpop.permute.xlu1 %90  }
  0x7a   :  { %v47_v51 = vpop.permute.xlu0 %46  }
  0x7b   :  { %49 = vst.msk [vmem:[%s813_s1] sm:$0xff] %vm48_vm5, %v47_v51  }
  0x7c   :  { %v113_v52 = vpop.permute.xlu1 %112  }
  0x7f   :  { %v69_v53 = vpop.permute.xlu0 %68  }
  0x80   :  { %71 = vst.msk [vmem:[%s813_s1] sm:$0xff] %vm70_vm6, %v69_v53  }
  0x81   :  { %93 = vst.msk [vmem:[%s813_s1] sm:$0xff] %vm92_vm7, %v91_v50   ;;  %v157_v54 = vpop.permute.xlu1 %156  }
  0x82   :  { %115 = vst.msk [vmem:[%s813_s1] sm:$0xff] %vm114_vm8, %v113_v52  }
  0x84   :  { %v135_v55 = vpop.permute.xlu0 %134  }
  0x85   :  { %137 = vst.msk [vmem:[%s813_s1] sm:$0xff] %vm136_vm9, %v135_v55  }
  0x86   :  { %159 = vst.msk [vmem:[%s813_s1] sm:$0xff] %vm158_vm10, %v157_v54   ;;  %v201_v56 = vpop.permute.xlu1 %200  }
  0x89   :  { %v179_v57 = vpop.permute.xlu0 %178  }
  0x8a   :  { %181 = vst.msk [vmem:[%s813_s1] sm:$0xff] %vm180_vm11, %v179_v57  }
  0x8b   :  { %203 = vst.msk [vmem:[%s813_s1] sm:$0xff] %vm202_vm12, %v201_v56   ;;  %v245_v58 = vpop.permute.xlu1 %244  }
  0x8e   :  { %v223_v59 = vpop.permute.xlu0 %222  }
  0x8f   :  { %225 = vst.msk [vmem:[%s813_s1] sm:$0xff] %vm224_vm13, %v223_v59  }
  0x90   :  { %247 = vst.msk [vmem:[%s813_s1] sm:$0xff] %vm246_vm14, %v245_v58   ;;  %v289_v60 = vpop.permute.xlu1 %288  }
  0x92   :  { %v267_v61 = vpop.permute.xlu0 %266  }
  0x93   :  { %269 = vst.msk [vmem:[%s813_s1] sm:$0xff] %vm268_vm15, %v267_v61  }
  0x94   :  { %v317_v62 = vpop.permute.xlu1 %316   ;;  %291 = vst.msk [vmem:[%s813_s1] sm:$0xff] %vm290_vm0, %v289_v60  }
  0x95   :  { %439 = vst.msk [vmem:[%s813_s1 + $0x8] sm:$0x1] %vm312_vm1, %v317_v62  }
  0x96   :  { %v311_v63 = vpop.permute.xlu0 %310  }
  0x97   :  { %313 = vst.msk [vmem:[%s813_s1] sm:$0xff] %vm312_vm1, %v311_v63  }
  0x98   :  { %v346_v0 = vpop.permute.xlu1 %345  }
  0x99   :  { %445 = vst.msk [vmem:[%s813_s1 + $0x8] sm:$0x1] %vm341_vm2, %v346_v0  }
  0x9a   :  { %v340_v1 = vpop.permute.xlu0 %339  }
  0x9b   :  { %342 = vst.msk [vmem:[%s813_s1] sm:$0xff] %vm341_vm2, %v340_v1  }
  0x9c   :  { %v375_v2 = vpop.permute.xlu1 %374  }
  0x9d   :  { %451 = vst.msk [vmem:[%s813_s1 + $0x8] sm:$0x1] %vm370_vm3, %v375_v2  }
  0x9e   :  { %v369_v3 = vpop.permute.xlu0 %368  }
  0x9f   :  { %371 = vst.msk [vmem:[%s813_s1] sm:$0xff] %vm370_vm3, %v369_v3  }

// kernel: blendnet_forward.16
= control target key start
LH: loop header
LB: loop body
LE: loop exit
PB: predicated region body
PF: predicated region fallthrough
CT: control target
= control target key end

     0   :  { %v608_v0 = vmov 0.0   ;;  %vm609_vm0 = vmmov 0   ;;  %v610_v3 = vmov 0   ;;  %s830_s1 = inlined_call_operand.vmem [shape: bf16[128,128], index: 1, kind: input, shape index: {}]   ;;  %s831_s0 = inlined_call_operand.vmem [shape: bf16[136,128], index: 0, kind: input, shape index: {}]   ;;  %s832_s2 = inlined_call_operand.vmem [shape: f32[136,1], index: 2, kind: input, shape index: {}]   ;;  %s833_s3 = inlined_call_operand.vmem [shape: f32[136,128], index: 3, kind: output, shape index: {}]  }
   0x1   :  { %518 = vmatprep.subr.bf16.mxu0 %v608_v0  ;;  %570 = vmatprep.subr.bf16.mxu1 %v608_v0  ;;  %v591_v1 = vld [vmem:[%s830_s1] sm:$0xff]   ;;  %v592_v2 = vld [vmem:[%s830_s1 + $0x8] sm:$0xff]   ;;  %v593_v4 = vld [vmem:[%s830_s1 + $0x10] sm:$0xff]  }
   0x2   :  { %534 = vmatprep.mubr.msk.bf16.mxu0 %vm609_vm0, %v608_v0  ;;  %554 = vmatprep.mubr.msk.bf16.mxu1 %vm609_vm0, %v608_v0  ;;  %v594_v5 = vld [vmem:[%s830_s1 + $0x18] sm:$0xff]   ;;  %v595_v6 = vld [vmem:[%s830_s1 + $0x20] sm:$0xff]   ;;  %v346_v8 = vld [vmem:[%s832_s2 + $0x10] sm:$0xff] }
   0x3   :  { %519 = vmatpush3.bf16.msra.mxu0 %v591_v1  ;;  %578 = vmatpush3.bf16.msra.mxu1 %v591_v1  ;;  %v344_v7 = vld [vmem:[%s832_s2] sm:$0xff]  ;;  %v596_v9 = vld [vmem:[%s830_s1 + $0x28] sm:$0xff]   ;;  %v347_v11 = vld [vmem:[%s832_s2 + $0x18] sm:$0xff] }
   0x4   :  { %520 = vmatprep.subr.bf16.mxu0 %v608_v0  ;;  %571 = vmatprep.subr.bf16.mxu1 %v608_v0  ;;  %v345_v10 = vld [vmem:[%s832_s2 + $0x8] sm:$0xff]  ;;  %v597_v12 = vld [vmem:[%s830_s1 + $0x30] sm:$0xff]   ;;  %v348_v13 = vld [vmem:[%s832_s2 + $0x20] sm:$0xff] }
   0x5   :  { %589 = vset.pattern.permute.xlu0 %v610_v3  ;;  %590 = vset.pattern.permute.xlu1 %v610_v3  ;;  %v349_v14 = vld [vmem:[%s832_s2 + $0x28] sm:$0xff]  ;;  %v598_v15 = vld [vmem:[%s830_s1 + $0x38] sm:$0xff]   ;;  %v350_v16 = vld [vmem:[%s832_s2 + $0x30] sm:$0xff] }
   0x6   :  { %363 = vperm.xlu0 %589, %v344_v7   ;;  %373 = vperm.xlu1 %590, %v346_v8   ;;  %v599_v17 = vld [vmem:[%s831_s0] sm:$0xff]   ;;  %v600_v18 = vld [vmem:[%s831_s0 + $0x28] sm:$0xff]   ;;  %v351_v19 = vld [vmem:[%s832_s2 + $0x38] sm:$0xff] }
   0x7   :  { %521 = vmatpush3.bf16.msra.mxu0 %v592_v2  ;;  %579 = vmatpush3.bf16.msra.mxu1 %v592_v2  ;;  %v352_v20 = vld [vmem:[%s832_s2 + $0x40] sm:$0xff]  ;;  %v353_v21 = vld [vmem:[%s832_s2 + $0x48] sm:$0xff]  ;;  %v354_v22 = vld [vmem:[%s832_s2 + $0x50] sm:$0xff] }
   0x8   :  { %522 = vmatprep.subr.bf16.mxu0 %v608_v0  ;;  %572 = vmatprep.subr.bf16.mxu1 %v608_v0  ;;  %v601_v23 = vld [vmem:[%s831_s0 + $0x8] sm:$0xff]   ;;  %v602_v24 = vld [vmem:[%s831_s0 + $0x30] sm:$0xff]   ;;  %v355_v25 = vld [vmem:[%s832_s2 + $0x58] sm:$0xff] }
   0x9   :  { %v356_v26 = vld [vmem:[%s832_s2 + $0x60] sm:$0xff]  ;;  %v357_v27 = vld [vmem:[%s832_s2 + $0x68] sm:$0xff]  ;;  %v358_v28 = vld [vmem:[%s832_s2 + $0x70] sm:$0xff] }
   0xa   :  { %368 = vperm.xlu0 %589, %v345_v10   ;;  %378 = vperm.xlu1 %590, %v347_v11   ;;  %v603_v29 = vld [vmem:[%s831_s0 + $0x10] sm:$0xff]   ;;  %v604_v30 = vld [vmem:[%s831_s0 + $0x38] sm:$0xff]   ;;  %v360_v32 = vld [vmem:[%s832_s2 + $0x80] sm:$0xff] }
   0xb   :  { %523 = vmatpush3.bf16.msra.mxu0 %v593_v4  ;;  %580 = vmatpush3.bf16.msra.mxu1 %v593_v4  ;;  %v359_v31 = vld [vmem:[%s832_s2 + $0x78] sm:$0xff]  ;;  %v606_v34 = vld [vmem:[%s831_s0 + $0x40] ss:$0 sps:$4 sm:$0xff]  }
   0xc   :  { %524 = vmatprep.subr.bf16.mxu0 %v608_v0  ;;  %573 = vmatprep.subr.bf16.mxu1 %v608_v0  ;;  %v605_v33 = vld [vmem:[%s831_s0 + $0x18] sm:$0xff]   ;;  %v607_v35 = vld [vmem:[%s831_s0 + $0x20] sm:$0xff]  }
   0xe   :  { %383 = vperm.xlu0 %589, %v348_v13   ;;  %388 = vperm.xlu1 %590, %v349_v14  }
   0xf   :  { %525 = vmatpush3.bf16.msra.mxu0 %v594_v5  ;;  %581 = vmatpush3.bf16.msra.mxu1 %v594_v5 }
  0x10   :  { %526 = vmatprep.subr.bf16.mxu0 %v608_v0  ;;  %574 = vmatprep.subr.bf16.mxu1 %v608_v0 }
  0x12   :  { %393 = vperm.xlu0 %589, %v350_v16   ;;  %398 = vperm.xlu1 %590, %v351_v19  }
  0x13   :  { %527 = vmatpush3.bf16.msra.mxu0 %v595_v6  ;;  %582 = vmatpush3.bf16.msra.mxu1 %v595_v6 }
  0x14   :  { %528 = vmatprep.subr.bf16.mxu0 %v608_v0  ;;  %575 = vmatprep.subr.bf16.mxu1 %v608_v0 }
  0x16   :  { %403 = vperm.xlu0 %589, %v352_v20   ;;  %408 = vperm.xlu1 %590, %v353_v21  }
  0x17   :  { %529 = vmatpush3.bf16.msra.mxu0 %v596_v9  ;;  %583 = vmatpush3.bf16.msra.mxu1 %v596_v9 }
  0x18   :  { %530 = vmatprep.subr.bf16.mxu0 %v608_v0  ;;  %576 = vmatprep.subr.bf16.mxu1 %v608_v0 }
  0x1a   :  { %413 = vperm.xlu0 %589, %v354_v22   ;;  %418 = vperm.xlu1 %590, %v355_v25  }
  0x1b   :  { %531 = vmatpush3.bf16.msra.mxu0 %v597_v12  ;;  %584 = vmatpush3.bf16.msra.mxu1 %v597_v12 }
  0x1c   :  { %532 = vmatprep.subr.bf16.mxu0 %v608_v0  ;;  %577 = vmatprep.subr.bf16.mxu1 %v608_v0 }
  0x1e   :  { %423 = vperm.xlu0 %589, %v356_v26   ;;  %428 = vperm.xlu1 %590, %v357_v27  }
  0x1f   :  { %533 = vmatpush3.bf16.msra.mxu0 %v598_v15  ;;  %585 = vmatpush3.bf16.msra.mxu1 %v598_v15 }
  0x22   :  { %535 = vmatmul.mubr.bf16.vlgmr.msra.gmra.mrb[0].mxu0 %v599_v17  ;;  %555 = vmatmul.mubr.bf16.vlgmr.msra.gmra.mrb[0].mxu1 %v600_v18 }
  0x23   :  { %538 = vmatprep.mubr.msk.bf16.mxu0 %vm609_vm0, %v608_v0  ;;  %558 = vmatprep.mubr.msk.bf16.mxu1 %vm609_vm0, %v608_v0 }
  0x24   :  { %433 = vperm.xlu0 %589, %v358_v28   ;;  %438 = vperm.xlu1 %590, %v359_v31  }
  0x28   :  { %443 = vperm.xlu0 %589, %v360_v32  }
  0x2a   :  { %539 = vmatmul.mubr.bf16.gmra.mrb[4].mxu0 %v601_v23  ;;  %559 = vmatmul.mubr.bf16.gmra.mrb[4].mxu1 %v602_v24 }
  0x2b   :  { %542 = vmatprep.mubr.msk.bf16.mxu0 %vm609_vm0, %v608_v0  ;;  %562 = vmatprep.mubr.msk.bf16.mxu1 %vm609_vm0, %v608_v0 }
  0x32   :  { %543 = vmatmul.mubr.bf16.gmra.mrb[8].mxu0 %v603_v29  ;;  %563 = vmatmul.mubr.bf16.gmra.mrb[8].mxu1 %v604_v30 }
  0x33   :  { %546 = vmatprep.mubr.msk.bf16.mxu0 %vm609_vm0, %v608_v0  ;;  %566 = vmatprep.mubr.msk.bf16.mxu1 %vm609_vm0, %v608_v0 }
  0x3a   :  { %547 = vmatmul.mubr.bf16.gmra.mrb[12].mxu0 %v605_v33  ;;  %567 = vmatmul.mubr.bf16.gmra.mrb[12].mxu1 %v606_v34 }
  0x3b   :  { %550 = vmatprep.mubr.msk.bf16.mxu0 %vm609_vm0, %v608_v0 }
  0x42   :  { %551 = vmatmul.mubr.bf16.gmra.mrb[16].mxu0 %v607_v35 }
  0x85   :  { %v364_v36 = vpop.permute.xlu0 %363  ;;  %v374_v37 = vpop.permute.xlu1 %373 }
  0x89   :  { %v369_v38 = vpop.permute.xlu0 %368  ;;  %v379_v39 = vpop.permute.xlu1 %378 }
  0x8d   :  { %v384_v40 = vpop.permute.xlu0 %383  ;;  %v389_v41 = vpop.permute.xlu1 %388 }
  0x91   :  { %v767_v42 = vpop.permute.xlu0 %393  ;;  %v769_v43 = vpop.permute.xlu1 %398 }
  0x95   :  { %v771_v44 = vpop.permute.xlu0 %403  ;;  %v773_v45 = vpop.permute.xlu1 %408 }
  0x99   :  { %v414_v46 = vpop.permute.xlu0 %413  ;;  %v419_v57 = vpop.permute.xlu1 %418 }
  0x9d   :  { %v424_v60 = vpop.permute.xlu0 %423  ;;  %v429_v7 = vpop.permute.xlu1 %428 }
  0xa3   :  { %v434_v10 = vpop.permute.xlu0 %433  ;;  %v439_v21 = vpop.permute.xlu1 %438 }
  0xa7   :  { %v444_v24 = vpop.permute.xlu0 %443 }
  0xf5   :  { %v220_v47 = vpop.f32.mrb[0].mxu0  ;;  %v260_v48 = vpop.f32.mrb[0].mxu1 }
  0xf6   :  { %v536_v49 = vpop.f32.mrb[1].mxu0  ;;  %v556_v50 = vpop.f32.mrb[1].mxu1  ;;  %v446_v53 = vadd.f32 %v364_v36, %v220_v47  ;;  %v456_v54 = vadd.f32 %v414_v46, %v260_v48 }
  0xf7   :  { %v223_v51 = vpop.f32.mrb[2].mxu0  ;;  %v263_v52 = vpop.f32.mrb[2].mxu1 }
  0xf8   :  { %v537_v55 = vpop.f32.mrb[3].mxu0  ;;  %v557_v56 = vpop.f32.mrb[3].mxu1  ;;  %463 = vst [vmem:[%s833_s3] sm:$0xff] %v446_v53  ;;  %v447_v58 = vadd.f32 %v369_v38, %v223_v51  ;;  %473 = vst [vmem:[%s833_s3 + $0x50] sm:$0xff] %v456_v54  ;;  %v457_v59 = vadd.f32 %v419_v57, %v263_v52 }
  0xfa   :  { %464 = vst [vmem:[%s833_s3 + $0x8] sm:$0xff] %v447_v58  ;;  %474 = vst [vmem:[%s833_s3 + $0x58] sm:$0xff] %v457_v59 }
  0xfd   :  { %v228_v61 = vpop.f32.mrb[4].mxu0  ;;  %v268_v62 = vpop.f32.mrb[4].mxu1 }
  0xfe   :  { %v540_v63 = vpop.f32.mrb[5].mxu0  ;;  %v560_v0 = vpop.f32.mrb[5].mxu1  ;;  %v448_v3 = vadd.f32 %v374_v37, %v228_v61  ;;  %v458_v4 = vadd.f32 %v424_v60, %v268_v62 }
  0xff   :  { %v231_v1 = vpop.f32.mrb[6].mxu0  ;;  %v271_v2 = vpop.f32.mrb[6].mxu1 }
 0x100   :  { %v541_v5 = vpop.f32.mrb[7].mxu0  ;;  %v561_v6 = vpop.f32.mrb[7].mxu1  ;;  %465 = vst [vmem:[%s833_s3 + $0x10] sm:$0xff] %v448_v3  ;;  %475 = vst [vmem:[%s833_s3 + $0x60] sm:$0xff] %v458_v4  ;;  %v449_v8 = vadd.f32 %v379_v39, %v231_v1  ;;  %v459_v9 = vadd.f32 %v429_v7, %v271_v2 }
 0x102   :  { %466 = vst [vmem:[%s833_s3 + $0x18] sm:$0xff] %v449_v8  ;;  %476 = vst [vmem:[%s833_s3 + $0x68] sm:$0xff] %v459_v9 }
 0x105   :  { %v236_v11 = vpop.f32.mrb[8].mxu0  ;;  %v276_v12 = vpop.f32.mrb[8].mxu1 }
 0x106   :  { %v544_v13 = vpop.f32.mrb[9].mxu0  ;;  %v564_v14 = vpop.f32.mrb[9].mxu1  ;;  %v450_v17 = vadd.f32 %v384_v40, %v236_v11  ;;  %v460_v18 = vadd.f32 %v434_v10, %v276_v12 }
 0x107   :  { %v239_v15 = vpop.f32.mrb[10].mxu0  ;;  %v279_v16 = vpop.f32.mrb[10].mxu1 }
 0x108   :  { %v545_v19 = vpop.f32.mrb[11].mxu0  ;;  %v565_v20 = vpop.f32.mrb[11].mxu1  ;;  %467 = vst [vmem:[%s833_s3 + $0x20] sm:$0xff] %v450_v17  ;;  %477 = vst [vmem:[%s833_s3 + $0x70] sm:$0xff] %v460_v18  ;;  %v451_v22 = vadd.f32 %v389_v41, %v239_v15  ;;  %v461_v23 = vadd.f32 %v439_v21, %v279_v16 }
 0x10a   :  { %468 = vst [vmem:[%s833_s3 + $0x28] sm:$0xff] %v451_v22  ;;  %478 = vst [vmem:[%s833_s3 + $0x78] sm:$0xff] %v461_v23 }
 0x10d   :  { %v244_v25 = vpop.f32.mrb[12].mxu0  ;;  %v284_v26 = vpop.f32.mrb[12].mxu1 }
 0x10e   :  { %v548_v27 = vpop.f32.mrb[13].mxu0  ;;  %v568_v28 = vpop.f32.mrb[13].mxu1  ;;  %v452_v31 = vadd.f32 %v767_v42, %v244_v25  ;;  %v462_v32 = vadd.f32 %v444_v24, %v284_v26 }
 0x10f   :  { %v247_v29 = vpop.f32.mrb[14].mxu0  ;;  %v287_v30 = vpop.f32.mrb[14].mxu1 }
 0x110   :  { %v549_v33 = vpop.f32.mrb[15].mxu0  ;;  %v569_v34 = vpop.f32.mrb[15].mxu1  ;;  %469 = vst [vmem:[%s833_s3 + $0x30] sm:$0xff] %v452_v31  ;;  %479 = vst [vmem:[%s833_s3 + $0x80] sm:$0xff] %v462_v32  ;;  %v453_v35 = vadd.f32 %v769_v43, %v247_v29 }
 0x112   :  { %470 = vst [vmem:[%s833_s3 + $0x38] sm:$0xff] %v453_v35 }
 0x115   :  { %v252_v36 = vpop.f32.mrb[16].mxu0 }
 0x116   :  { %v552_v37 = vpop.f32.mrb[17].mxu0  ;;  %v454_v39 = vadd.f32 %v771_v44, %v252_v36 }
 0x117   :  { %v255_v38 = vpop.f32.mrb[18].mxu0 }
 0x118   :  { %v553_v40 = vpop.f32.mrb[19].mxu0  ;;  %471 = vst [vmem:[%s833_s3 + $0x40] sm:$0xff] %v454_v39  ;;  %v455_v41 = vadd.f32 %v773_v45, %v255_v38 }
 0x11a   :  { %472 = vst [vmem:[%s833_s3 + $0x48] sm:$0xff] %v455_v41 }

// kernel: blendnet_forward.17
= control target key start
LH: loop header
LB: loop body
LE: loop exit
PB: predicated region body
PF: predicated region fallthrough
CT: control target
= control target key end

     0   :  { %s313_s0 = inlined_call_operand.vmem [shape: f32[8,512], index: 0, kind: input, shape index: {}]   ;;  %s314_s1 = inlined_call_operand.vmem [shape: f32[8,512], index: 1, kind: input, shape index: {}]   ;;  %s315_s2 = inlined_call_operand.vmem [shape: f32[8,512], index: 2, kind: input, shape index: {}]   ;;  %s316_s3 = inlined_call_operand.vmem [shape: f32[8,512], index: 3, kind: input, shape index: {}]   ;;  %s317_s4 = inlined_call_operand.vmem [shape: f32[8,512], index: 4, kind: input, shape index: {}]   ;;  %s318_s5 = inlined_call_operand.vmem [shape: f32[8,512], index: 5, kind: input, shape index: {}]   ;;  %s319_s6 = inlined_call_operand.vmem [shape: f32[8,512], index: 6, kind: output, shape index: {0}]   ;;  %s320_s7 = inlined_call_operand.vmem [shape: f32[8,512], index: 7, kind: output, shape index: {1}]  }
   0x1   :  { %v25_v0 = vld [vmem:[%s313_s0] sm:$0xff]  ;;  %v26_v4 = vld [vmem:[%s313_s0 + $0x8] sm:$0xff]  ;;  %v27_v8 = vld [vmem:[%s313_s0 + $0x10] sm:$0xff] }
   0x2   :  { %v29_v1 = vld [vmem:[%s314_s1] sm:$0xff]  ;;  %v137_v2 = vmul.f32 -1.442695, %v25_v0  ;;  %v30_v5 = vld [vmem:[%s314_s1 + $0x8] sm:$0xff]  ;;  %v138_v6 = vmul.f32 -1.442695, %v26_v4 }
   0x3   :  { %v141_v3 = vmul.f32 -1.442695, %v29_v1  ;;  %v142_v7 = vmul.f32 -1.442695, %v30_v5  ;;  %v31_v9 = vld [vmem:[%s314_s1 + $0x10] sm:$0xff]  ;;  %v28_v12 = vld [vmem:[%s313_s0 + $0x18] sm:$0xff] }
   0x4   :  { %145 = vpow2.f32 %v137_v2  ;;  %v139_v10 = vmul.f32 -1.442695, %v27_v8  ;;  %v143_v11 = vmul.f32 -1.442695, %v31_v9  ;;  %v32_v13 = vld [vmem:[%s314_s1 + $0x18] sm:$0xff]  ;;  %v33_v32 = vld [vmem:[%s315_s2] sm:$0xff] }
   0x5   :  { %147 = vpow2.f32 %v141_v3  ;;  %v140_v14 = vmul.f32 -1.442695, %v28_v12  ;;  %v144_v15 = vmul.f32 -1.442695, %v32_v13  ;;  %v37_v33 = vld [vmem:[%s316_s3] sm:$0xff]  ;;  %v34_v37 = vld [vmem:[%s315_s2 + $0x8] sm:$0xff] }
   0x6   :  { %149 = vpow2.f32 %v138_v6  ;;  %v41_v34 = vld [vmem:[%s317_s4] sm:$0xff]  ;;  %v38_v38 = vld [vmem:[%s316_s3 + $0x8] sm:$0xff]  ;;  %v35_v46 = vld [vmem:[%s315_s2 + $0x10] sm:$0xff] }
   0x7   :  { %151 = vpow2.f32 %v142_v7  ;;  %v45_v35 = vld [vmem:[%s318_s5] sm:$0xff]  ;;  %v42_v41 = vld [vmem:[%s317_s4 + $0x8] sm:$0xff]  ;;  %v39_v48 = vld [vmem:[%s316_s3 + $0x10] sm:$0xff] }
   0x8   :  { %153 = vpow2.f32 %v139_v10  ;;  %v46_v43 = vld [vmem:[%s318_s5 + $0x8] sm:$0xff]  ;;  %v43_v51 = vld [vmem:[%s317_s4 + $0x10] sm:$0xff]  ;;  %v36_v57 = vld [vmem:[%s315_s2 + $0x18] sm:$0xff] }
   0x9   :  { %155 = vpow2.f32 %v143_v11  ;;  %v47_v53 = vld [vmem:[%s318_s5 + $0x10] sm:$0xff]  ;;  %v40_v60 = vld [vmem:[%s316_s3 + $0x18] sm:$0xff] }
   0xa   :  { %157 = vpow2.f32 %v140_v14  ;;  %v44_v63 = vld [vmem:[%s317_s4 + $0x18] sm:$0xff] }
   0xb   :  { %159 = vpow2.f32 %v144_v15  ;;  %v48_v1 = vld [vmem:[%s318_s5 + $0x18] sm:$0xff] }
   0xe   :  { %v146_v16 = vpop.eup %145 }
   0xf   :  { %v148_v17 = vpop.eup %147  ;;  %v61_v18 = vadd.f32 1.0, %v146_v16 }
  0x10   :  { %v150_v19 = vpop.eup %149  ;;  %v85_v20 = vadd.f32 1.0, %v148_v17 }
  0x11   :  { %v152_v21 = vpop.eup %151  ;;  %161 = vrcp.f32 %v61_v18  ;;  %v62_v22 = vadd.f32 1.0, %v150_v19 }
  0x12   :  { %v154_v23 = vpop.eup %153  ;;  %163 = vrcp.f32 %v85_v20  ;;  %v86_v24 = vadd.f32 1.0, %v152_v21 }
  0x13   :  { %v156_v25 = vpop.eup %155  ;;  %165 = vrcp.f32 %v62_v22  ;;  %v63_v26 = vadd.f32 1.0, %v154_v23 }
  0x14   :  { %v158_v27 = vpop.eup %157  ;;  %167 = vrcp.f32 %v86_v24  ;;  %v87_v28 = vadd.f32 1.0, %v156_v25 }
  0x15   :  { %v160_v29 = vpop.eup %159  ;;  %169 = vrcp.f32 %v63_v26  ;;  %v64_v30 = vadd.f32 1.0, %v158_v27 }
  0x16   :  { %171 = vrcp.f32 %v87_v28  ;;  %v88_v31 = vadd.f32 1.0, %v160_v29 }
  0x17   :  { %173 = vrcp.f32 %v64_v30 }
  0x18   :  { %175 = vrcp.f32 %v88_v31 }
  0x1b   :  { %v162_v36 = vpop.eup %161 }
  0x1c   :  { %v164_v39 = vpop.eup %163  ;;  %v97_v40 = vmul.f32 %v162_v36, %v33_v32  ;;  %v109_v42 = vmul.f32 %v162_v36, %v37_v33 }
  0x1d   :  { %v166_v44 = vpop.eup %165  ;;  %v101_v45 = vmul.f32 %v164_v39, %v41_v34  ;;  %v113_v47 = vmul.f32 %v164_v39, %v45_v35 }
  0x1e   :  { %v168_v49 = vpop.eup %167  ;;  %v98_v50 = vmul.f32 %v166_v44, %v34_v37  ;;  %v110_v52 = vmul.f32 %v166_v44, %v38_v38 }
  0x1f   :  { %v170_v54 = vpop.eup %169  ;;  %v105_v55 = vadd.f32 %v101_v45, %v97_v40  ;;  %v102_v56 = vmul.f32 %v168_v49, %v42_v41  ;;  %v117_v58 = vadd.f32 %v113_v47, %v109_v42  ;;  %v114_v59 = vmul.f32 %v168_v49, %v46_v43 }
  0x20   :  { %v172_v61 = vpop.eup %171  ;;  %v99_v62 = vmul.f32 %v170_v54, %v35_v46  ;;  %v111_v0 = vmul.f32 %v170_v54, %v39_v48 }
  0x21   :  { %v174_v2 = vpop.eup %173  ;;  %121 = vst [vmem:[%s319_s6] sm:$0xff] %v105_v55  ;;  %v106_v3 = vadd.f32 %v102_v56, %v98_v50  ;;  %v103_v4 = vmul.f32 %v172_v61, %v43_v51  ;;  %125 = vst [vmem:[%s320_s7] sm:$0xff] %v117_v58  ;;  %v118_v5 = vadd.f32 %v114_v59, %v110_v52 }
  0x22   :  { %v115_v6 = vmul.f32 %v172_v61, %v47_v53  ;;  %v176_v7 = vpop.eup %175  ;;  %v100_v8 = vmul.f32 %v174_v2, %v36_v57  ;;  %v112_v9 = vmul.f32 %v174_v2, %v40_v60 }
  0x23   :  { %122 = vst [vmem:[%s319_s6 + $0x8] sm:$0xff] %v106_v3  ;;  %v107_v10 = vadd.f32 %v103_v4, %v99_v62  ;;  %v104_v11 = vmul.f32 %v176_v7, %v44_v63  ;;  %126 = vst [vmem:[%s320_s7 + $0x8] sm:$0xff] %v118_v5  ;;  %v116_v13 = vmul.f32 %v176_v7, %v48_v1 }
  0x24   :  { %v119_v12 = vadd.f32 %v115_v6, %v111_v0 }
  0x25   :  { %123 = vst [vmem:[%s319_s6 + $0x10] sm:$0xff] %v107_v10  ;;  %v108_v14 = vadd.f32 %v104_v11, %v100_v8  ;;  %v120_v15 = vadd.f32 %v116_v13, %v112_v9 }
  0x26   :  { %127 = vst [vmem:[%s320_s7 + $0x10] sm:$0xff] %v119_v12 }
  0x27   :  { %124 = vst [vmem:[%s319_s6 + $0x18] sm:$0xff] %v108_v14  ;;  %128 = vst [vmem:[%s320_s7 + $0x18] sm:$0xff] %v120_v15 }

// kernel: blendnet_forward.18
= control target key start
LH: loop header
LB: loop body
LE: loop exit
PB: predicated region body
PF: predicated region fallthrough
CT: control target
= control target key end

     0   :  { %s712_s15 = smov 0   ;;  %s714_s16 = smov 0   ;;  %s773_s0 = inlined_call_operand.vmem [shape: bf16[2,8,384], index: 0, kind: input, shape index: {}, may-alias: {0,1}]   ;;  %s774_s1 = inlined_call_operand.vmem [shape: bf16[2,8,384], index: 1, kind: input, shape index: {}, may-alias: {0,1}]   ;;  %s775_s2 = inlined_call_operand.vmem [shape: bf16[3,8,8], index: 2, kind: input, shape index: {}]   ;;  %s776_s3 = inlined_call_operand.vmem [shape: f32[8,1], index: 3, kind: input, shape index: {}]   ;;  %s777_s4 = inlined_call_operand.vmem [shape: f32[2,8,256], index: 4, kind: output, shape index: {}]  }
   0x1   :  { %s716_s17 = smov 0  }
   0x2 LB: > { %s26_s18 = sadd.s32 1, %s678_s16  ;;  %p607_p0 = scmp.ge.s32.totalorder %s682_s17, 1  ;;  %s682_s17 = sphi %s716_s17, %s14_s17   ;;  %s678_s16 = sphi %s714_s16, %s779_s16   ;;  %s674_s15 = sphi %s712_s15, %s778_s15  }
   0x3   : > { %p28_p1 = scmp.ge.s32.totalorder %s26_s18, 2  ;;  %p214_p2 = scmp.lt.s32.totalorder %s682_s17, 3 }
   0x5   : > { %s781_s18 = smov (%p28_p1, %s26_s18), 0  ;;  %p215_p3 = pnand %p607_p0, %p214_p2 }
   0x6   : > { %p267_p4 = scmp.lt.s32.totalorder (!%p215_p3), %s674_s15, 1  ;;  %v684_v0 = vmov (!%p215_p3), 0   ;;  %vm327_vm0 = vcmask (!%p215_p3), 1043456   ;;  %s685_s27 = smov (!%p215_p3), 127   ;;  %vm323_vm1 = vcmask (!%p215_p3), 64512   ;;  %v488_v7 = vld [vmem:[%s776_s3] sm:$0xff] (!%p215_p3) }
   0x7   : > { %218 = sbr.rel (%p215_p3) target bundleno = 371 (0x173), region = 36  ;;  %366 = vmatprep.mubr.bf16.mxu0 (!%p215_p3), %v684_v0  ;;  %416 = vmatprep.mubr.bf16.mxu1 (!%p215_p3), %v684_v0  ;;  %v310_v6 = vld [vmem:[%s775_s2] sm:$0xf] (!%p215_p3)  ;;  %s686_s30 = smov (!%p215_p3), 126   ;;  %vm320_vm2 = vcmask (!%p215_p3), 1039360   ;;  %vm433_vm3 = vcmask (!%p215_p3), 1031168  }
   0x8   : > { %657 = vset.pattern.permute.xlu0 (!%p215_p3), %v684_v0  ;;  %v614_v16 = vld [vmem:[%s775_s2 + $0x4] sm:$0xf] (!%p215_p3)  ;;  %v619_v21 = vld [vmem:[%s775_s2 + $0x8] sm:$0xf] (!%p215_p3) }
   0xe   : > { %s783_s15 = smov (!%p267_p4, %s674_s15), 1 }
   0xf   : > { %s627_s19 = smul.u32 12, %s783_s15  ;;  %s626_s11 = sshll.u32 %s783_s15, 4 }
  0x10   : > { %s300_s14 = scalar_lea.vmem %s777_s4, %s626_s11 }
  0x11   : > { %s625_s20 = sadd.s32 8, %s627_s19  ;;  %s274_s23 = scalar_lea.vmem %s773_s0, %s627_s19 }
  0x12   : > { %s289_s26 = scalar_lea.vmem %s774_s1, %s625_s20  ;;  %v303_v1 = vld [vmem:[%s274_s23] sm:$0xff] }
  0x13   : > { %v304_v2 = vld [vmem:[%s289_s26] sm:$0xf]  ;;  %v612_v3 = vcombine.low %v303_v1, %v303_v1  ;;  %v613_v4 = vcombine.high %v303_v1, %v303_v1 }
  0x14   : > { %318 = vrot.lane.b32.xlu1 %v304_v2, %s685_s27 }
  0x15   : > { %314 = vrot.lane.b32.xlu0 %v612_v3, %s685_s27  ;;  %617 = vmatprep.subr.msk.bf16.mxu1 %vm327_vm0, %v613_v4  ;;  %v379_v5 = vsel %vm327_vm0, %v612_v3, 0 }
  0x16   : > { %385 = vmatpush1.bf16.msra.mxu1 %v379_v5 }
  0x18   : > { %427 = vrot.lane.b32.xlu1 %v612_v3, %s686_s30 }
  0x19   : > { %316 = vrot.lane.b32.xlu0 %v613_v4, %s685_s27  ;;  %618 = vmatmul.mubr.msk.bf16.vlgmr.msra.gmra.mrb[0].mxu1 %vm323_vm1, %v310_v6 }
  0x1c   : > { %431 = vrot.lane.b32.xlu1 %v304_v2, %s686_s30 }
  0x1d   : > { %429 = vrot.lane.b32.xlu0 %v613_v4, %s686_s30 }
  0x21   : > { %491 = vperm.xlu0 %657, %v488_v7  }
  0x86   : > { %v319_v8 = vpop.permute.xlu1 %318 }
  0x87   : > { %v315_v9 = vpop.permute.xlu0 %314 }
  0x8a   : > { %v428_v10 = vpop.permute.xlu1 %427 }
  0x8b   : > { %v317_v11 = vpop.permute.xlu0 %316 }
  0x8c   : > { %v322_v12 = vsel %vm320_vm2, %v317_v11, %v319_v8  ;;  %v321_v13 = vsel %vm320_vm2, %v315_v9, %v317_v11 }
  0x8d   : > { %615 = vmatprep.subr.msk.bf16.mxu0 %vm327_vm0, %v322_v12  ;;  %v329_v14 = vsel %vm327_vm0, %v321_v13, 0 }
  0x8e   : > { %335 = vmatpush1.bf16.msra.mxu0 %v329_v14  ;;  %v432_v15 = vpop.permute.xlu1 %431 }
  0x8f   : > { %v430_v17 = vpop.permute.xlu0 %429 }
  0x90   : > { %v434_v18 = vsel %vm433_vm3, %v428_v10, %v430_v17  ;;  %v435_v19 = vsel %vm433_vm3, %v430_v17, %v432_v15 }
  0x91   : > { %v440_v20 = vsel %vm327_vm0, %v434_v18, 0  ;;  %616 = vmatmul.mubr.msk.bf16.vlgmr.msra.gmra.mrb[0].mxu0 %vm323_vm1, %v614_v16  ;;  %620 = vmatprep.subr.msk.bf16.mxu0 %vm327_vm0, %v435_v19 }
  0x92   : > { %446 = vmatpush1.bf16.msra.mxu0 %v440_v20  ;;  %477 = vmatprep.mubr.bf16.mxu0 %v684_v0 }
  0x99   : > { %621 = vmatmul.mubr.msk.bf16.vlgmr.msra.gmra.mrb[4].mxu0 %vm323_vm1, %v619_v21 }
  0xa0   : > { %v492_v33 = vpop.permute.xlu0 %491 }
  0xec   : > { %v418_v22 = vpop.f32.mrb[0].mxu1 }
  0xed   : > { %v420_v23 = vpop.f32.mrb[1].mxu1 }
  0xee   : > { %v422_v24 = vpop.f32.mrb[2].mxu1 }
  0xef   : > { %v423_v25 = vpop.f32.mrb[3].mxu1 }
 0x164   : > { %v368_v26 = vpop.f32.mrb[0].mxu0 }
 0x165   : > { %v419_v27 = vadd.f32 %v418_v22, %v368_v26  ;;  %v370_v28 = vpop.f32.mrb[1].mxu0 }
 0x166   : > { %v421_v29 = vadd.f32 %v420_v23, %v370_v28  ;;  %v372_v30 = vpop.f32.mrb[2].mxu0 }
 0x167   : > { %v373_v31 = vpop.f32.mrb[3].mxu0 }
 0x16c   : > { %v479_v32 = vpop.f32.mrb[4].mxu0 }
 0x16d   : > { %v486_v34 = vadd.f32 %v479_v32, %v419_v27  ;;  %v481_v35 = vpop.f32.mrb[5].mxu0 }
 0x16e   : > { %v487_v36 = vadd.f32 %v481_v35, %v421_v29  ;;  %v483_v37 = vpop.f32.mrb[6].mxu0 }
 0x16f   : > { %v494_v38 = vadd.f32 %v492_v33, %v486_v34  ;;  %v484_v39 = vpop.f32.mrb[7].mxu0 }
 0x170   : > { %v495_v40 = vadd.f32 %v492_v33, %v487_v36 }
 0x171   : > { %496 = vst [vmem:[%s300_s14] sm:$0xff] %v494_v38 }
 0x172   : > { %497 = vst [vmem:[%s300_s14 + $0x8] sm:$0xff] %v495_v40 }
 0x173 PF: > { %s14_s17 = sadd.s32 1, %s682_s17   ;;  %s778_s15 = smov %s678_s16 }
 0x174   : > { %p11_p5 = scmp.ge.s32.totalorder %s14_s17, 4   ;;  %s779_s16 = smov %s781_s18 }
 0x176   :  { %13 = sbr.rel (!%p11_p5) target bundleno = 2 (0x2), region = 71 }

// kernel: blendnet_forward.19
= control target key start
LH: loop header
LB: loop body
LE: loop exit
PB: predicated region body
PF: predicated region fallthrough
CT: control target
= control target key end

     0   :  { %s538_s12 = smov 0   ;;  %s540_s13 = smov 0   ;;  %s577_s0 = inlined_call_operand.vmem [shape: f32[2,8,256], index: 0, kind: input, shape index: {}]   ;;  %s578_s1 = inlined_call_operand.vmem [shape: f32[8,1], index: 1, kind: input, shape index: {}]   ;;  %s579_s2 = inlined_call_operand.vmem [shape: f32[8,1], index: 2, kind: input, shape index: {}]   ;;  %s580_s3 = inlined_call_operand.vmem [shape: bf16[2,8,256], index: 3, kind: output, shape index: {}]  }
   0x1   :  { %s542_s14 = smov 0  }
   0x2 LB: > { %s32_s15 = sadd.s32 1, %s511_s13  ;;  %p456_p0 = scmp.ge.s32.totalorder %s515_s14, 1  ;;  %s515_s14 = sphi %s542_s14, %s13_s14   ;;  %s511_s13 = sphi %s540_s13, %s582_s13   ;;  %s507_s12 = sphi %s538_s12, %s581_s12  }
   0x3   : > { %p34_p1 = scmp.ge.s32.totalorder %s32_s15, 2  ;;  %p191_p2 = scmp.lt.s32.totalorder %s515_s14, 3 }
   0x5   : > { %s584_s15 = smov (%p34_p1, %s32_s15), 0  ;;  %p192_p3 = pnand %p456_p0, %p191_p2 }
   0x6   : > { %v277_v0 = vld [vmem:[%s578_s1] sm:$0xff] (!%p192_p3)  ;;  %v517_v1 = vmov (!%p192_p3), 0   ;;  %p240_p4 = scmp.lt.s32.totalorder (!%p192_p3), %s507_s12, 1 }
   0x7   : > { %195 = sbr.rel (%p192_p3) target bundleno = 148 (0x94), region = 32  ;;  %492 = vset.pattern.permute.xlu0 (!%p192_p3), %v517_v1  ;;  %v285_v2 = vld [vmem:[%s579_s2] sm:$0xff] (!%p192_p3) }
   0x8   : > { %280 = vperm.xlu0 (!%p192_p3), %492, %v277_v0  }
   0xc   : > { %288 = vperm.xlu0 (!%p192_p3), %492, %v285_v2  }
   0xe   : > { %s586_s12 = smov (!%p240_p4, %s507_s12), 1 }
   0xf   : > { %s464_s20 = sshll.u32 %s586_s12, 4  ;;  %s465_s24 = sshll.u32 %s586_s12, 3 }
  0x10   : > { %s251_s23 = scalar_lea.vmem %s577_s0, %s464_s20  ;;  %s273_s27 = scalar_lea.vmem %s580_s3, %s465_s24 }
  0x11   : > { %v275_v4 = vld [vmem:[%s251_s23] sm:$0xff]  ;;  %v276_v5 = vld [vmem:[%s251_s23 + $0x8] sm:$0xff] }
  0x87   : > { %v281_v3 = vpop.permute.xlu0 %280 }
  0x88   : > { %v283_v6 = vmul.f32 %v281_v3, %v275_v4  ;;  %v284_v7 = vmul.f32 %v281_v3, %v276_v5 }
  0x8b   : > { %v289_v8 = vpop.permute.xlu0 %288 }
  0x8c   : > { %v291_v9 = vadd.f32 %v289_v8, %v283_v6  ;;  %v292_v10 = vadd.f32 %v289_v8, %v284_v7 }
  0x8e   : > { %vm293_vm0 = vcmp.ge.f32.partialorder %v291_v9, 0.0  ;;  %vm294_vm1 = vcmp.ge.f32.partialorder %v292_v10, 0.0  ;;  %v295_v11 = vmul.f32 0.01, %v291_v9  ;;  %v296_v12 = vmul.f32 0.01, %v292_v10 }
  0x90   : > { %v297_v13 = vsel %vm293_vm0, %v291_v9, %v295_v11  ;;  %v298_v14 = vsel %vm294_vm1, %v292_v10, %v296_v12 }
  0x91   : > { %v466_v15 = vpack.c.bf16 %v298_v14, %v297_v13 }
  0x93   : > { %307 = vst [vmem:[%s273_s27] sm:$0xff] %v466_v15 }
  0x94 PF: > { %s13_s14 = sadd.s32 1, %s515_s14   ;;  %s581_s12 = smov %s511_s13 }
  0x95   : > { %p10_p5 = scmp.ge.s32.totalorder %s13_s14, 4   ;;  %s582_s13 = smov %s584_s15 }
  0x97   :  { %12 = sbr.rel (!%p10_p5) target bundleno = 2 (0x2), region = 68 }

// kernel: blendnet_forward.21
= control target key start
LH: loop header
LB: loop body
LE: loop exit
PB: predicated region body
PF: predicated region fallthrough
CT: control target
= control target key end

     0   :  { %s591_s12 = smov 0   ;;  %s593_s13 = smov 0   ;;  %s636_s0 = inlined_call_operand.vmem [shape: f32[2,16,256], index: 0, kind: input, shape index: {}]   ;;  %s637_s1 = inlined_call_operand.vmem [shape: f32[16,1], index: 1, kind: input, shape index: {}]   ;;  %s638_s2 = inlined_call_operand.vmem [shape: f32[16,1], index: 2, kind: input, shape index: {}]   ;;  %s639_s3 = inlined_call_operand.vmem [shape: bf16[2,16,256], index: 3, kind: output, shape index: {}]  }
   0x1   :  { %s595_s14 = smov 0  }
   0x2 LB: > { %s32_s15 = sadd.s32 1, %s564_s13  ;;  %p506_p0 = scmp.ge.s32.totalorder %s568_s14, 1  ;;  %s568_s14 = sphi %s595_s14, %s13_s14   ;;  %s564_s13 = sphi %s593_s13, %s641_s13   ;;  %s560_s12 = sphi %s591_s12, %s640_s12  }
   0x3   : > { %p34_p1 = scmp.ge.s32.totalorder %s32_s15, 2  ;;  %p197_p2 = scmp.lt.s32.totalorder %s568_s14, 3 }
   0x5   : > { %s643_s15 = smov (%p34_p1, %s32_s15), 0  ;;  %p198_p3 = pnand %p506_p0, %p197_p2 }
   0x6   : > { %v313_v0 = vld [vmem:[%s638_s2] sm:$0xff] (!%p198_p3)  ;;  %v570_v2 = vmov (!%p198_p3), 0   ;;  %v314_v3 = vld [vmem:[%s638_s2 + $0x8] sm:$0xff] (!%p198_p3)  ;;  %p251_p4 = scmp.lt.s32.totalorder (!%p198_p3), %s560_s12, 1 }
   0x7   : > { %201 = sbr.rel (%p198_p3) target bundleno = 151 (0x97), region = 32  ;;  %v297_v1 = vld [vmem:[%s637_s1] sm:$0xff] (!%p198_p3)  ;;  %545 = vset.pattern.permute.xlu1 (!%p198_p3), %v570_v2  ;;  %544 = vset.pattern.permute.xlu0 (!%p198_p3), %v570_v2  ;;  %v298_v4 = vld [vmem:[%s637_s1 + $0x8] sm:$0xff] (!%p198_p3) }
   0x8   : > { %317 = vperm.xlu1 (!%p198_p3), %545, %v313_v0   ;;  %301 = vperm.xlu0 (!%p198_p3), %544, %v297_v1  }
   0xc   : > { %322 = vperm.xlu1 (!%p198_p3), %545, %v314_v3   ;;  %306 = vperm.xlu0 (!%p198_p3), %544, %v298_v4  }
   0xe   : > { %s645_s12 = smov (!%p251_p4, %s560_s12), 1 }
   0xf   : > { %s515_s24 = sshll.u32 %s645_s12, 5  ;;  %s516_s28 = sshll.u32 %s645_s12, 4 }
  0x10   : > { %s262_s27 = scalar_lea.vmem %s636_s0, %s515_s24  ;;  %s290_s4 = scalar_lea.vmem %s639_s3, %s516_s28 }
  0x11   : > { %v293_v5 = vld [vmem:[%s262_s27] sm:$0xff]  ;;  %v294_v6 = vld [vmem:[%s262_s27 + $0x8] sm:$0xff]  ;;  %v295_v13 = vld [vmem:[%s262_s27 + $0x10] sm:$0xff] }
  0x12   : > { %v296_v14 = vld [vmem:[%s262_s27 + $0x18] sm:$0xff] }
  0x87   : > { %v302_v7 = vpop.permute.xlu0 %301  ;;  %v318_v8 = vpop.permute.xlu1 %317 }
  0x88   : > { %v309_v9 = vmul.f32 %v302_v7, %v293_v5  ;;  %v310_v10 = vmul.f32 %v302_v7, %v294_v6 }
  0x8a   : > { %v325_v11 = vadd.f32 %v318_v8, %v309_v9  ;;  %v326_v12 = vadd.f32 %v318_v8, %v310_v10 }
  0x8b   : > { %v307_v15 = vpop.permute.xlu0 %306  ;;  %v323_v22 = vpop.permute.xlu1 %322 }
  0x8c   : > { %vm329_vm0 = vcmp.ge.f32.partialorder %v325_v11, 0.0  ;;  %vm330_vm1 = vcmp.ge.f32.partialorder %v326_v12, 0.0  ;;  %v333_v16 = vmul.f32 0.01, %v325_v11  ;;  %v334_v17 = vmul.f32 0.01, %v326_v12 }
  0x8d   : > { %v311_v18 = vmul.f32 %v307_v15, %v295_v13  ;;  %v312_v19 = vmul.f32 %v307_v15, %v296_v14 }
  0x8e   : > { %v337_v20 = vsel %vm329_vm0, %v325_v11, %v333_v16  ;;  %v338_v21 = vsel %vm330_vm1, %v326_v12, %v334_v17 }
  0x8f   : > { %v517_v23 = vpack.c.bf16 %v338_v21, %v337_v20  ;;  %v327_v24 = vadd.f32 %v323_v22, %v311_v18  ;;  %v328_v25 = vadd.f32 %v323_v22, %v312_v19 }
  0x91   : > { %vm331_vm2 = vcmp.ge.f32.partialorder %v327_v24, 0.0  ;;  %vm332_vm3 = vcmp.ge.f32.partialorder %v328_v25, 0.0  ;;  %v335_v26 = vmul.f32 0.01, %v327_v24  ;;  %v336_v27 = vmul.f32 0.01, %v328_v25  ;;  %353 = vst [vmem:[%s290_s4] sm:$0xff] %v517_v23 }
  0x93   : > { %v339_v28 = vsel %vm331_vm2, %v327_v24, %v335_v26  ;;  %v340_v29 = vsel %vm332_vm3, %v328_v25, %v336_v27 }
  0x94   : > { %v518_v30 = vpack.c.bf16 %v340_v29, %v339_v28 }
  0x96   : > { %354 = vst [vmem:[%s290_s4 + $0x8] sm:$0xff] %v518_v30 }
  0x97 PF: > { %s13_s14 = sadd.s32 1, %s568_s14   ;;  %s640_s12 = smov %s564_s13 }
  0x98   : > { %p10_p5 = scmp.ge.s32.totalorder %s13_s14, 4   ;;  %s641_s13 = smov %s643_s15 }
  0x9a   :  { %12 = sbr.rel (!%p10_p5) target bundleno = 2 (0x2), region = 68 }

// kernel: blendnet_forward.20
= control target key start
LH: loop header
LB: loop body
LE: loop exit
PB: predicated region body
PF: predicated region fallthrough
CT: control target
= control target key end

     0   :  { %s765_s15 = smov 0   ;;  %s767_s16 = smov 0   ;;  %s829_s0 = inlined_call_operand.vmem [shape: bf16[2,8,384], index: 0, kind: input, shape index: {}, may-alias: {0,1}]   ;;  %s830_s1 = inlined_call_operand.vmem [shape: bf16[2,8,384], index: 1, kind: input, shape index: {}, may-alias: {0,1}]   ;;  %s831_s2 = inlined_call_operand.vmem [shape: bf16[3,16,8], index: 2, kind: input, shape index: {}]   ;;  %s832_s3 = inlined_call_operand.vmem [shape: f32[16,1], index: 3, kind: input, shape index: {}]   ;;  %s833_s4 = inlined_call_operand.vmem [shape: f32[2,16,256], index: 4, kind: output, shape index: {}]  }
   0x1   :  { %s769_s17 = smov 0  }
   0x2 LB: > { %s26_s18 = sadd.s32 1, %s731_s16  ;;  %p643_p0 = scmp.ge.s32.totalorder %s735_s17, 1  ;;  %s735_s17 = sphi %s769_s17, %s14_s17   ;;  %s731_s16 = sphi %s767_s16, %s835_s16   ;;  %s727_s15 = sphi %s765_s15, %s834_s15  }
   0x3   : > { %p28_p1 = scmp.ge.s32.totalorder %s26_s18, 2  ;;  %p214_p2 = scmp.lt.s32.totalorder %s735_s17, 3 }
   0x5   : > { %s837_s18 = smov (%p28_p1, %s26_s18), 0  ;;  %p215_p3 = pnand %p643_p0, %p214_p2 }
   0x6   : > { %p267_p4 = scmp.lt.s32.totalorder (!%p215_p3), %s727_s15, 1  ;;  %v737_v0 = vmov (!%p215_p3), 0   ;;  %vm334_vm0 = vcmask (!%p215_p3), 1043456   ;;  %s738_s27 = smov (!%p215_p3), 127   ;;  %v710_v6 = vld [vmem:[%s831_s2] sm:$0xff] (!%p215_p3)   ;;  %vm330_vm1 = vcmask (!%p215_p3), 64512  }
   0x7   : > { %218 = sbr.rel (%p215_p3) target bundleno = 369 (0x171), region = 36  ;;  %430 = vmatprep.mubr.bf16.mxu0 (!%p215_p3), %v737_v0  ;;  %373 = vmatprep.mubr.bf16.mxu1 (!%p215_p3), %v737_v0  ;;  %s739_s30 = smov (!%p215_p3), 126   ;;  %v515_v7 = vld [vmem:[%s832_s3 + $0x8] sm:$0xff] (!%p215_p3)  ;;  %v514_v8 = vld [vmem:[%s832_s3] sm:$0xff] (!%p215_p3)  ;;  %vm327_vm2 = vcmask (!%p215_p3), 1039360   ;;  %vm455_vm3 = vcmask (!%p215_p3), 1031168  }
   0x8   : > { %706 = vset.pattern.permute.xlu0 (!%p215_p3), %v737_v0  ;;  %707 = vset.pattern.permute.xlu1 (!%p215_p3), %v737_v0  ;;  %v711_v16 = vld [vmem:[%s831_s2 + $0x8] sm:$0xff] (!%p215_p3)   ;;  %v712_v22 = vld [vmem:[%s831_s2 + $0x10] sm:$0xff] (!%p215_p3)  }
   0xe   : > { %s839_s15 = smov (!%p267_p4, %s727_s15), 1 }
   0xf   : > { %s676_s19 = smul.u32 12, %s839_s15  ;;  %s667_s13 = sshll.u32 %s839_s15, 5 }
  0x11   : > { %s666_s20 = sadd.s32 8, %s676_s19  ;;  %s274_s23 = scalar_lea.vmem %s829_s0, %s676_s19 }
  0x12   : > { %s289_s26 = scalar_lea.vmem %s830_s1, %s666_s20  ;;  %v303_v1 = vld [vmem:[%s274_s23] sm:$0xff]  ;;  %s300_s20 = scalar_lea.vmem %s833_s4, %s667_s13 }
  0x13   : > { %v304_v2 = vld [vmem:[%s289_s26] sm:$0xf]  ;;  %v648_v3 = vcombine.low %v303_v1, %v303_v1  ;;  %v649_v4 = vcombine.high %v303_v1, %v303_v1 }
  0x14   : > { %325 = vrot.lane.b32.xlu1 %v304_v2, %s738_s27 }
  0x15   : > { %321 = vrot.lane.b32.xlu0 %v648_v3, %s738_s27  ;;  %656 = vmatprep.subr.msk.bf16.mxu0 %vm334_vm0, %v649_v4  ;;  %v393_v5 = vsel %vm334_vm0, %v648_v3, 0 }
  0x16   : > { %399 = vmatpush1.bf16.msra.mxu0 %v393_v5 }
  0x18   : > { %449 = vrot.lane.b32.xlu1 %v648_v3, %s739_s30 }
  0x19   : > { %323 = vrot.lane.b32.xlu0 %v649_v4, %s738_s27  ;;  %657 = vmatmul.mubr.msk.bf16.vlgmr.msra.gmra.mrb[0].mxu0 %vm330_vm1, %v710_v6 }
  0x1a   : > { %499 = vmatprep.mubr.bf16.mxu0 %v737_v0 }
  0x1c   : > { %453 = vrot.lane.b32.xlu1 %v304_v2, %s739_s30 }
  0x1d   : > { %451 = vrot.lane.b32.xlu0 %v649_v4, %s739_s30 }
  0x20   : > { %523 = vperm.xlu1 %707, %v515_v7  }
  0x21   : > { %518 = vperm.xlu0 %706, %v514_v8  }
  0x86   : > { %v326_v9 = vpop.permute.xlu1 %325 }
  0x87   : > { %v322_v10 = vpop.permute.xlu0 %321 }
  0x8a   : > { %v450_v11 = vpop.permute.xlu1 %449 }
  0x8b   : > { %v324_v12 = vpop.permute.xlu0 %323 }
  0x8c   : > { %v329_v13 = vsel %vm327_vm2, %v324_v12, %v326_v9  ;;  %v328_v14 = vsel %vm327_vm2, %v322_v10, %v324_v12 }
  0x8d   : > { %653 = vmatprep.subr.msk.bf16.mxu1 %vm334_vm0, %v329_v13  ;;  %v336_v15 = vsel %vm334_vm0, %v328_v14, 0 }
  0x8e   : > { %342 = vmatpush1.bf16.msra.mxu1 %v336_v15  ;;  %v454_v17 = vpop.permute.xlu1 %453 }
  0x8f   : > { %v452_v18 = vpop.permute.xlu0 %451 }
  0x90   : > { %v456_v19 = vsel %vm455_vm3, %v450_v11, %v452_v18  ;;  %v457_v20 = vsel %vm455_vm3, %v452_v18, %v454_v17 }
  0x91   : > { %v462_v21 = vsel %vm334_vm0, %v456_v19, 0  ;;  %661 = vmatprep.subr.msk.bf16.mxu0 %vm334_vm0, %v457_v20  ;;  %654 = vmatmul.mubr.msk.bf16.vlgmr.msra.gmra.mrb[0].mxu1 %vm330_vm1, %v711_v16 }
  0x92   : > { %468 = vmatpush1.bf16.msra.mxu0 %v462_v21 }
  0x95   : > { %662 = vmatmul.mubr.msk.bf16.vlgmr.msra.gmra.mrb[0].mxu0 %vm330_vm1, %v712_v22 }
  0x9f   : > { %v524_v33 = vpop.permute.xlu1 %523 }
  0xa0   : > { %v519_v28 = vpop.permute.xlu0 %518 }
 0x164   : > { %v375_v23 = vpop.f32.mrb[0].mxu1 }
 0x165   : > { %v377_v24 = vpop.f32.mrb[1].mxu1 }
 0x166   : > { %v379_v25 = vpop.f32.mrb[2].mxu1 }
 0x167   : > { %v381_v26 = vpop.f32.mrb[3].mxu1 }
 0x168   : > { %v501_v27 = vpop.f32.mrb[0].mxu0 }
 0x169   : > { %v668_v29 = vadd.f32 %v501_v27, %v375_v23  ;;  %v503_v30 = vpop.f32.mrb[1].mxu0 }
 0x16a   : > { %v669_v31 = vadd.f32 %v503_v30, %v377_v24  ;;  %v505_v32 = vpop.f32.mrb[2].mxu0 }
 0x16b   : > { %v526_v34 = vadd.f32 %v668_v29, %v519_v28  ;;  %v670_v35 = vadd.f32 %v505_v32, %v379_v25  ;;  %v507_v36 = vpop.f32.mrb[3].mxu0 }
 0x16c   : > { %v527_v37 = vadd.f32 %v669_v31, %v519_v28  ;;  %v671_v38 = vadd.f32 %v507_v36, %v381_v26 }
 0x16d   : > { %530 = vst [vmem:[%s300_s20] sm:$0xff] %v526_v34  ;;  %v528_v39 = vadd.f32 %v670_v35, %v524_v33 }
 0x16e   : > { %531 = vst [vmem:[%s300_s20 + $0x8] sm:$0xff] %v527_v37  ;;  %v529_v40 = vadd.f32 %v671_v38, %v524_v33 }
 0x16f   : > { %532 = vst [vmem:[%s300_s20 + $0x10] sm:$0xff] %v528_v39 }
 0x170   : > { %533 = vst [vmem:[%s300_s20 + $0x18] sm:$0xff] %v529_v40 }
 0x171 PF: > { %s14_s17 = sadd.s32 1, %s735_s17   ;;  %s834_s15 = smov %s731_s16 }
 0x172   : > { %p11_p5 = scmp.ge.s32.totalorder %s14_s17, 4   ;;  %s835_s16 = smov %s837_s18 }
 0x174   :  { %13 = sbr.rel (!%p11_p5) target bundleno = 2 (0x2), region = 71 }

// kernel: squeeze.23
= control target key start
LH: loop header
LB: loop body
LE: loop exit
PB: predicated region body
PF: predicated region fallthrough
CT: control target
= control target key end

     0   :  { %vm32_vm0 = vcmask 261120   ;;  %vm74_vm1 = vcmask 916480   ;;  %vm53_vm2 = vcmask 654336   ;;  %s109_s14 = smov 96   ;;  %vm22_vm3 = vcmask 392192   ;;  %s110_s19 = smov 16   ;;  %s169_s0 = inlined_call_operand.vmem [shape: f32[1,2,2,176], index: 0, kind: input, shape index: {}]   ;;  %s170_s1 = inlined_call_operand.vmem [shape: f32[704], index: 1, kind: output, shape index: {}]  }
   0x1   :  { %v94_v0 = vld [vmem:[%s169_s0 + $0x4] sm:$0x3]  ;;  %v93_v1 = vld [vmem:[%s169_s0 + $0x6] sm:$0x3]  ;;  %v95_v2 = vld [vmem:[%s169_s0 + $0x2] sm:$0x3] }
   0x2   :  { %13 = vst [vmem:[#allocation0 + $0x10] sm:$0x3] %v94_v0  ;;  %8 = vst [vmem:[#allocation0 + $0x18] sm:$0x3] %v93_v1  ;;  %v18_v3 = vld [vmem:[%s169_s0] sm:$0x3] }
   0x3   :  { %17 = vst [vmem:[#allocation0 + $0x8] sm:$0x3] %v95_v2  ;;  %19 = vst [vmem:[#allocation0] sm:$0x3] %v18_v3  ;;  %s30_s0 = smov 3  ;;  %s111_s20 = smov 48  }
   0x4   :  { %vm36_vm4 = vcmask 130048   ;;  %vm39_vm5 = vcmask 1048320   ;;  %vm46_vm6 = vcmask 785408   ;;  %vm81_vm7 = vcmask 523392  }
   0x5   :  { %vm60_vm8 = vcmask 785792   ;;  %vm88_vm9 = vcmask 1047680   ;;  %vm67_vm10 = vcmask 1047936  }
   0x9   :  { %v43_v4 = vld [vmem:[#allocation0 + $0x10] sm:$0x1]   ;;  %v28_v5 = vld [vmem:[#allocation0 + $0x18] sm:$0x1]   ;;  %v71_v8 = vld [vmem:[#allocation0 + $0x11] sm:$0x1]  }
   0xa   :  { %v31_v6 = vld [vmem:[#allocation0 + $0x10] ss:$8 sm:%s30_s0]   ;;  %44 = vrot.lane.b32.xlu1 %v43_v4, %s109_s14  ;;  %v73_v9 = vld [vmem:[#allocation0 + $0x19] sm:$0x1]   ;;  %v52_v10 = vld [vmem:[#allocation0 + $0x9] sm:$0x1]  }
   0xb   :  { %v33_v7 = vsel %vm32_vm0, %v31_v6, %v28_v5  ;;  %v75_v11 = vsel %vm74_vm1, %v73_v9, %v71_v8  ;;  %v50_v12 = vld [vmem:[#allocation0 + $0x1] sm:$0x1]   ;;  %v25_v13 = vld [vmem:[#allocation0] sm:$0x1]   ;;  %v21_v15 = vld [vmem:[#allocation0 + $0x8] sm:$0x1]  }
   0xc   :  { %34 = vrot.lane.b32.xlu0 %v33_v7, %s109_s14  ;;  %v54_v14 = vsel %vm53_vm2, %v52_v10, %v50_v12  ;;  %26 = vst [vmem:[%s170_s1] sm:$0x1] %v25_v13   ;;  %96 = vst.msk [vmem:[%s170_s1 + $0x1] sm:$0x1] %vm22_vm3, %v21_v15   ;;  %v85_v16 = vld [vmem:[#allocation0 + $0x11] sm:$0x1]  }
   0xd   :  { %v64_v17 = vld [vmem:[#allocation0 + $0x1] sm:$0x1]  }
   0xe   :  { %76 = vrot.lane.b32.xlu1 %v75_v11, %s110_s19 }
  0x10   :  { %55 = vrot.lane.b32.xlu0 %v54_v14, %s111_s20 }
  0x12   :  { %86 = vrot.lane.b32.xlu1 %v85_v16, %s110_s19 }
  0x14   :  { %65 = vrot.lane.b32.xlu0 %v64_v17, %s111_s20 }
  0x7c   :  { %v45_v18 = vpop.permute.xlu1 %44  }
  0x7e   :  { %v35_v19 = vpop.permute.xlu0 %34  }
  0x7f   :  { %97 = vst.msk [vmem:[%s170_s1 + $0x4] sm:$0x1] %vm36_vm4, %v35_v19  }
  0x80   :  { %98 = vst.msk [vmem:[%s170_s1 + $0x2] sm:$0x3] %vm39_vm5, %v35_v19   ;;  %v77_v20 = vpop.permute.xlu1 %76  }
  0x81   :  { %99 = vst.msk [vmem:[%s170_s1 + $0x3] sm:$0x1] %vm46_vm6, %v45_v18  }
  0x82   :  { %103 = vst.msk [vmem:[%s170_s1 + $0x5] sm:$0x1] %vm36_vm4, %v77_v20   ;;  %v56_v21 = vpop.permute.xlu0 %55  }
  0x83   :  { %104 = vst.msk [vmem:[%s170_s1 + $0x5] sm:$0x1] %vm81_vm7, %v77_v20  }
  0x84   :  { %100 = vst.msk [vmem:[%s170_s1 + $0x2] sm:$0x1] %vm22_vm3, %v56_v21   ;;  %v87_v22 = vpop.permute.xlu1 %86  }
  0x85   :  { %101 = vst.msk [vmem:[%s170_s1 + $0x2] sm:$0x1] %vm60_vm8, %v56_v21  }
  0x86   :  { %105 = vst.msk [vmem:[%s170_s1 + $0x4] sm:$0x1] %vm88_vm9, %v87_v22   ;;  %v66_v23 = vpop.permute.xlu0 %65  }
  0x87   :  { %102 = vst.msk [vmem:[%s170_s1 + $0x1] sm:$0x1] %vm67_vm10, %v66_v23  }

// kernel: div.1
= control target key start
LH: loop header
LB: loop body
LE: loop exit
PB: predicated region body
PF: predicated region fallthrough
CT: control target
= control target key end

     0   :  { %s37_s0 = inlined_call_operand.vmem [shape: f32[704], index: 0, kind: input, shape index: {}]   ;;  %s38_s1 = inlined_call_operand.vmem [shape: f32[704], index: 1, kind: input, shape index: {}]   ;;  %s39_s2 = inlined_call_operand.vmem [shape: f32[704], index: 2, kind: output, shape index: {}]  }
   0x1   :  { %v4_v0 = vld [vmem:[%s38_s1] sm:$0x3f] }
   0x2   :  { %11 = vrcp.f32 %v4_v0  ;;  %v3_v1 = vld [vmem:[%s37_s0] sm:$0x3f] }
   0xc   :  { %v12_v2 = vpop.eup %11 }
   0xd   :  { %v8_v3 = vmul.f32 %v12_v2, %v3_v1 }
   0xf   :  { %10 = vst [vmem:[%s39_s2] sm:$0xff] %v8_v3 }

// kernel: blendnet_forward.22
= control target key start
LH: loop header
LB: loop body
LE: loop exit
PB: predicated region body
PF: predicated region fallthrough
CT: control target
= control target key end

     0   :  { %v384_v0 = vmov 0.0   ;;  %vm385_vm0 = vmmov 0   ;;  %v386_v3 = vmov 0   ;;  %s494_s1 = inlined_call_operand.vmem [shape: bf16[128,384], index: 1, kind: input, shape index: {}]   ;;  %s495_s2 = inlined_call_operand.vmem [shape: f32[8,1], index: 2, kind: input, shape index: {}]   ;;  %s496_s0 = inlined_call_operand.vmem [shape: bf16[8,128], index: 0, kind: input, shape index: {}]   ;;  %s497_s3 = inlined_call_operand.vmem [shape: f32[8,384], index: 3, kind: output, shape index: {}]  }
   0x1   :  { %328 = vmatprep.subr.bf16.mxu1 %v384_v0  ;;  %v352_v1 = vld [vmem:[%s494_s1 + $0x4] ss:$12 sps:$4 sm:$0xff]   ;;  %344 = vmatprep.mubr.msk.bf16.mxu1 %vm385_vm0, %v384_v0  ;;  %v354_v2 = vld [vmem:[%s494_s1 + $0x8] ss:$12 sps:$4 sm:$0xff]   ;;  %v355_v4 = vld [vmem:[%s494_s1] ss:$12 sps:$4 sm:$0xff]  }
   0x2   :  { %218 = vmatprep.mubr.bf16.mxu0 %v386_v3  ;;  %351 = vset.pattern.permute.xlu0 %v386_v3  ;;  %v356_v5 = vld [vmem:[%s494_s1 + $0x1c] ss:$12 sps:$4 sm:$0xff]   ;;  %v358_v6 = vld [vmem:[%s494_s1 + $0x20] ss:$12 sps:$4 sm:$0xff]   ;;  %v359_v7 = vld [vmem:[%s494_s1 + $0x18] ss:$12 sps:$4 sm:$0xff]  }
   0x3   :  { %186 = vmatprep.subr.bf16.mxu0 %v352_v1  ;;  %329 = vmatpush3.bf16.msra.mxu1 %v354_v2  ;;  %v360_v8 = vld [vmem:[%s494_s1 + $0x34] ss:$12 sps:$4 sm:$0xff]   ;;  %v362_v9 = vld [vmem:[%s494_s1 + $0x38] ss:$12 sps:$4 sm:$0xff]   ;;  %v363_v10 = vld [vmem:[%s494_s1 + $0x30] ss:$12 sps:$4 sm:$0xff]  }
   0x4   :  { %187 = vmatpush1.bf16.msra.mxu0 %v355_v4  ;;  %330 = vmatprep.subr.bf16.mxu1 %v384_v0  ;;  %v364_v11 = vld [vmem:[%s494_s1 + $0x4c] ss:$12 sps:$4 sm:$0xff]   ;;  %v366_v12 = vld [vmem:[%s494_s1 + $0x50] ss:$12 sps:$4 sm:$0xff]   ;;  %v367_v13 = vld [vmem:[%s494_s1 + $0x48] ss:$12 sps:$4 sm:$0xff]  }
   0x5   :  { %188 = vmatprep.subr.bf16.mxu0 %v356_v5  ;;  %v368_v14 = vld [vmem:[%s494_s1 + $0x64] ss:$12 sps:$4 sm:$0xff]   ;;  %v370_v15 = vld [vmem:[%s494_s1 + $0x68] ss:$12 sps:$4 sm:$0xff]   ;;  %v371_v16 = vld [vmem:[%s494_s1 + $0x60] ss:$12 sps:$4 sm:$0xff]  }
   0x6   :  { %v372_v17 = vld [vmem:[%s494_s1 + $0x7c] ss:$12 sps:$4 sm:$0xff]   ;;  %v374_v18 = vld [vmem:[%s494_s1 + $0x80] ss:$12 sps:$4 sm:$0xff]   ;;  %v375_v20 = vld [vmem:[%s494_s1 + $0x78] ss:$12 sps:$4 sm:$0xff]  }
   0x7   :  { %331 = vmatpush3.bf16.msra.mxu1 %v358_v6  ;;  %v279_v19 = vld [vmem:[%s495_s2] sm:$0xff]  ;;  %v379_v23 = vld [vmem:[%s494_s1 + $0x90] ss:$12 sps:$4 sm:$0xff]   ;;  %v380_v24 = vld [vmem:[%s494_s1 + $0xac] ss:$12 sps:$4 sm:$0xff]  }
   0x8   :  { %189 = vmatpush1.bf16.msra.mxu0 %v359_v7  ;;  %332 = vmatprep.subr.bf16.mxu1 %v384_v0  ;;  %v376_v21 = vld [vmem:[%s494_s1 + $0x94] ss:$12 sps:$4 sm:$0xff]   ;;  %v378_v22 = vld [vmem:[%s494_s1 + $0x98] ss:$12 sps:$4 sm:$0xff]   ;;  %v382_v25 = vld [vmem:[%s494_s1 + $0xb0] ss:$12 sps:$4 sm:$0xff]  }
   0x9   :  { %190 = vmatprep.subr.bf16.mxu0 %v360_v8  ;;  %282 = vperm.xlu0 %351, %v279_v19   ;;  %v383_v26 = vld [vmem:[%s494_s1 + $0xa8] ss:$12 sps:$4 sm:$0xff]   ;;  %v25_v27 = vld [vmem:[%s496_s0] sm:$0xf] }
   0xb   :  { %333 = vmatpush3.bf16.msra.mxu1 %v362_v9 }
   0xc   :  { %191 = vmatpush1.bf16.msra.mxu0 %v363_v10  ;;  %334 = vmatprep.subr.bf16.mxu1 %v384_v0 }
   0xd   :  { %192 = vmatprep.subr.bf16.mxu0 %v364_v11 }
   0xf   :  { %335 = vmatpush3.bf16.msra.mxu1 %v366_v12 }
  0x10   :  { %193 = vmatpush1.bf16.msra.mxu0 %v367_v13  ;;  %336 = vmatprep.subr.bf16.mxu1 %v384_v0 }
  0x11   :  { %194 = vmatprep.subr.bf16.mxu0 %v368_v14 }
  0x13   :  { %337 = vmatpush3.bf16.msra.mxu1 %v370_v15 }
  0x14   :  { %195 = vmatpush1.bf16.msra.mxu0 %v371_v16  ;;  %338 = vmatprep.subr.bf16.mxu1 %v384_v0 }
  0x15   :  { %196 = vmatprep.subr.bf16.mxu0 %v372_v17 }
  0x17   :  { %339 = vmatpush3.bf16.msra.mxu1 %v374_v18 }
  0x18   :  { %197 = vmatpush1.bf16.msra.mxu0 %v375_v20  ;;  %340 = vmatprep.subr.bf16.mxu1 %v384_v0 }
  0x19   :  { %198 = vmatprep.subr.bf16.mxu0 %v376_v21 }
  0x1b   :  { %341 = vmatpush3.bf16.msra.mxu1 %v378_v22 }
  0x1c   :  { %199 = vmatpush1.bf16.msra.mxu0 %v379_v23  ;;  %342 = vmatprep.subr.bf16.mxu1 %v384_v0 }
  0x1d   :  { %200 = vmatprep.subr.bf16.mxu0 %v380_v24 }
  0x1f   :  { %343 = vmatpush3.bf16.msra.mxu1 %v382_v25 }
  0x20   :  { %201 = vmatpush1.bf16.msra.mxu0 %v383_v26 }
  0x22   :  { %345 = vmatmul.mubr.bf16.vlgmr.msra.gmra.mrb[0].mxu1 %v25_v27 }
  0x23   :  { %219 = vmatmul.mubr.bf16.vlgmr.msra.gmra.mrb[0].mxu0 %v25_v27 }
  0x88   :  { %v283_v29 = vpop.permute.xlu0 %282 }
  0xf5   :  { %v261_v28 = vpop.f32.mrb[0].mxu1 }
  0xf6   :  { %v220_v30 = vpop.f32.mrb[0].mxu0  ;;  %v346_v31 = vpop.f32.mrb[1].mxu1  ;;  %v287_v36 = vadd.f32 %v283_v29, %v261_v28 }
  0xf7   :  { %v222_v32 = vpop.f32.mrb[1].mxu0  ;;  %v264_v33 = vpop.f32.mrb[2].mxu1  ;;  %v285_v38 = vadd.f32 %v283_v29, %v220_v30 }
  0xf8   :  { %v224_v34 = vpop.f32.mrb[2].mxu0  ;;  %v347_v35 = vpop.f32.mrb[3].mxu1  ;;  %v286_v39 = vadd.f32 %v283_v29, %v222_v32  ;;  %290 = vst [vmem:[%s497_s3 + $0x10] sm:$0xff] %v287_v36 }
  0xf9   :  { %v225_v37 = vpop.f32.mrb[3].mxu0  ;;  %288 = vst [vmem:[%s497_s3] sm:$0xff] %v285_v38 }
  0xfa   :  { %289 = vst [vmem:[%s497_s3 + $0x8] sm:$0xff] %v286_v39 }

// kernel: blendnet_forward.23
= control target key start
LH: loop header
LB: loop body
LE: loop exit
PB: predicated region body
PF: predicated region fallthrough
CT: control target
= control target key end

     0   :  { %s326_s0 = inlined_call_operand.vmem [shape: f32[8,512], index: 0, kind: input, shape index: {}]   ;;  %s327_s1 = inlined_call_operand.vmem [shape: f32[8,512], index: 1, kind: input, shape index: {}]   ;;  %s328_s2 = inlined_call_operand.vmem [shape: f32[8,512], index: 2, kind: input, shape index: {}]   ;;  %s329_s3 = inlined_call_operand.vmem [shape: f32[8,512], index: 3, kind: input, shape index: {}]   ;;  %s330_s4 = inlined_call_operand.vmem [shape: f32[8,512], index: 4, kind: input, shape index: {}]   ;;  %s331_s5 = inlined_call_operand.vmem [shape: f32[8,512], index: 5, kind: input, shape index: {}]   ;;  %s332_s6 = inlined_call_operand.vmem [shape: f32[8,512], index: 6, kind: output, shape index: {}]  }
   0x1   :  { %v23_v0 = vld [vmem:[%s326_s0] sm:$0xff]  ;;  %v24_v6 = vld [vmem:[%s326_s0 + $0x8] sm:$0xff]  ;;  %v25_v12 = vld [vmem:[%s326_s0 + $0x10] sm:$0xff] }
   0x2   :  { %v27_v1 = vld [vmem:[%s327_s1] sm:$0xff]  ;;  %v147_v3 = vmul.f32 -1.442695, %v23_v0  ;;  %v28_v7 = vld [vmem:[%s327_s1 + $0x8] sm:$0xff]  ;;  %v148_v9 = vmul.f32 -1.442695, %v24_v6 }
   0x3   :  { %v31_v2 = vld [vmem:[%s328_s2] sm:$0xff]  ;;  %v151_v4 = vmul.f32 -1.442695, %v27_v1  ;;  %v32_v8 = vld [vmem:[%s328_s2 + $0x8] sm:$0xff]  ;;  %v152_v10 = vmul.f32 -1.442695, %v28_v7 }
   0x4   :  { %v155_v5 = vmul.f32 -1.442695, %v31_v2  ;;  %159 = vpow2.f32 %v147_v3  ;;  %v156_v11 = vmul.f32 -1.442695, %v32_v8  ;;  %v29_v13 = vld [vmem:[%s327_s1 + $0x10] sm:$0xff]  ;;  %v26_v18 = vld [vmem:[%s326_s0 + $0x18] sm:$0xff] }
   0x5   :  { %161 = vpow2.f32 %v151_v4  ;;  %v33_v14 = vld [vmem:[%s328_s2 + $0x10] sm:$0xff]  ;;  %v149_v15 = vmul.f32 -1.442695, %v25_v12  ;;  %v153_v16 = vmul.f32 -1.442695, %v29_v13  ;;  %v30_v19 = vld [vmem:[%s327_s1 + $0x18] sm:$0xff] }
   0x6   :  { %163 = vpow2.f32 %v155_v5  ;;  %v157_v17 = vmul.f32 -1.442695, %v33_v14  ;;  %v34_v20 = vld [vmem:[%s328_s2 + $0x18] sm:$0xff]  ;;  %v150_v21 = vmul.f32 -1.442695, %v26_v18  ;;  %v35_v46 = vld [vmem:[%s329_s3] sm:$0xff] }
   0x7   :  { %165 = vpow2.f32 %v148_v9  ;;  %v154_v22 = vmul.f32 -1.442695, %v30_v19  ;;  %v158_v23 = vmul.f32 -1.442695, %v34_v20  ;;  %v39_v48 = vld [vmem:[%s330_s4] sm:$0xff]  ;;  %v36_v54 = vld [vmem:[%s329_s3 + $0x8] sm:$0xff] }
   0x8   :  { %167 = vpow2.f32 %v152_v10  ;;  %v43_v51 = vld [vmem:[%s331_s5] sm:$0xff]  ;;  %v40_v57 = vld [vmem:[%s330_s4 + $0x8] sm:$0xff]  ;;  %v37_v0 = vld [vmem:[%s329_s3 + $0x10] sm:$0xff] }
   0x9   :  { %169 = vpow2.f32 %v156_v11  ;;  %v44_v60 = vld [vmem:[%s331_s5 + $0x8] sm:$0xff]  ;;  %v41_v3 = vld [vmem:[%s330_s4 + $0x10] sm:$0xff]  ;;  %v38_v11 = vld [vmem:[%s329_s3 + $0x18] sm:$0xff] }
   0xa   :  { %171 = vpow2.f32 %v149_v15  ;;  %v45_v7 = vld [vmem:[%s331_s5 + $0x10] sm:$0xff]  ;;  %v42_v14 = vld [vmem:[%s330_s4 + $0x18] sm:$0xff] }
   0xb   :  { %173 = vpow2.f32 %v153_v16  ;;  %v46_v18 = vld [vmem:[%s331_s5 + $0x18] sm:$0xff] }
   0xc   :  { %175 = vpow2.f32 %v157_v17 }
   0xd   :  { %177 = vpow2.f32 %v150_v21 }
   0xe   :  { %v160_v24 = vpop.eup %159  ;;  %179 = vpow2.f32 %v154_v22 }
   0xf   :  { %v162_v25 = vpop.eup %161  ;;  %v59_v26 = vadd.f32 1.0, %v160_v24  ;;  %181 = vpow2.f32 %v158_v23 }
  0x10   :  { %v164_v27 = vpop.eup %163  ;;  %v87_v28 = vadd.f32 1.0, %v162_v25 }
  0x11   :  { %v166_v29 = vpop.eup %165  ;;  %183 = vrcp.f32 %v59_v26  ;;  %v119_v30 = vadd.f32 1.0, %v164_v27 }
  0x12   :  { %v168_v31 = vpop.eup %167  ;;  %185 = vrcp.f32 %v87_v28  ;;  %v60_v32 = vadd.f32 1.0, %v166_v29 }
  0x13   :  { %v170_v33 = vpop.eup %169  ;;  %187 = vrcp.f32 %v119_v30  ;;  %v88_v34 = vadd.f32 1.0, %v168_v31 }
  0x14   :  { %v172_v35 = vpop.eup %171  ;;  %189 = vrcp.f32 %v60_v32  ;;  %v120_v36 = vadd.f32 1.0, %v170_v33 }
  0x15   :  { %v174_v37 = vpop.eup %173  ;;  %191 = vrcp.f32 %v88_v34  ;;  %v61_v38 = vadd.f32 1.0, %v172_v35 }
  0x16   :  { %v176_v39 = vpop.eup %175  ;;  %193 = vrcp.f32 %v120_v36  ;;  %v89_v40 = vadd.f32 1.0, %v174_v37 }
  0x17   :  { %v178_v41 = vpop.eup %177  ;;  %195 = vrcp.f32 %v61_v38  ;;  %v121_v42 = vadd.f32 1.0, %v176_v39 }
  0x18   :  { %v180_v43 = vpop.eup %179  ;;  %197 = vrcp.f32 %v89_v40  ;;  %v62_v44 = vadd.f32 1.0, %v178_v41 }
  0x19   :  { %v182_v45 = vpop.eup %181  ;;  %199 = vrcp.f32 %v121_v42  ;;  %v90_v47 = vadd.f32 1.0, %v180_v43 }
  0x1a   :  { %201 = vrcp.f32 %v62_v44  ;;  %v122_v49 = vadd.f32 1.0, %v182_v45 }
  0x1b   :  { %v184_v50 = vpop.eup %183  ;;  %203 = vrcp.f32 %v90_v47 }
  0x1c   :  { %v186_v52 = vpop.eup %185  ;;  %v71_v53 = vmul.f32 %v184_v50, %v35_v46  ;;  %205 = vrcp.f32 %v122_v49 }
  0x1d   :  { %v188_v55 = vpop.eup %187  ;;  %v99_v56 = vmul.f32 %v186_v52, %v39_v48 }
  0x1e   :  { %v190_v58 = vpop.eup %189  ;;  %v131_v59 = vmul.f32 %v188_v55, %v43_v51 }
  0x1f   :  { %v192_v61 = vpop.eup %191  ;;  %v103_v62 = vadd.f32 %v99_v56, %v71_v53  ;;  %v72_v63 = vmul.f32 %v190_v58, %v36_v54 }
  0x20   :  { %v194_v1 = vpop.eup %193  ;;  %v100_v2 = vmul.f32 %v192_v61, %v40_v57 }
  0x21   :  { %v196_v4 = vpop.eup %195  ;;  %v135_v5 = vadd.f32 %v131_v59, %v103_v62  ;;  %v132_v6 = vmul.f32 %v194_v1, %v44_v60 }
  0x22   :  { %v198_v8 = vpop.eup %197  ;;  %v104_v9 = vadd.f32 %v100_v2, %v72_v63  ;;  %v73_v10 = vmul.f32 %v196_v4, %v37_v0 }
  0x23   :  { %v200_v12 = vpop.eup %199  ;;  %139 = vst [vmem:[%s332_s6] sm:$0xff] %v135_v5  ;;  %v101_v13 = vmul.f32 %v198_v8, %v41_v3 }
  0x24   :  { %v202_v15 = vpop.eup %201  ;;  %v136_v16 = vadd.f32 %v132_v6, %v104_v9  ;;  %v133_v17 = vmul.f32 %v200_v12, %v45_v7 }
  0x25   :  { %v204_v19 = vpop.eup %203  ;;  %v105_v20 = vadd.f32 %v101_v13, %v73_v10  ;;  %v74_v21 = vmul.f32 %v202_v15, %v38_v11 }
  0x26   :  { %v206_v22 = vpop.eup %205  ;;  %140 = vst [vmem:[%s332_s6 + $0x8] sm:$0xff] %v136_v16  ;;  %v102_v23 = vmul.f32 %v204_v19, %v42_v14 }
  0x27   :  { %v137_v24 = vadd.f32 %v133_v17, %v105_v20  ;;  %v134_v25 = vmul.f32 %v206_v22, %v46_v18 }
  0x28   :  { %v106_v26 = vadd.f32 %v102_v23, %v74_v21 }
  0x29   :  { %141 = vst [vmem:[%s332_s6 + $0x10] sm:$0xff] %v137_v24 }
  0x2a   :  { %v138_v27 = vadd.f32 %v134_v25, %v106_v26 }
  0x2c   :  { %142 = vst [vmem:[%s332_s6 + $0x18] sm:$0xff] %v138_v27 }

</bundles_post_ra>
